<compile_context>
chip_gen: v6e
topology: v6e:2x2x1
jax: 0.10.0
libtpu: 0.0.40
codegen_flags: <defaults>
</compile_context>

<pallas_src>
import jax
import jax.numpy as jnp
import numpy as np
from jax.experimental import pallas as pl
from jax.experimental.pallas import tpu as pltpu


# ----------------------------------------------------------------------------
# Module structure (mirrors the PyTorch Encoder, all convs bias=False).
# ----------------------------------------------------------------------------
def encoder_layer_configs(cin, cout, nf):
    return [
        # (in_ch, out_ch, kernel, stride, pad, activation)
        (cin, nf, 4, 2, 1, "relu"),
        (nf, nf * 2, 4, 2, 1, "relu"),
        (nf * 2, nf * 4, 4, 2, 1, "relu"),
        (nf * 4, nf * 8, 4, 2, 1, "relu"),
        (nf * 8, nf * 8, 4, 1, 0, "relu"),
        (nf * 8, cout, 1, 1, 0, "tanh"),
    ]


def init_encoder_params(key, cin, cout, nf):
    """Conv weights in torch layout (out_ch, in_ch, kh, kw), bias-free."""
    cfgs = encoder_layer_configs(cin, cout, nf)
    keys = jax.random.split(key, len(cfgs))
    params = []
    for k_i, (ic, oc, k, _, _, _) in zip(keys, cfgs):
        fan_in = ic * k * k
        w = jax.random.normal(k_i, (oc, ic, k, k), jnp.float32) * (1.0 / np.sqrt(fan_in))
        params.append(w)
    return params


# ----------------------------------------------------------------------------
# Host-side weight preprocessing: fold im2col + zero padding into matmul
# operands.  For a conv (k, stride s, pad p) acting on an activation stored
# as A[h, w*Cin + ci]:
#   B[oh, ow*Cout + co] = sum_di ( (S[di] @ A) @ G[di] )[oh, ow*Cout + co]
#   S[di][oh, h]                    = 1  iff h == s*oh + di - p  (else 0)
#   G[di][w*Cin+ci, ow*Cout+co]     = W[co, ci, di, dj] where w == s*ow+dj-p
# Out-of-range rows/columns simply have no entries -> zero padding for free.
# ----------------------------------------------------------------------------
def build_selection_and_weight_mats(params, cin, cout, nf, H, W):
    cfgs = encoder_layer_configs(cin, cout, nf)
    ih, iw = H, W
    sg_mats = []
    g_last = None
    for w_jnp, (ic, oc, k, s, p, _) in zip(params, cfgs):
        w_np = np.asarray(w_jnp, dtype=np.float32)          # (oc, ic, kh, kw)
        oh = (ih + 2 * p - k) // s + 1
        ow = (iw + 2 * p - k) // s + 1
        if k == 1:
            g_last = np.ascontiguousarray(w_np[:, :, 0, 0].T)   # (ic, oc)
        else:
            S = np.zeros((k, oh, ih), np.float32)
            G = np.zeros((k, iw * ic, ow * oc), np.float32)
            for di in range(k):
                for o in range(oh):
                    h = s * o + di - p
                    if 0 <= h < ih:
                        S[di, o, h] = 1.0
                for dj in range(k):
                    for o in range(ow):
                        w_in = s * o + dj - p
                        if 0 <= w_in < iw:
                            G[di, w_in * ic:(w_in + 1) * ic, o * oc:(o + 1) * oc] = (
                                w_np[:, :, di, dj].T
                            )
            sg_mats.append((S, G))
        ih, iw = oh, ow
    assert g_last is not None, "expected a final 1x1 conv layer"
    return sg_mats, g_last


# ----------------------------------------------------------------------------
# Fused Pallas kernel: the whole encoder for one batch element per grid step.
# Args: x_ref, S1, G1, S2, G2, S3, G3, S4, G4, S5, G5, Glast, o_ref.
# ----------------------------------------------------------------------------
def _encoder_kernel(x_ref, *refs):
    o_ref = refs[-1]
    w_refs = refs[:-1]
    g_last_ref = w_refs[-1]
    sg_refs = w_refs[:-1]

    a = x_ref[...]                                   # (H, W*Cin), f32, VMEM
    for li in range(0, len(sg_refs), 2):
        s_ref = sg_refs[li]                          # (k, OH, IH)
        g_ref = sg_refs[li + 1]                      # (k, IW*Cin, OW*Cout)
        k = s_ref.shape[0]
        acc = None
        for di in range(k):
            rows = jnp.dot(s_ref[di], a, preferred_element_type=jnp.float32)
            part = jnp.dot(rows, g_ref[di], preferred_element_type=jnp.float32)
            acc = part if acc is None else acc + part
        a = jnp.maximum(acc, 0.0)                    # ReLU (hidden layers)

    out = jnp.tanh(jnp.dot(a, g_last_ref[...], preferred_element_type=jnp.float32))
    o_ref[...] = out.astype(o_ref.dtype)             # (1, cout)


def encoder_forward_pallas(x_nchw, sg_mats, g_last, cout):
    B, C, H, W = x_nchw.shape
    # NCHW -> (B, H, W*C): spatial rows on sublanes, (w, c) flattened on lanes.
    a0 = jnp.transpose(x_nchw, (0, 2, 3, 1)).reshape(B, H, W * C).astype(jnp.float32)

    flat_ws = []
    in_specs = [pl.BlockSpec((None, H, W * C), lambda b: (b, 0, 0))]
    flops = 0
    for S, G in sg_mats:
        flat_ws += [jnp.asarray(S), jnp.asarray(G)]
        in_specs += [
            pl.BlockSpec(S.shape, lambda b: (0, 0, 0)),
            pl.BlockSpec(G.shape, lambda b: (0, 0, 0)),
        ]
        k, oh, ih = S.shape
        _, kin, kout = G.shape
        flops += 2 * k * (oh * ih * kin + oh * kin * kout)
    flat_ws.append(jnp.asarray(g_last))
    in_specs.append(pl.BlockSpec(g_last.shape, lambda b: (0, 0)))
    flops += 2 * g_last.shape[0] * g_last.shape[1]
    flops *= B

    bytes_accessed = int(
        a0.size * 4 + sum(int(w.size) * 4 for w in flat_ws) + B * cout * 4
    )
    cost = pl.CostEstimate(
        flops=int(flops),
        transcendentals=int(B * cout),
        bytes_accessed=bytes_accessed,
    )

    out = pl.pallas_call(
        _encoder_kernel,
        out_shape=jax.ShapeDtypeStruct((B, 1, cout), jnp.float32),
        grid=(B,),
        in_specs=in_specs,
        out_specs=pl.BlockSpec((None, 1, cout), lambda b: (b, 0, 0)),
        compiler_params=pltpu.CompilerParams(
            dimension_semantics=("parallel",),          # batch over both TCs on v7x
            vmem_limit_bytes=32 * 1024 * 1024,          # ~9 MiB needed; give headroom
        ),
        cost_estimate=cost,
    )(a0, *flat_ws)
    return out.reshape(B, cout)


# ----------------------------------------------------------------------------
# Pure-JAX reference (semantics of the PyTorch module).
# ----------------------------------------------------------------------------
def encoder_reference(x_nchw, params, cin, cout, nf):
    cfgs = encoder_layer_configs(cin, cout, nf)
    x = x_nchw.astype(jnp.float32)
    for w, (ic, oc, k, s, p, act) in zip(params, cfgs):
        x = jax.lax.conv_general_dilated(
            x, w, window_strides=(s, s), padding=[(p, p), (p, p)],
            dimension_numbers=("NCHW", "OIHW", "NCHW"),
        )
        if act == "relu":
            x = jnp.maximum(x, 0.0)
        else:
            x = jnp.tanh(x)
    return x.reshape(x.shape[0], -1)


if __name__ == "__main__":
    # 64x64 input is required so the k4/s1/p0 layer reduces 4x4 -> 1x1 and the
    # final reshape gives (B, cout), as in the PyTorch module.
    B, cin, cout, nf = 2, 3, 8, 8
    H = W = 64

    key = jax.random.PRNGKey(0)
    kx, kp = jax.random.split(key)
    x = jax.random.normal(kx, (B, cin, H, W), jnp.float32)
    params = init_encoder_params(kp, cin, cout, nf)

    sg_mats, g_last = build_selection_and_weight_mats(params, cin, cout, nf, H, W)

    out = encoder_forward_pallas(x, sg_mats, g_last, cout)
    out = jax.block_until_ready(out)

    ref = jax.block_until_ready(encoder_reference(x, params, cin, cout, nf))
    assert out.shape == (B, cout), out.shape
    np.testing.assert_allclose(np.asarray(out), np.asarray(ref), rtol=1e-3, atol=1e-3)

    print("KERNEL_OK")
</pallas_src>

<mosaic_0001>
module attributes {stable_mosaic.version = 11 : i64} {
  func.func @_encoder_kernel(%arg0: i32, %arg1: memref<1x64x192xf32, #tpu.memory_space<vmem>>, %arg2: memref<4x32x64xf32, #tpu.memory_space<vmem>>, %arg3: memref<4x192x256xf32, #tpu.memory_space<vmem>>, %arg4: memref<4x16x32xf32, #tpu.memory_space<vmem>>, %arg5: memref<4x256x256xf32, #tpu.memory_space<vmem>>, %arg6: memref<4x8x16xf32, #tpu.memory_space<vmem>>, %arg7: memref<4x256x256xf32, #tpu.memory_space<vmem>>, %arg8: memref<4x4x8xf32, #tpu.memory_space<vmem>>, %arg9: memref<4x256x256xf32, #tpu.memory_space<vmem>>, %arg10: memref<4x1x4xf32, #tpu.memory_space<vmem>>, %arg11: memref<4x256x64xf32, #tpu.memory_space<vmem>>, %arg12: memref<64x8xf32, #tpu.memory_space<vmem>>, %arg13: memref<1x1x8xf32, #tpu.memory_space<vmem>>) attributes {dimension_semantics = [#tpu.dimension_semantics<parallel>], iteration_bounds = array<i64: 2>, scalar_prefetch = 0 : i64, scratch_operands = 0 : i64, tpu.core_type = #tpu.core_type<tc>, window_params = [{transform_indices = @transform_0, window_bounds = array<i64: 1, 64, 192>}, {pipeline_mode = #tpu.pipeline_mode<synchronous>, transform_indices = @transform_1, window_bounds = array<i64: 4, 32, 64>}, {pipeline_mode = #tpu.pipeline_mode<synchronous>, transform_indices = @transform_2, window_bounds = array<i64: 4, 192, 256>}, {pipeline_mode = #tpu.pipeline_mode<synchronous>, transform_indices = @transform_3, window_bounds = array<i64: 4, 16, 32>}, {pipeline_mode = #tpu.pipeline_mode<synchronous>, transform_indices = @transform_4, window_bounds = array<i64: 4, 256, 256>}, {pipeline_mode = #tpu.pipeline_mode<synchronous>, transform_indices = @transform_5, window_bounds = array<i64: 4, 8, 16>}, {pipeline_mode = #tpu.pipeline_mode<synchronous>, transform_indices = @transform_6, window_bounds = array<i64: 4, 256, 256>}, {pipeline_mode = #tpu.pipeline_mode<synchronous>, transform_indices = @transform_7, window_bounds = array<i64: 4, 4, 8>}, {pipeline_mode = #tpu.pipeline_mode<synchronous>, transform_indices = @transform_8, window_bounds = array<i64: 4, 256, 256>}, {pipeline_mode = #tpu.pipeline_mode<synchronous>, transform_indices = @transform_9, window_bounds = array<i64: 4, 1, 4>}, {pipeline_mode = #tpu.pipeline_mode<synchronous>, transform_indices = @transform_10, window_bounds = array<i64: 4, 256, 64>}, {pipeline_mode = #tpu.pipeline_mode<synchronous>, transform_indices = @transform_11, window_bounds = array<i64: 64, 8>}, {transform_indices = @transform_12, window_bounds = array<i64: 1, 1, 8>}]} {
    %c0 = arith.constant 0 : index
    %c0_0 = arith.constant 0 : index
    %c0_1 = arith.constant 0 : index
    %0 = vector.load %arg1[%c0, %c0_0, %c0_1] : memref<1x64x192xf32, #tpu.memory_space<vmem>>, vector<1x64x192xf32>
    %1 = vector.shape_cast %0 : vector<1x64x192xf32> to vector<64x192xf32>
    %c0_2 = arith.constant 0 : index
    %c0_3 = arith.constant 0 : index
    %c0_4 = arith.constant 0 : index
    %2 = vector.load %arg2[%c0_2, %c0_3, %c0_4] : memref<4x32x64xf32, #tpu.memory_space<vmem>>, vector<1x32x64xf32>
    %3 = vector.shape_cast %2 : vector<1x32x64xf32> to vector<32x64xf32>
    %cst = arith.constant dense<0.000000e+00> : vector<32x192xf32>
    %4 = tpu.matmul %3, %1, %cst {dimension_numbers = #tpu.dot_dimension_numbers<[1], [0], [0], [1], [0, 0, 1, 1], [], []>} : vector<32x64xf32>, vector<64x192xf32>, vector<32x192xf32> -> vector<32x192xf32>
    %c0_5 = arith.constant 0 : index
    %c0_6 = arith.constant 0 : index
    %c0_7 = arith.constant 0 : index
    %5 = vector.load %arg3[%c0_5, %c0_6, %c0_7] : memref<4x192x256xf32, #tpu.memory_space<vmem>>, vector<1x192x256xf32>
    %6 = vector.shape_cast %5 : vector<1x192x256xf32> to vector<192x256xf32>
    %cst_8 = arith.constant dense<0.000000e+00> : vector<32x256xf32>
    %7 = tpu.matmul %4, %6, %cst_8 {dimension_numbers = #tpu.dot_dimension_numbers<[1], [0], [0], [1], [0, 0, 1, 1], [], []>} : vector<32x192xf32>, vector<192x256xf32>, vector<32x256xf32> -> vector<32x256xf32>
    %c1 = arith.constant 1 : index
    %c0_9 = arith.constant 0 : index
    %c0_10 = arith.constant 0 : index
    %8 = vector.load %arg2[%c1, %c0_9, %c0_10] : memref<4x32x64xf32, #tpu.memory_space<vmem>>, vector<1x32x64xf32>
    %9 = vector.shape_cast %8 : vector<1x32x64xf32> to vector<32x64xf32>
    %cst_11 = arith.constant dense<0.000000e+00> : vector<32x192xf32>
    %10 = tpu.matmul %9, %1, %cst_11 {dimension_numbers = #tpu.dot_dimension_numbers<[1], [0], [0], [1], [0, 0, 1, 1], [], []>} : vector<32x64xf32>, vector<64x192xf32>, vector<32x192xf32> -> vector<32x192xf32>
    %c1_12 = arith.constant 1 : index
    %c0_13 = arith.constant 0 : index
    %c0_14 = arith.constant 0 : index
    %11 = vector.load %arg3[%c1_12, %c0_13, %c0_14] : memref<4x192x256xf32, #tpu.memory_space<vmem>>, vector<1x192x256xf32>
    %12 = vector.shape_cast %11 : vector<1x192x256xf32> to vector<192x256xf32>
    %cst_15 = arith.constant dense<0.000000e+00> : vector<32x256xf32>
    %13 = tpu.matmul %10, %12, %cst_15 {dimension_numbers = #tpu.dot_dimension_numbers<[1], [0], [0], [1], [0, 0, 1, 1], [], []>} : vector<32x192xf32>, vector<192x256xf32>, vector<32x256xf32> -> vector<32x256xf32>
    %14 = arith.addf %7, %13 : vector<32x256xf32>
    %c2 = arith.constant 2 : index
    %c0_16 = arith.constant 0 : index
    %c0_17 = arith.constant 0 : index
    %15 = vector.load %arg2[%c2, %c0_16, %c0_17] : memref<4x32x64xf32, #tpu.memory_space<vmem>>, vector<1x32x64xf32>
    %16 = vector.shape_cast %15 : vector<1x32x64xf32> to vector<32x64xf32>
    %cst_18 = arith.constant dense<0.000000e+00> : vector<32x192xf32>
    %17 = tpu.matmul %16, %1, %cst_18 {dimension_numbers = #tpu.dot_dimension_numbers<[1], [0], [0], [1], [0, 0, 1, 1], [], []>} : vector<32x64xf32>, vector<64x192xf32>, vector<32x192xf32> -> vector<32x192xf32>
    %c2_19 = arith.constant 2 : index
    %c0_20 = arith.constant 0 : index
    %c0_21 = arith.constant 0 : index
    %18 = vector.load %arg3[%c2_19, %c0_20, %c0_21] : memref<4x192x256xf32, #tpu.memory_space<vmem>>, vector<1x192x256xf32>
    %19 = vector.shape_cast %18 : vector<1x192x256xf32> to vector<192x256xf32>
    %cst_22 = arith.constant dense<0.000000e+00> : vector<32x256xf32>
    %20 = tpu.matmul %17, %19, %cst_22 {dimension_numbers = #tpu.dot_dimension_numbers<[1], [0], [0], [1], [0, 0, 1, 1], [], []>} : vector<32x192xf32>, vector<192x256xf32>, vector<32x256xf32> -> vector<32x256xf32>
    %21 = arith.addf %14, %20 : vector<32x256xf32>
    %c3 = arith.constant 3 : index
    %c0_23 = arith.constant 0 : index
    %c0_24 = arith.constant 0 : index
    %22 = vector.load %arg2[%c3, %c0_23, %c0_24] : memref<4x32x64xf32, #tpu.memory_space<vmem>>, vector<1x32x64xf32>
    %23 = vector.shape_cast %22 : vector<1x32x64xf32> to vector<32x64xf32>
    %cst_25 = arith.constant dense<0.000000e+00> : vector<32x192xf32>
    %24 = tpu.matmul %23, %1, %cst_25 {dimension_numbers = #tpu.dot_dimension_numbers<[1], [0], [0], [1], [0, 0, 1, 1], [], []>} : vector<32x64xf32>, vector<64x192xf32>, vector<32x192xf32> -> vector<32x192xf32>
    %c3_26 = arith.constant 3 : index
    %c0_27 = arith.constant 0 : index
    %c0_28 = arith.constant 0 : index
    %25 = vector.load %arg3[%c3_26, %c0_27, %c0_28] : memref<4x192x256xf32, #tpu.memory_space<vmem>>, vector<1x192x256xf32>
    %26 = vector.shape_cast %25 : vector<1x192x256xf32> to vector<192x256xf32>
    %cst_29 = arith.constant dense<0.000000e+00> : vector<32x256xf32>
    %27 = tpu.matmul %24, %26, %cst_29 {dimension_numbers = #tpu.dot_dimension_numbers<[1], [0], [0], [1], [0, 0, 1, 1], [], []>} : vector<32x192xf32>, vector<192x256xf32>, vector<32x256xf32> -> vector<32x256xf32>
    %28 = arith.addf %21, %27 : vector<32x256xf32>
    %cst_30 = arith.constant 0.000000e+00 : f32
    %29 = vector.broadcast %cst_30 : f32 to vector<32x256xf32>
    %30 = arith.maximumf %28, %29 : vector<32x256xf32>
    %c0_31 = arith.constant 0 : index
    %c0_32 = arith.constant 0 : index
    %c0_33 = arith.constant 0 : index
    %31 = vector.load %arg4[%c0_31, %c0_32, %c0_33] : memref<4x16x32xf32, #tpu.memory_space<vmem>>, vector<1x16x32xf32>
    %32 = vector.shape_cast %31 : vector<1x16x32xf32> to vector<16x32xf32>
    %cst_34 = arith.constant dense<0.000000e+00> : vector<16x256xf32>
    %33 = tpu.matmul %32, %30, %cst_34 {dimension_numbers = #tpu.dot_dimension_numbers<[1], [0], [0], [1], [0, 0, 1, 1], [], []>} : vector<16x32xf32>, vector<32x256xf32>, vector<16x256xf32> -> vector<16x256xf32>
    %c0_35 = arith.constant 0 : index
    %c0_36 = arith.constant 0 : index
    %c0_37 = arith.constant 0 : index
    %34 = vector.load %arg5[%c0_35, %c0_36, %c0_37] : memref<4x256x256xf32, #tpu.memory_space<vmem>>, vector<1x256x256xf32>
    %35 = vector.shape_cast %34 : vector<1x256x256xf32> to vector<256x256xf32>
    %cst_38 = arith.constant dense<0.000000e+00> : vector<16x256xf32>
    %36 = tpu.matmul %33, %35, %cst_38 {dimension_numbers = #tpu.dot_dimension_numbers<[1], [0], [0], [1], [0, 0, 1, 1], [], []>} : vector<16x256xf32>, vector<256x256xf32>, vector<16x256xf32> -> vector<16x256xf32>
    %c1_39 = arith.constant 1 : index
    %c0_40 = arith.constant 0 : index
    %c0_41 = arith.constant 0 : index
    %37 = vector.load %arg4[%c1_39, %c0_40, %c0_41] : memref<4x16x32xf32, #tpu.memory_space<vmem>>, vector<1x16x32xf32>
    %38 = vector.shape_cast %37 : vector<1x16x32xf32> to vector<16x32xf32>
    %cst_42 = arith.constant dense<0.000000e+00> : vector<16x256xf32>
    %39 = tpu.matmul %38, %30, %cst_42 {dimension_numbers = #tpu.dot_dimension_numbers<[1], [0], [0], [1], [0, 0, 1, 1], [], []>} : vector<16x32xf32>, vector<32x256xf32>, vector<16x256xf32> -> vector<16x256xf32>
    %c1_43 = arith.constant 1 : index
    %c0_44 = arith.constant 0 : index
    %c0_45 = arith.constant 0 : index
    %40 = vector.load %arg5[%c1_43, %c0_44, %c0_45] : memref<4x256x256xf32, #tpu.memory_space<vmem>>, vector<1x256x256xf32>
    %41 = vector.shape_cast %40 : vector<1x256x256xf32> to vector<256x256xf32>
    %cst_46 = arith.constant dense<0.000000e+00> : vector<16x256xf32>
    %42 = tpu.matmul %39, %41, %cst_46 {dimension_numbers = #tpu.dot_dimension_numbers<[1], [0], [0], [1], [0, 0, 1, 1], [], []>} : vector<16x256xf32>, vector<256x256xf32>, vector<16x256xf32> -> vector<16x256xf32>
    %43 = arith.addf %36, %42 : vector<16x256xf32>
    %c2_47 = arith.constant 2 : index
    %c0_48 = arith.constant 0 : index
    %c0_49 = arith.constant 0 : index
    %44 = vector.load %arg4[%c2_47, %c0_48, %c0_49] : memref<4x16x32xf32, #tpu.memory_space<vmem>>, vector<1x16x32xf32>
    %45 = vector.shape_cast %44 : vector<1x16x32xf32> to vector<16x32xf32>
    %cst_50 = arith.constant dense<0.000000e+00> : vector<16x256xf32>
    %46 = tpu.matmul %45, %30, %cst_50 {dimension_numbers = #tpu.dot_dimension_numbers<[1], [0], [0], [1], [0, 0, 1, 1], [], []>} : vector<16x32xf32>, vector<32x256xf32>, vector<16x256xf32> -> vector<16x256xf32>
    %c2_51 = arith.constant 2 : index
    %c0_52 = arith.constant 0 : index
    %c0_53 = arith.constant 0 : index
    %47 = vector.load %arg5[%c2_51, %c0_52, %c0_53] : memref<4x256x256xf32, #tpu.memory_space<vmem>>, vector<1x256x256xf32>
    %48 = vector.shape_cast %47 : vector<1x256x256xf32> to vector<256x256xf32>
    %cst_54 = arith.constant dense<0.000000e+00> : vector<16x256xf32>
    %49 = tpu.matmul %46, %48, %cst_54 {dimension_numbers = #tpu.dot_dimension_numbers<[1], [0], [0], [1], [0, 0, 1, 1], [], []>} : vector<16x256xf32>, vector<256x256xf32>, vector<16x256xf32> -> vector<16x256xf32>
    %50 = arith.addf %43, %49 : vector<16x256xf32>
    %c3_55 = arith.constant 3 : index
    %c0_56 = arith.constant 0 : index
    %c0_57 = arith.constant 0 : index
    %51 = vector.load %arg4[%c3_55, %c0_56, %c0_57] : memref<4x16x32xf32, #tpu.memory_space<vmem>>, vector<1x16x32xf32>
    %52 = vector.shape_cast %51 : vector<1x16x32xf32> to vector<16x32xf32>
    %cst_58 = arith.constant dense<0.000000e+00> : vector<16x256xf32>
    %53 = tpu.matmul %52, %30, %cst_58 {dimension_numbers = #tpu.dot_dimension_numbers<[1], [0], [0], [1], [0, 0, 1, 1], [], []>} : vector<16x32xf32>, vector<32x256xf32>, vector<16x256xf32> -> vector<16x256xf32>
    %c3_59 = arith.constant 3 : index
    %c0_60 = arith.constant 0 : index
    %c0_61 = arith.constant 0 : index
    %54 = vector.load %arg5[%c3_59, %c0_60, %c0_61] : memref<4x256x256xf32, #tpu.memory_space<vmem>>, vector<1x256x256xf32>
    %55 = vector.shape_cast %54 : vector<1x256x256xf32> to vector<256x256xf32>
    %cst_62 = arith.constant dense<0.000000e+00> : vector<16x256xf32>
    %56 = tpu.matmul %53, %55, %cst_62 {dimension_numbers = #tpu.dot_dimension_numbers<[1], [0], [0], [1], [0, 0, 1, 1], [], []>} : vector<16x256xf32>, vector<256x256xf32>, vector<16x256xf32> -> vector<16x256xf32>
    %57 = arith.addf %50, %56 : vector<16x256xf32>
    %cst_63 = arith.constant 0.000000e+00 : f32
    %58 = vector.broadcast %cst_63 : f32 to vector<16x256xf32>
    %59 = arith.maximumf %57, %58 : vector<16x256xf32>
    %c0_64 = arith.constant 0 : index
    %c0_65 = arith.constant 0 : index
    %c0_66 = arith.constant 0 : index
    %60 = vector.load %arg6[%c0_64, %c0_65, %c0_66] : memref<4x8x16xf32, #tpu.memory_space<vmem>>, vector<1x8x16xf32>
    %61 = vector.shape_cast %60 : vector<1x8x16xf32> to vector<8x16xf32>
    %cst_67 = arith.constant dense<0.000000e+00> : vector<8x256xf32>
    %62 = tpu.matmul %61, %59, %cst_67 {dimension_numbers = #tpu.dot_dimension_numbers<[1], [0], [0], [1], [0, 0, 1, 1], [], []>} : vector<8x16xf32>, vector<16x256xf32>, vector<8x256xf32> -> vector<8x256xf32>
    %c0_68 = arith.constant 0 : index
    %c0_69 = arith.constant 0 : index
    %c0_70 = arith.constant 0 : index
    %63 = vector.load %arg7[%c0_68, %c0_69, %c0_70] : memref<4x256x256xf32, #tpu.memory_space<vmem>>, vector<1x256x256xf32>
    %64 = vector.shape_cast %63 : vector<1x256x256xf32> to vector<256x256xf32>
    %cst_71 = arith.constant dense<0.000000e+00> : vector<8x256xf32>
    %65 = tpu.matmul %62, %64, %cst_71 {dimension_numbers = #tpu.dot_dimension_numbers<[1], [0], [0], [1], [0, 0, 1, 1], [], []>} : vector<8x256xf32>, vector<256x256xf32>, vector<8x256xf32> -> vector<8x256xf32>
    %c1_72 = arith.constant 1 : index
    %c0_73 = arith.constant 0 : index
    %c0_74 = arith.constant 0 : index
    %66 = vector.load %arg6[%c1_72, %c0_73, %c0_74] : memref<4x8x16xf32, #tpu.memory_space<vmem>>, vector<1x8x16xf32>
    %67 = vector.shape_cast %66 : vector<1x8x16xf32> to vector<8x16xf32>
    %cst_75 = arith.constant dense<0.000000e+00> : vector<8x256xf32>
    %68 = tpu.matmul %67, %59, %cst_75 {dimension_numbers = #tpu.dot_dimension_numbers<[1], [0], [0], [1], [0, 0, 1, 1], [], []>} : vector<8x16xf32>, vector<16x256xf32>, vector<8x256xf32> -> vector<8x256xf32>
    %c1_76 = arith.constant 1 : index
    %c0_77 = arith.constant 0 : index
    %c0_78 = arith.constant 0 : index
    %69 = vector.load %arg7[%c1_76, %c0_77, %c0_78] : memref<4x256x256xf32, #tpu.memory_space<vmem>>, vector<1x256x256xf32>
    %70 = vector.shape_cast %69 : vector<1x256x256xf32> to vector<256x256xf32>
    %cst_79 = arith.constant dense<0.000000e+00> : vector<8x256xf32>
    %71 = tpu.matmul %68, %70, %cst_79 {dimension_numbers = #tpu.dot_dimension_numbers<[1], [0], [0], [1], [0, 0, 1, 1], [], []>} : vector<8x256xf32>, vector<256x256xf32>, vector<8x256xf32> -> vector<8x256xf32>
    %72 = arith.addf %65, %71 : vector<8x256xf32>
    %c2_80 = arith.constant 2 : index
    %c0_81 = arith.constant 0 : index
    %c0_82 = arith.constant 0 : index
    %73 = vector.load %arg6[%c2_80, %c0_81, %c0_82] : memref<4x8x16xf32, #tpu.memory_space<vmem>>, vector<1x8x16xf32>
    %74 = vector.shape_cast %73 : vector<1x8x16xf32> to vector<8x16xf32>
    %cst_83 = arith.constant dense<0.000000e+00> : vector<8x256xf32>
    %75 = tpu.matmul %74, %59, %cst_83 {dimension_numbers = #tpu.dot_dimension_numbers<[1], [0], [0], [1], [0, 0, 1, 1], [], []>} : vector<8x16xf32>, vector<16x256xf32>, vector<8x256xf32> -> vector<8x256xf32>
    %c2_84 = arith.constant 2 : index
    %c0_85 = arith.constant 0 : index
    %c0_86 = arith.constant 0 : index
    %76 = vector.load %arg7[%c2_84, %c0_85, %c0_86] : memref<4x256x256xf32, #tpu.memory_space<vmem>>, vector<1x256x256xf32>
    %77 = vector.shape_cast %76 : vector<1x256x256xf32> to vector<256x256xf32>
    %cst_87 = arith.constant dense<0.000000e+00> : vector<8x256xf32>
    %78 = tpu.matmul %75, %77, %cst_87 {dimension_numbers = #tpu.dot_dimension_numbers<[1], [0], [0], [1], [0, 0, 1, 1], [], []>} : vector<8x256xf32>, vector<256x256xf32>, vector<8x256xf32> -> vector<8x256xf32>
    %79 = arith.addf %72, %78 : vector<8x256xf32>
    %c3_88 = arith.constant 3 : index
    %c0_89 = arith.constant 0 : index
    %c0_90 = arith.constant 0 : index
    %80 = vector.load %arg6[%c3_88, %c0_89, %c0_90] : memref<4x8x16xf32, #tpu.memory_space<vmem>>, vector<1x8x16xf32>
    %81 = vector.shape_cast %80 : vector<1x8x16xf32> to vector<8x16xf32>
    %cst_91 = arith.constant dense<0.000000e+00> : vector<8x256xf32>
    %82 = tpu.matmul %81, %59, %cst_91 {dimension_numbers = #tpu.dot_dimension_numbers<[1], [0], [0], [1], [0, 0, 1, 1], [], []>} : vector<8x16xf32>, vector<16x256xf32>, vector<8x256xf32> -> vector<8x256xf32>
    %c3_92 = arith.constant 3 : index
    %c0_93 = arith.constant 0 : index
    %c0_94 = arith.constant 0 : index
    %83 = vector.load %arg7[%c3_92, %c0_93, %c0_94] : memref<4x256x256xf32, #tpu.memory_space<vmem>>, vector<1x256x256xf32>
    %84 = vector.shape_cast %83 : vector<1x256x256xf32> to vector<256x256xf32>
    %cst_95 = arith.constant dense<0.000000e+00> : vector<8x256xf32>
    %85 = tpu.matmul %82, %84, %cst_95 {dimension_numbers = #tpu.dot_dimension_numbers<[1], [0], [0], [1], [0, 0, 1, 1], [], []>} : vector<8x256xf32>, vector<256x256xf32>, vector<8x256xf32> -> vector<8x256xf32>
    %86 = arith.addf %79, %85 : vector<8x256xf32>
    %cst_96 = arith.constant 0.000000e+00 : f32
    %87 = vector.broadcast %cst_96 : f32 to vector<8x256xf32>
    %88 = arith.maximumf %86, %87 : vector<8x256xf32>
    %c0_97 = arith.constant 0 : index
    %c0_98 = arith.constant 0 : index
    %c0_99 = arith.constant 0 : index
    %89 = vector.load %arg8[%c0_97, %c0_98, %c0_99] : memref<4x4x8xf32, #tpu.memory_space<vmem>>, vector<1x4x8xf32>
    %90 = vector.shape_cast %89 : vector<1x4x8xf32> to vector<4x8xf32>
    %cst_100 = arith.constant dense<0.000000e+00> : vector<4x256xf32>
    %91 = tpu.matmul %90, %88, %cst_100 {dimension_numbers = #tpu.dot_dimension_numbers<[1], [0], [0], [1], [0, 0, 1, 1], [], []>} : vector<4x8xf32>, vector<8x256xf32>, vector<4x256xf32> -> vector<4x256xf32>
    %c0_101 = arith.constant 0 : index
    %c0_102 = arith.constant 0 : index
    %c0_103 = arith.constant 0 : index
    %92 = vector.load %arg9[%c0_101, %c0_102, %c0_103] : memref<4x256x256xf32, #tpu.memory_space<vmem>>, vector<1x256x256xf32>
    %93 = vector.shape_cast %92 : vector<1x256x256xf32> to vector<256x256xf32>
    %cst_104 = arith.constant dense<0.000000e+00> : vector<4x256xf32>
    %94 = tpu.matmul %91, %93, %cst_104 {dimension_numbers = #tpu.dot_dimension_numbers<[1], [0], [0], [1], [0, 0, 1, 1], [], []>} : vector<4x256xf32>, vector<256x256xf32>, vector<4x256xf32> -> vector<4x256xf32>
    %c1_105 = arith.constant 1 : index
    %c0_106 = arith.constant 0 : index
    %c0_107 = arith.constant 0 : index
    %95 = vector.load %arg8[%c1_105, %c0_106, %c0_107] : memref<4x4x8xf32, #tpu.memory_space<vmem>>, vector<1x4x8xf32>
    %96 = vector.shape_cast %95 : vector<1x4x8xf32> to vector<4x8xf32>
    %cst_108 = arith.constant dense<0.000000e+00> : vector<4x256xf32>
    %97 = tpu.matmul %96, %88, %cst_108 {dimension_numbers = #tpu.dot_dimension_numbers<[1], [0], [0], [1], [0, 0, 1, 1], [], []>} : vector<4x8xf32>, vector<8x256xf32>, vector<4x256xf32> -> vector<4x256xf32>
    %c1_109 = arith.constant 1 : index
    %c0_110 = arith.constant 0 : index
    %c0_111 = arith.constant 0 : index
    %98 = vector.load %arg9[%c1_109, %c0_110, %c0_111] : memref<4x256x256xf32, #tpu.memory_space<vmem>>, vector<1x256x256xf32>
    %99 = vector.shape_cast %98 : vector<1x256x256xf32> to vector<256x256xf32>
    %cst_112 = arith.constant dense<0.000000e+00> : vector<4x256xf32>
    %100 = tpu.matmul %97, %99, %cst_112 {dimension_numbers = #tpu.dot_dimension_numbers<[1], [0], [0], [1], [0, 0, 1, 1], [], []>} : vector<4x256xf32>, vector<256x256xf32>, vector<4x256xf32> -> vector<4x256xf32>
    %101 = arith.addf %94, %100 : vector<4x256xf32>
    %c2_113 = arith.constant 2 : index
    %c0_114 = arith.constant 0 : index
    %c0_115 = arith.constant 0 : index
    %102 = vector.load %arg8[%c2_113, %c0_114, %c0_115] : memref<4x4x8xf32, #tpu.memory_space<vmem>>, vector<1x4x8xf32>
    %103 = vector.shape_cast %102 : vector<1x4x8xf32> to vector<4x8xf32>
    %cst_116 = arith.constant dense<0.000000e+00> : vector<4x256xf32>
    %104 = tpu.matmul %103, %88, %cst_116 {dimension_numbers = #tpu.dot_dimension_numbers<[1], [0], [0], [1], [0, 0, 1, 1], [], []>} : vector<4x8xf32>, vector<8x256xf32>, vector<4x256xf32> -> vector<4x256xf32>
    %c2_117 = arith.constant 2 : index
    %c0_118 = arith.constant 0 : index
    %c0_119 = arith.constant 0 : index
    %105 = vector.load %arg9[%c2_117, %c0_118, %c0_119] : memref<4x256x256xf32, #tpu.memory_space<vmem>>, vector<1x256x256xf32>
    %106 = vector.shape_cast %105 : vector<1x256x256xf32> to vector<256x256xf32>
    %cst_120 = arith.constant dense<0.000000e+00> : vector<4x256xf32>
    %107 = tpu.matmul %104, %106, %cst_120 {dimension_numbers = #tpu.dot_dimension_numbers<[1], [0], [0], [1], [0, 0, 1, 1], [], []>} : vector<4x256xf32>, vector<256x256xf32>, vector<4x256xf32> -> vector<4x256xf32>
    %108 = arith.addf %101, %107 : vector<4x256xf32>
    %c3_121 = arith.constant 3 : index
    %c0_122 = arith.constant 0 : index
    %c0_123 = arith.constant 0 : index
    %109 = vector.load %arg8[%c3_121, %c0_122, %c0_123] : memref<4x4x8xf32, #tpu.memory_space<vmem>>, vector<1x4x8xf32>
    %110 = vector.shape_cast %109 : vector<1x4x8xf32> to vector<4x8xf32>
    %cst_124 = arith.constant dense<0.000000e+00> : vector<4x256xf32>
    %111 = tpu.matmul %110, %88, %cst_124 {dimension_numbers = #tpu.dot_dimension_numbers<[1], [0], [0], [1], [0, 0, 1, 1], [], []>} : vector<4x8xf32>, vector<8x256xf32>, vector<4x256xf32> -> vector<4x256xf32>
    %c3_125 = arith.constant 3 : index
    %c0_126 = arith.constant 0 : index
    %c0_127 = arith.constant 0 : index
    %112 = vector.load %arg9[%c3_125, %c0_126, %c0_127] : memref<4x256x256xf32, #tpu.memory_space<vmem>>, vector<1x256x256xf32>
    %113 = vector.shape_cast %112 : vector<1x256x256xf32> to vector<256x256xf32>
    %cst_128 = arith.constant dense<0.000000e+00> : vector<4x256xf32>
    %114 = tpu.matmul %111, %113, %cst_128 {dimension_numbers = #tpu.dot_dimension_numbers<[1], [0], [0], [1], [0, 0, 1, 1], [], []>} : vector<4x256xf32>, vector<256x256xf32>, vector<4x256xf32> -> vector<4x256xf32>
    %115 = arith.addf %108, %114 : vector<4x256xf32>
    %cst_129 = arith.constant 0.000000e+00 : f32
    %116 = vector.broadcast %cst_129 : f32 to vector<4x256xf32>
    %117 = arith.maximumf %115, %116 : vector<4x256xf32>
    %c0_130 = arith.constant 0 : index
    %c0_131 = arith.constant 0 : index
    %c0_132 = arith.constant 0 : index
    %118 = vector.load %arg10[%c0_130, %c0_131, %c0_132] : memref<4x1x4xf32, #tpu.memory_space<vmem>>, vector<1x1x4xf32>
    %119 = vector.shape_cast %118 : vector<1x1x4xf32> to vector<1x4xf32>
    %cst_133 = arith.constant dense<0.000000e+00> : vector<1x256xf32>
    %120 = tpu.matmul %119, %117, %cst_133 {dimension_numbers = #tpu.dot_dimension_numbers<[1], [0], [0], [1], [0, 0, 1, 1], [], []>} : vector<1x4xf32>, vector<4x256xf32>, vector<1x256xf32> -> vector<1x256xf32>
    %c0_134 = arith.constant 0 : index
    %c0_135 = arith.constant 0 : index
    %c0_136 = arith.constant 0 : index
    %121 = vector.load %arg11[%c0_134, %c0_135, %c0_136] : memref<4x256x64xf32, #tpu.memory_space<vmem>>, vector<1x256x64xf32>
    %122 = vector.shape_cast %121 : vector<1x256x64xf32> to vector<256x64xf32>
    %cst_137 = arith.constant dense<0.000000e+00> : vector<1x64xf32>
    %123 = tpu.matmul %120, %122, %cst_137 {dimension_numbers = #tpu.dot_dimension_numbers<[1], [0], [0], [1], [0, 0, 1, 1], [], []>} : vector<1x256xf32>, vector<256x64xf32>, vector<1x64xf32> -> vector<1x64xf32>
    %c1_138 = arith.constant 1 : index
    %c0_139 = arith.constant 0 : index
    %c0_140 = arith.constant 0 : index
    %124 = vector.load %arg10[%c1_138, %c0_139, %c0_140] : memref<4x1x4xf32, #tpu.memory_space<vmem>>, vector<1x1x4xf32>
    %125 = vector.shape_cast %124 : vector<1x1x4xf32> to vector<1x4xf32>
    %cst_141 = arith.constant dense<0.000000e+00> : vector<1x256xf32>
    %126 = tpu.matmul %125, %117, %cst_141 {dimension_numbers = #tpu.dot_dimension_numbers<[1], [0], [0], [1], [0, 0, 1, 1], [], []>} : vector<1x4xf32>, vector<4x256xf32>, vector<1x256xf32> -> vector<1x256xf32>
    %c1_142 = arith.constant 1 : index
    %c0_143 = arith.constant 0 : index
    %c0_144 = arith.constant 0 : index
    %127 = vector.load %arg11[%c1_142, %c0_143, %c0_144] : memref<4x256x64xf32, #tpu.memory_space<vmem>>, vector<1x256x64xf32>
    %128 = vector.shape_cast %127 : vector<1x256x64xf32> to vector<256x64xf32>
    %cst_145 = arith.constant dense<0.000000e+00> : vector<1x64xf32>
    %129 = tpu.matmul %126, %128, %cst_145 {dimension_numbers = #tpu.dot_dimension_numbers<[1], [0], [0], [1], [0, 0, 1, 1], [], []>} : vector<1x256xf32>, vector<256x64xf32>, vector<1x64xf32> -> vector<1x64xf32>
    %130 = arith.addf %123, %129 : vector<1x64xf32>
    %c2_146 = arith.constant 2 : index
    %c0_147 = arith.constant 0 : index
    %c0_148 = arith.constant 0 : index
    %131 = vector.load %arg10[%c2_146, %c0_147, %c0_148] : memref<4x1x4xf32, #tpu.memory_space<vmem>>, vector<1x1x4xf32>
    %132 = vector.shape_cast %131 : vector<1x1x4xf32> to vector<1x4xf32>
    %cst_149 = arith.constant dense<0.000000e+00> : vector<1x256xf32>
    %133 = tpu.matmul %132, %117, %cst_149 {dimension_numbers = #tpu.dot_dimension_numbers<[1], [0], [0], [1], [0, 0, 1, 1], [], []>} : vector<1x4xf32>, vector<4x256xf32>, vector<1x256xf32> -> vector<1x256xf32>
    %c2_150 = arith.constant 2 : index
    %c0_151 = arith.constant 0 : index
    %c0_152 = arith.constant 0 : index
    %134 = vector.load %arg11[%c2_150, %c0_151, %c0_152] : memref<4x256x64xf32, #tpu.memory_space<vmem>>, vector<1x256x64xf32>
    %135 = vector.shape_cast %134 : vector<1x256x64xf32> to vector<256x64xf32>
    %cst_153 = arith.constant dense<0.000000e+00> : vector<1x64xf32>
    %136 = tpu.matmul %133, %135, %cst_153 {dimension_numbers = #tpu.dot_dimension_numbers<[1], [0], [0], [1], [0, 0, 1, 1], [], []>} : vector<1x256xf32>, vector<256x64xf32>, vector<1x64xf32> -> vector<1x64xf32>
    %137 = arith.addf %130, %136 : vector<1x64xf32>
    %c3_154 = arith.constant 3 : index
    %c0_155 = arith.constant 0 : index
    %c0_156 = arith.constant 0 : index
    %138 = vector.load %arg10[%c3_154, %c0_155, %c0_156] : memref<4x1x4xf32, #tpu.memory_space<vmem>>, vector<1x1x4xf32>
    %139 = vector.shape_cast %138 : vector<1x1x4xf32> to vector<1x4xf32>
    %cst_157 = arith.constant dense<0.000000e+00> : vector<1x256xf32>
    %140 = tpu.matmul %139, %117, %cst_157 {dimension_numbers = #tpu.dot_dimension_numbers<[1], [0], [0], [1], [0, 0, 1, 1], [], []>} : vector<1x4xf32>, vector<4x256xf32>, vector<1x256xf32> -> vector<1x256xf32>
    %c3_158 = arith.constant 3 : index
    %c0_159 = arith.constant 0 : index
    %c0_160 = arith.constant 0 : index
    %141 = vector.load %arg11[%c3_158, %c0_159, %c0_160] : memref<4x256x64xf32, #tpu.memory_space<vmem>>, vector<1x256x64xf32>
    %142 = vector.shape_cast %141 : vector<1x256x64xf32> to vector<256x64xf32>
    %cst_161 = arith.constant dense<0.000000e+00> : vector<1x64xf32>
    %143 = tpu.matmul %140, %142, %cst_161 {dimension_numbers = #tpu.dot_dimension_numbers<[1], [0], [0], [1], [0, 0, 1, 1], [], []>} : vector<1x256xf32>, vector<256x64xf32>, vector<1x64xf32> -> vector<1x64xf32>
    %144 = arith.addf %137, %143 : vector<1x64xf32>
    %cst_162 = arith.constant 0.000000e+00 : f32
    %145 = vector.broadcast %cst_162 : f32 to vector<1x64xf32>
    %146 = arith.maximumf %144, %145 : vector<1x64xf32>
    %c0_163 = arith.constant 0 : index
    %c0_164 = arith.constant 0 : index
    %147 = vector.load %arg12[%c0_163, %c0_164] : memref<64x8xf32, #tpu.memory_space<vmem>>, vector<64x8xf32>
    %cst_165 = arith.constant dense<0.000000e+00> : vector<1x8xf32>
    %148 = tpu.matmul %146, %147, %cst_165 {dimension_numbers = #tpu.dot_dimension_numbers<[1], [0], [0], [1], [0, 0, 1, 1], [], []>} : vector<1x64xf32>, vector<64x8xf32>, vector<1x8xf32> -> vector<1x8xf32>
    %149 = math.tanh %148 : vector<1x8xf32>
    %c0_166 = arith.constant 0 : index
    %c0_167 = arith.constant 0 : index
    %c0_168 = arith.constant 0 : index
    %150 = vector.load %arg13[%c0_166, %c0_167, %c0_168] : memref<1x1x8xf32, #tpu.memory_space<vmem>>, vector<1x1x8xf32>
    %151 = vector.shape_cast %150 : vector<1x1x8xf32> to vector<1x8xf32>
    %152 = vector.shape_cast %149 : vector<1x8xf32> to vector<1x1x8xf32>
    tpu.vector_store %arg13[%c0_166, %c0_167, %c0_168], %152 {strides = array<i32>} : memref<1x1x8xf32, #tpu.memory_space<vmem>>, vector<1x1x8xf32>,
    return
  }
  func.func @transform_0(%arg0: i32) -> (i32, i32, i32) {
    %c0_i32 = arith.constant 0 : i32
    %c0_i32_0 = arith.constant 0 : i32
    %c0_i32_1 = arith.constant 0 : i32
    return %arg0, %c0_i32, %c0_i32_0 : i32, i32, i32
  }
  func.func @transform_1(%arg0: i32) -> (i32, i32, i32) {
    %c0_i32 = arith.constant 0 : i32
    %c0_i32_0 = arith.constant 0 : i32
    %c0_i32_1 = arith.constant 0 : i32
    %c0_i32_2 = arith.constant 0 : i32
    return %c0_i32, %c0_i32_0, %c0_i32_1 : i32, i32, i32
  }
  func.func @transform_2(%arg0: i32) -> (i32, i32, i32) {
    %c0_i32 = arith.constant 0 : i32
    %c0_i32_0 = arith.constant 0 : i32
    %c0_i32_1 = arith.constant 0 : i32
    %c0_i32_2 = arith.constant 0 : i32
    return %c0_i32, %c0_i32_0, %c0_i32_1 : i32, i32, i32
  }
  func.func @transform_3(%arg0: i32) -> (i32, i32, i32) {
    %c0_i32 = arith.constant 0 : i32
    %c0_i32_0 = arith.constant 0 : i32
    %c0_i32_1 = arith.constant 0 : i32
    %c0_i32_2 = arith.constant 0 : i32
    return %c0_i32, %c0_i32_0, %c0_i32_1 : i32, i32, i32
  }
  func.func @transform_4(%arg0: i32) -> (i32, i32, i32) {
    %c0_i32 = arith.constant 0 : i32
    %c0_i32_0 = arith.constant 0 : i32
    %c0_i32_1 = arith.constant 0 : i32
    %c0_i32_2 = arith.constant 0 : i32
    return %c0_i32, %c0_i32_0, %c0_i32_1 : i32, i32, i32
  }
  func.func @transform_5(%arg0: i32) -> (i32, i32, i32) {
    %c0_i32 = arith.constant 0 : i32
    %c0_i32_0 = arith.constant 0 : i32
    %c0_i32_1 = arith.constant 0 : i32
    %c0_i32_2 = arith.constant 0 : i32
    return %c0_i32, %c0_i32_0, %c0_i32_1 : i32, i32, i32
  }
  func.func @transform_6(%arg0: i32) -> (i32, i32, i32) {
    %c0_i32 = arith.constant 0 : i32
    %c0_i32_0 = arith.constant 0 : i32
    %c0_i32_1 = arith.constant 0 : i32
    %c0_i32_2 = arith.constant 0 : i32
    return %c0_i32, %c0_i32_0, %c0_i32_1 : i32, i32, i32
  }
  func.func @transform_7(%arg0: i32) -> (i32, i32, i32) {
    %c0_i32 = arith.constant 0 : i32
    %c0_i32_0 = arith.constant 0 : i32
    %c0_i32_1 = arith.constant 0 : i32
    %c0_i32_2 = arith.constant 0 : i32
    return %c0_i32, %c0_i32_0, %c0_i32_1 : i32, i32, i32
  }
  func.func @transform_8(%arg0: i32) -> (i32, i32, i32) {
    %c0_i32 = arith.constant 0 : i32
    %c0_i32_0 = arith.constant 0 : i32
    %c0_i32_1 = arith.constant 0 : i32
    %c0_i32_2 = arith.constant 0 : i32
    return %c0_i32, %c0_i32_0, %c0_i32_1 : i32, i32, i32
  }
  func.func @transform_9(%arg0: i32) -> (i32, i32, i32) {
    %c0_i32 = arith.constant 0 : i32
    %c0_i32_0 = arith.constant 0 : i32
    %c0_i32_1 = arith.constant 0 : i32
    %c0_i32_2 = arith.constant 0 : i32
    return %c0_i32, %c0_i32_0, %c0_i32_1 : i32, i32, i32
  }
  func.func @transform_10(%arg0: i32) -> (i32, i32, i32) {
    %c0_i32 = arith.constant 0 : i32
    %c0_i32_0 = arith.constant 0 : i32
    %c0_i32_1 = arith.constant 0 : i32
    %c0_i32_2 = arith.constant 0 : i32
    return %c0_i32, %c0_i32_0, %c0_i32_1 : i32, i32, i32
  }
  func.func @transform_11(%arg0: i32) -> (i32, i32) {
    %c0_i32 = arith.constant 0 : i32
    %c0_i32_0 = arith.constant 0 : i32
    %c0_i32_1 = arith.constant 0 : i32
    return %c0_i32, %c0_i32_0 : i32, i32
  }
  func.func @transform_12(%arg0: i32) -> (i32, i32, i32) {
    %c0_i32 = arith.constant 0 : i32
    %c0_i32_0 = arith.constant 0 : i32
    %c0_i32_1 = arith.constant 0 : i32
    return %arg0, %c0_i32, %c0_i32_0 : i32, i32, i32
  }
}

</mosaic_0001>

<bundles_post_ra>
// kernel: tpu_custom_call.1
= control target key start
LH: loop header
LB: loop body
LE: loop exit
PB: predicated region body
PF: predicated region fallthrough
CT: control target
= control target key end

     0   :  { %s7780_s0 = inlined_call_operand.hbm [shape: f32[2,64,192], index: 0, kind: input, shape index: {}]   ;;  %s7781_s1 = inlined_call_operand.hbm [shape: f32[4,32,64], index: 1, kind: input, shape index: {}]   ;;  %s7782_s2 = inlined_call_operand.vmem [shape: f32[4,192,256], index: 2, kind: input, shape index: {}]   ;;  %s7783_s3 = inlined_call_operand.vmem [shape: f32[4,16,32], index: 3, kind: input, shape index: {}]   ;;  %s7784_s4 = inlined_call_operand.hbm [shape: f32[4,256,256], index: 4, kind: input, shape index: {}]   ;;  %s7785_s5 = inlined_call_operand.hbm [shape: f32[4,8,16], index: 5, kind: input, shape index: {}]   ;;  %s7786_s6 = inlined_call_operand.hbm [shape: f32[4,256,256], index: 6, kind: input, shape index: {}]   ;;  %s7787_s7 = inlined_call_operand.hbm [shape: f32[4,4,8], index: 7, kind: input, shape index: {}]   ;;  %s7788_s8 = inlined_call_operand.hbm [shape: f32[4,256,256], index: 8, kind: input, shape index: {}]   ;;  %s7789_s9 = inlined_call_operand.vmem [shape: f32[4,1,4], index: 9, kind: input, shape index: {}]   ;;  %s7790_s10 = inlined_call_operand.vmem [shape: f32[4,256,64], index: 10, kind: input, shape index: {}]   ;;  %s7791_s11 = inlined_call_operand.vmem [shape: f32[64,8], index: 11, kind: input, shape index: {}]   ;;  %s7792_s12 = inlined_call_operand.hbm [shape: f32[2,1,8], index: 12, kind: output, shape index: {}]  }
   0x1   :  { %7799 = sst [smem:[#allocation20_spill]] %s7781_s1 }
   0x2   :  { %7800 = sst [smem:[#allocation21_spill]] %s7784_s4 }
   0x3   :  { %7801 = sst [smem:[#allocation22_spill]] %s7785_s5 }
   0x4   :  { %7802 = sst [smem:[#allocation23_spill]] %s7786_s6 }
   0x5   :  { %7803 = sst [smem:[#allocation24_spill]] %s7787_s7 }
   0x6   :  { %7804 = sst [smem:[#allocation25_spill]] %s7788_s8 }
   0x7   :  { %17 = vsyncpa [#allocation3], 0 }
   0x8   :  { %19 = vsyncpa [#allocation3 + $0x1], 0 }
   0x9   :  { %20 = vsyncpa [#allocation6], 0 }
   0xa   :  { %21 = vsyncpa [#allocation9], 0 }
   0xb   :  { %22 = vsyncpa [#allocation12], 0 }
   0xc   :  { %23 = vsyncpa [#allocation4], 0 }
   0xd   :  { %25 = vsyncpa [#allocation4 + $0x1], 0  ;;  %s6117_s21 = smov 0   ;;  %s6119_s22 = smov 0  }
   0xe   :  { %s6121_s23 = smov 0   ;;  %s6123_s24 = smov 0  }
   0xf LB: > { %s6036_s25 = smov [#allocation5]   ;;  %s6138_s27 = sadd.s32 4294967295, %s6034_s24   ;;  %s6034_s24 = sphi %s6123_s24, %s7835_s24   ;;  %s6030_s23 = sphi %s6121_s23, %s7834_s23   ;;  %s6026_s22 = sphi %s6119_s22, %s7833_s22   ;;  %s6022_s21 = sphi %s6117_s21, %s7832_s21  }
  0x10   : > { %s331_s26 = sshll.u32 %s6036_s25, 4  ;;  %p5156_p0 = scmp.ge.s32.totalorder %s6034_s24, 1  ;;  %s332_s26 = int_to_ptr.vmem [resolvable:$true] %s331_s26 }
  0x11   : > { %p7795_p1 = scmp.eq.s32.totalorder %s6138_s27, 0  ;;  %p319_p2 = scmp.lt.s32.totalorder %s6034_s24, 3 }
  0x12   : > { %s6037_s29 = smov [#allocation8]   ;;  %s6038_s14 = smov [#allocation11]  }
  0x13   : > { %p6143_p3 = pnand %p5156_p0, %p319_p2  ;;  %s363_s30 = sshll.u32 %s6037_s29, 4  ;;  %s6156_s30 = int_to_ptr.vmem [resolvable:$true] %s363_s30 }
  0x14   : > { %s389_s15 = sshll.u32 %s6038_s14, 4  ;;  %s5785_s17 = scalar_lea.vmem %s332_s26, 2048  ;;  %s6158_s15 = int_to_ptr.vmem [resolvable:$true] %s389_s15 }
  0x15   : > { %s7805_s28 = scalar_select %p6143_p3, 1, 0 }
  0x16   : > { %p5685_p5 = pneg %p6143_p3  ;;  %p5786_p8 = scmp.ne.s32.totalorder %s332_s26, %s5785_s17 }
  0x17   : > { %p5793_p11 = scmp.lt.s32.totalorder %s332_s26, %s332_s26  ;;  %p5794_p12 = scmp.lt.s32.totalorder %s5785_s17, %s5785_s17 }
  0x18   : > { %p6152_p6 = pnand %p5685_p5, %p7795_p1 }
  0x19   : > { %p5795_p13 = por %p5794_p12, %p5793_p11 }
  0x1a   : > { %p6162_p7 = pneg %p6152_p6 }
  0x1c   : > { %p5788_p9 = pnand %p5786_p8, %p6162_p7 }
  0x1e   : > { %p5789_p10 = pneg %p5788_p9 }
  0x20   : > { %p5796_p0 = pnand %p5795_p13, %p5789_p10 }
  0x22   : > { %5799 = shalt.err (!%p5796_p0)
}
  0x23   : > { %s6039_s18 = smov 128   ;;  %s6040_s19 = smov 8  }
  0x24   : > { %s7808_s1 = sld [smem:[#allocation20_spill]]  ;;  %s5811_s29 = scalar_lea.vmem %s6156_s30, 512 }
  0x25   : > { %p5812_p2 = scmp.ne.s32.totalorder %s6156_s30, %s5811_s29  ;;  %p5819_p9 = scmp.lt.s32.totalorder %s6156_s30, %s6156_s30 }
  0x26   : > { %p5820_p10 = scmp.lt.s32.totalorder %s5811_s29, %s5811_s29 }
  0x27   : > { %p5814_p5 = pnand %p5812_p2, %p6162_p7 }
  0x28   : > { %p5821_p11 = por %p5820_p10, %p5819_p9 }
  0x29   : > { %p5815_p8 = pneg %p5814_p5 }
  0x2a   : > { %5688 = dma.hbm_to_vmem [thread:$0]  (!%p6152_p6), %s7808_s1, 2048, %s332_s26, [#allocation6], %s6039_s18, %s6039_s18, %s6040_s19  }
  0x2b   : > { %p5822_p12 = pnand %p5821_p11, %p5815_p8 }
  0x2d   : > { %5825 = shalt.err (!%p5822_p12)
}
  0x2e   : > { %s7809_s5 = sld [smem:[#allocation22_spill]]  ;;  %s5837_s26 = scalar_lea.vmem %s6158_s15, 256 }
  0x2f   : > { %p5838_p13 = scmp.ne.s32.totalorder %s6158_s15, %s5837_s26  ;;  %p5845_p5 = scmp.lt.s32.totalorder %s6158_s15, %s6158_s15 }
  0x30   : > { %p5846_p8 = scmp.lt.s32.totalorder %s5837_s26, %s5837_s26 }
  0x31   : > { %p5840_p0 = pnand %p5838_p13, %p6162_p7 }
  0x32   : > { %p5847_p9 = por %p5846_p8, %p5845_p5 }
  0x33   : > { %p5841_p2 = pneg %p5840_p0 }
  0x34   : > { %5694 = dma.hbm_to_vmem [thread:$0]  (!%p6152_p6), %s7809_s5, 512, %s6156_s30, [#allocation9], %s6039_s18, %s6039_s18, %s6040_s19  }
  0x35   : > { %p5848_p10 = pnand %p5847_p9, %p5841_p2 }
  0x37   : > { %5851 = shalt.err (!%p5848_p10)
}
  0x38   : > { %s6041_s20 = smov 64   ;;  %s6042_s25 = smov 4  }
  0x39   : > { %s7810_s7 = sld [smem:[#allocation24_spill]]  ;;  %s6043_s30 = smov [#allocation7]  }
  0x3a   : > { %s350_s18 = sshll.u32 %s6043_s30, 4  ;;  %s351_s18 = int_to_ptr.vmem [resolvable:$true] %s350_s18 }
  0x3b   : > { %s5863_s19 = scalar_lea.vmem %s351_s18, 32768  ;;  %p5871_p0 = scmp.lt.s32.totalorder %s351_s18, %s351_s18 }
  0x3c   : > { %p5864_p11 = scmp.ne.s32.totalorder %s351_s18, %s5863_s19  ;;  %p5872_p2 = scmp.lt.s32.totalorder %s5863_s19, %s5863_s19 }
  0x3e   : > { %p5866_p12 = pnand %p5864_p11, %p6162_p7  ;;  %p5873_p5 = por %p5872_p2, %p5871_p0 }
  0x3f   : > { %5700 = dma.hbm_to_vmem [thread:$0]  (!%p6152_p6), %s7810_s7, 256, %s6158_s15, [#allocation12], %s6041_s20, %s6041_s20, %s6042_s25  }
  0x40   : > { %p5867_p13 = pneg %p5866_p12 }
  0x42   : > { %p5874_p8 = pnand %p5873_p5, %p5867_p13 }
  0x44   : > { %5877 = shalt.err (!%p5874_p8)
}
  0x45   : > { %s7793_s17 = smov 256   ;;  %s7794_s26 = smov 16  }
  0x46   : > { %s7811_s4 = sld [smem:[#allocation21_spill]]  ;;  %s6046_s25 = smov [#allocation10]  }
  0x47   : > { %s376_s29 = sshll.u32 %s6046_s25, 4  ;;  %s6047_s14 = smov [#allocation13]   ;;  %s377_s29 = int_to_ptr.vmem [resolvable:$true] %s376_s29 }
  0x48   : > { %s402_s30 = sshll.u32 %s6047_s14, 4  ;;  %s5889_s19 = scalar_lea.vmem %s377_s29, 32768  ;;  %s403_s30 = int_to_ptr.vmem [resolvable:$true] %s402_s30 }
  0x49   : > { %p5890_p9 = scmp.ne.s32.totalorder %s377_s29, %s5889_s19  ;;  %p5897_p12 = scmp.lt.s32.totalorder %s377_s29, %s377_s29 }
  0x4a   : > { %p5898_p13 = scmp.lt.s32.totalorder %s5889_s19, %s5889_s19 }
  0x4b   : > { %p5892_p10 = pnand %p5890_p9, %p6162_p7 }
  0x4c   : > { %5691 = dma.hbm_to_vmem [thread:$0]  (!%p6152_p6), %s7811_s4, 32768, %s351_s18, [#allocation6], %s7793_s17, %s7793_s17, %s7794_s26  }
  0x4d   : > { %p5893_p11 = pneg %p5892_p10  ;;  %p5899_p0 = por %p5898_p13, %p5897_p12 }
  0x4f   : > { %p5900_p2 = pnand %p5899_p0, %p5893_p11 }
  0x51   : > { %5903 = shalt.err (!%p5900_p2)
}
  0x52   : > { %s7812_s6 = sld [smem:[#allocation23_spill]]  ;;  %s5915_s20 = scalar_lea.vmem %s403_s30, 32768 }
  0x53   : > { %p5916_p5 = scmp.ne.s32.totalorder %s403_s30, %s5915_s20  ;;  %p5923_p10 = scmp.lt.s32.totalorder %s403_s30, %s403_s30 }
  0x54   : > { %p5924_p4 = scmp.lt.s32.totalorder %s5915_s20, %s5915_s20 }
  0x55   : > { %p5918_p8 = pnand %p5916_p5, %p6162_p7 }
  0x56   : > { %p5925_p12 = por %p5924_p4, %p5923_p10 }
  0x57   : > { %p5919_p9 = pneg %p5918_p8 }
  0x58   : > { %5697 = dma.hbm_to_vmem [thread:$0]  (!%p6152_p6), %s7812_s6, 32768, %s377_s29, [#allocation9], %s7793_s17, %s7793_s17, %s7794_s26  }
  0x59   : > { %p5926_p11 = pnand %p5925_p12, %p5919_p9 }
  0x5b   : > { %5929 = shalt.err (!%p5926_p11)
}
  0x5c   : > { %s7813_s8 = sld [smem:[#allocation25_spill]]  ;;  %s5155_s13 = sadd.s32 4294967294, %s6034_s24  }
  0x5d   : > { %s6229_s16 = sadd.s32 1, %s6034_s24   ;;  %s38_s19 = sadd.s32 1, %s6030_s23 }
  0x5e   : > { %s35_s29 = ssub.s32 %s6034_s24, %s6229_s16  ;;  %p45_p7 = scmp.ne.s32.totalorder %s6030_s23, %s6026_s22 }
  0x5f   : > { %p36_p4 = scmp.eq.s32.totalorder %s35_s29, 0  ;;  %p46_p13 = scmp.eq.s32.totalorder %s6034_s24, 0 }
  0x60   : > { %p51_p0 = scmp.ne.s32.totalorder %s6026_s22, %s6022_s21  ;;  %p306_p5 = scmp.eq.s32.totalorder %s6138_s27, 1 }
  0x61   : > { %s6240_s18 = scalar_select %p36_p4, %s6030_s23, %s38_s19  }
  0x62   : > { %5703 = dma.hbm_to_vmem [thread:$0]  (!%p6152_p6), %s7813_s8, 32768, %s403_s30, [#allocation12], %s7793_s17, %s7793_s17, %s7794_s26  }
  0x63   : > { %p6242_p2 = por %p46_p13, %p45_p7  ;;  %p6248_p6 = por %p7795_p1, %p51_p0 }
  0x64   : > { %p312_p8 = scmp.eq.s32.totalorder %s5155_s13, 1  ;;  %p5718_p9 = scmp.lt.s32.totalorder %s6034_s24, 2 }
  0x65   : > { %s7815_s30 = scalar_select %p6248_p6, 1, 0 }
  0x66   : > { %s425_s20 = sand.u32 1, %s6030_s23   ;;  %p6255_p10 = por %p306_p5, %p45_p7 }
  0x67   : > { %p6259_p12 = por %p312_p8, %p51_p0  ;;  %s5164_s29 = sshll.u32 %s425_s20, 7 }
  0x68   : > { %s7816_s25 = scalar_select %p6255_p10, 1, 0 }
  0x69   : > { %s7817_s14 = scalar_select %p6259_p12, 1, 0 }
  0x6a   : > { %s5488_s19 = sshll.u32 %s6034_s24, 11  ;;  %s429_s13 = scalar_lea.vmem [#allocation2], %s5164_s29 }
  0x6b   : > { %s6267_s1 = scalar_lea.hbm %s7780_s0, %s5488_s19  ;;  %s436_s4 = sshll.u32 %s429_s13, 4  ;;  %s6269_s4 = int_to_ptr.vmem [resolvable:$true] %s436_s4 }
  0x6c   : > { %p6273_p11 = pnand %p5718_p9, %p6242_p2  ;;  %s6277_s6 = scalar_lea.sflag [#allocation3], %s425_s20 }
  0x6d   : > { %s5930_s7 = scalar_lea.hbm %s6267_s1, 2048  ;;  %s5935_s29 = scalar_lea.hbm %s7780_s0, 4096 }
  0x6e   : > { %p5931_p4 = scmp.ne.s32.totalorder %s6267_s1, %s5930_s7  ;;  %p5932_p7 = pneg %p6273_p11 }
  0x6f   : > { %p5936_p2 = scmp.lt.s32.totalorder %s6267_s1, %s7780_s0  ;;  %p5937_p5 = scmp.lt.s32.totalorder %s5935_s29, %s5930_s7 }
  0x70   : > { %p5933_p13 = pnand %p5932_p7, %p5931_p4 }
  0x71   : > { %p5938_p8 = por %p5937_p5, %p5936_p2 }
  0x72   : > { %p5934_p0 = pneg %p5933_p13 }
  0x74   : > { %p5939_p9 = pnand %p5938_p8, %p5934_p0 }
  0x76   : > { %5942 = shalt.err (!%p5939_p9)
}
  0x77   : > { %s5943_s15 = scalar_lea.vmem %s6269_s4, 2048  ;;  %s6048_s20 = smov [#allocation2]  }
  0x78   : > { %p5944_p1 = scmp.ne.s32.totalorder %s6269_s4, %s5943_s15  ;;  %s5948_s8 = sshll.u32 %s6048_s20, 4  ;;  %s5949_s8 = int_to_ptr.vmem [resolvable:$false] %s5948_s8 }
  0x79   : > { %s5950_s17 = scalar_lea.vmem %s5949_s8, 4096  ;;  %p5951_p13 = scmp.lt.s32.totalorder %s6269_s4, %s5949_s8 }
  0x7a   : > { %p5946_p12 = pnand %p5944_p1, %p5932_p7  ;;  %p5952_p10 = scmp.lt.s32.totalorder %s5950_s17, %s5943_s15 }
  0x7c   : > { %p5947_p4 = pneg %p5946_p12  ;;  %p5953_p6 = por %p5952_p10, %p5951_p13 }
  0x7e   : > { %p5954_p3 = pnand %p5953_p6, %p5947_p4 }
  0x80   : > { %5957 = shalt.err (!%p5954_p3)
}
  0x81   : > { %s7819_s7 = smov 16   ;;  %s7820_s26 = smov 256  }
  0x82   : > { %5707 = dma.hbm_to_vmem [thread:$0]  (!%p6273_p11), %s6267_s1, 2048, %s6269_s4, %s6277_s6, %s7820_s26, %s7820_s26, %s7819_s7  }
  0x83   : > { %p7821_p1 = scmp.ne.s32.totalorder %s7805_s28, 0 }
  0x84   : > { %s6304_s29 = sand.u32 (!%p7821_p1), 1, %s6026_s22   ;;  %p7822_p3 = scmp.ne.s32.totalorder (!%p7821_p1), %s7815_s30, 0 }
  0x85   : > { %448 = sbr.rel (%p7821_p1) target bundleno = 3465 (0xd89), region = 68  ;;  %s5168_s8 = sshll.u32 (!%p7821_p1), %s6304_s29, 7 }
  0x86   : > { %s451_s19 = scalar_lea.sflag (!%p7821_p1), [#allocation3], %s6304_s29  ;;  %s6308_s13 = scalar_lea.vmem (!%p7821_p1), [#allocation2], %s5168_s8 }
  0x8a   : > { %6001 = dma.done.wait (%p7822_p3), %s451_s19, 2048  }
  0x8b   : > { %6003 = vsyncadd (%p7822_p3), %s451_s19, 4294965248  ;;  %p7823_p6 = scmp.eq.s32.totalorder %s6138_s27, 0 }
  0x8d   : > { %6005 = dma.done.wait (%p7823_p6), [#allocation6], 34816   ;;  %p7824_p10 = pmov %p7823_p6 }
  0x8e   : > { %p7825_p12 = pmov %p7823_p6 }
  0x8f   : > { %6007 = vsyncadd (%p7824_p10), [#allocation6], 4294932480 }
  0x90   : > { %6009 = dma.done.wait (%p7825_p12), [#allocation9], 33280   ;;  %p7826_p11 = pmov %p7823_p6 }
  0x91   : > { %p7827_p7 = pmov %p7823_p6 }
  0x92   : > { %6011 = vsyncadd (%p7826_p11), [#allocation9], 4294934016 }
  0x93   : > { %6013 = dma.done.wait (%p7827_p7), [#allocation12], 33024   ;;  %p7828_p0 = pmov %p7823_p6 }
  0x94   : > { %v6049_v0 = vmov 0.0   ;;  %v6329_v1 = vld [vmem:[%s6308_s13 + $0x78] sm:$0xff]  ;;  %v6332_v2 = vld [vmem:[%s6308_s13 + $0x70] sm:$0xff]  ;;  %v6335_v3 = vld [vmem:[%s6308_s13 + $0x68] sm:$0xff]  ;;  %vm538_vm0 = vcmask 523264   ;;  %vm1583_vm1 = vcmask 261120  }
  0x95   : > { %6015 = vsyncadd (%p7828_p0), [#allocation12], 4294934272  ;;  %615 = vmatprep.mubr.f32.mxu0 %v6049_v0  ;;  %769 = vmatprep.mubr.f32.mxu1 %v6049_v0  ;;  %v6340_v4 = vld [vmem:[%s6308_s13 + $0x60] sm:$0xff]  ;;  %v6345_v5 = vld [vmem:[%s6308_s13 + $0x58] sm:$0xff]  ;;  %vm2505_vm2 = vcmask 130048   ;;  %vm3358_vm3 = vcmask 64512  }
  0x96   : > { %567 = vmatprep.subr.mxu0 %v6329_v1  ;;  %721 = vmatprep.subr.mxu1 %v6329_v1  ;;  %v6350_v6 = vld [vmem:[%s6308_s13 + $0x50] sm:$0xff]  ;;  %v6355_v7 = vld [vmem:[%s6308_s13 + $0x48] sm:$0xff]  ;;  %v6360_v8 = vld [vmem:[%s6308_s13 + $0x40] sm:$0xff]  ;;  %vm4215_vm4 = vcmask 1043456   ;;  %vm4211_vm5 = vcmask 31744   ;;  %vm6050_vm6 = vmmov 0  }
  0x97   : > { %568 = vmatpush1.msra.mxu0 %v6332_v2  ;;  %722 = vmatpush1.msra.mxu1 %v6332_v2  ;;  %v6365_v9 = vld [vmem:[%s6308_s13 + $0x38] sm:$0xff]  ;;  %v6370_v10 = vld [vmem:[%s6308_s13 + $0x30] sm:$0xff]  ;;  %v6375_v11 = vld [vmem:[%s6308_s13 + $0x28] sm:$0xff]  ;;  %s5485_s17 = sshll.u32 %s6138_s27, 4  ;;  %s517_s7 = scalar_lea.vmem [#allocation14], %s6304_s29  ;;  %vm5017_vm7 = vcmask 57344  }
  0x98   : > { %569 = vmatprep.subr.mxu0 %v6335_v3  ;;  %723 = vmatprep.subr.mxu1 %v6335_v3  ;;  %v6380_v12 = vld [vmem:[%s6308_s13 + $0x20] sm:$0xff]  ;;  %v6385_v13 = vld [vmem:[%s6308_s13 + $0x18] sm:$0xff]  ;;  %v6390_v14 = vld [vmem:[%s6308_s13 + $0x10] sm:$0xff]  ;;  %s5032_s26 = sshll.u32 %s517_s7, 4  ;;  %s5020_s1 = scalar_lea.sflag [#allocation4], %s6304_s29  ;;  %s5033_s26 = int_to_ptr.vmem [resolvable:$true] %s5032_s26 }
  0x99   : > { %570 = vmatpush1.msra.mxu0 %v6340_v4  ;;  %724 = vmatpush1.msra.mxu1 %v6340_v4  ;;  %v6395_v15 = vld [vmem:[%s6308_s13 + $0x8] sm:$0xff]  ;;  %v6400_v16 = vld [vmem:[%s6308_s13] sm:$0xff]  ;;  %v5214_v19 = vld [vmem:[%s7782_s2 + $0x278] sm:$0xff]  ;;  %s7743_s13 = scalar_lea.hbm %s7792_s12, %s5485_s17  ;;  %s5958_s4 = scalar_lea.vmem %s5033_s26, 16 }
  0x9a   : > { %571 = vmatprep.subr.mxu0 %v6345_v5  ;;  %725 = vmatprep.subr.mxu1 %v6345_v5  ;;  %v534_v17 = vld [vmem:[#allocation5] sm:$0xff]  ;;  %v671_v20 = vld [vmem:[%s7782_s2 + $0xf8] sm:$0xff]  ;;  %v5213_v21 = vld [vmem:[%s7782_s2 + $0x270] sm:$0xff]  ;;  %p5959_p2 = scmp.ne.s32.totalorder %s5033_s26, %s5958_s4  ;;  %p7829_p5 = scmp.ne.s32.totalorder %s7816_s25, 0 }
  0x9b   : > { %572 = vmatpush1.msra.mxu0 %v6350_v6  ;;  %726 = vmatpush1.msra.mxu1 %v6350_v6  ;;  %v689_v18 = vld [vmem:[#allocation5 + $0x20] sm:$0xff]  ;;  %v670_v22 = vld [vmem:[%s7782_s2 + $0xf0] sm:$0xff]  ;;  %v535_v23 = vld [vmem:[#allocation5 + $0x8] sm:$0xff]  ;;  %s6051_s5 = smov [#allocation14]  }
  0x9c   : > { %573 = vmatprep.subr.mxu0 %v6355_v7  ;;  %727 = vmatprep.subr.mxu1 %v6355_v7  ;;  %v690_v24 = vld [vmem:[#allocation5 + $0x28] sm:$0xff]  ;;  %v5211_v27 = vld [vmem:[%s7782_s2 + $0x260] sm:$0xff]  ;;  %v536_v29 = vld [vmem:[#allocation5 + $0x10] sm:$0xff]  ;;  %p5960_p8 = pnand %p5959_p2, %p7829_p5  ;;  %s5962_s6 = sshll.u32 %s6051_s5, 4  ;;  %s5963_s6 = int_to_ptr.vmem [resolvable:$false] %s5962_s6 }
  0x9d   : > { %574 = vmatpush1.msra.mxu0 %v6360_v8  ;;  %728 = vmatpush1.msra.mxu1 %v6360_v8  ;;  %v5212_v25 = vld [vmem:[%s7782_s2 + $0x268] sm:$0xff]  ;;  %v668_v28 = vld [vmem:[%s7782_s2 + $0xe0] sm:$0xff]  ;;  %v691_v30 = vld [vmem:[#allocation5 + $0x30] sm:$0xff]  ;;  %s5964_s27 = scalar_lea.vmem %s5963_s6, 32  ;;  %p5965_p4 = scmp.lt.s32.totalorder %s5033_s26, %s5963_s6 }
  0x9e   : > { %575 = vmatprep.subr.mxu0 %v6365_v9  ;;  %729 = vmatprep.subr.mxu1 %v6365_v9  ;;  %v669_v26 = vld [vmem:[%s7782_s2 + $0xe8] sm:$0xff]  ;;  %v5210_v31 = vld [vmem:[%s7782_s2 + $0x258] sm:$0xff]  ;;  %v5209_v33 = vld [vmem:[%s7782_s2 + $0x250] sm:$0xff]  ;;  %p5961_p9 = pneg %p5960_p8  ;;  %p5966_p13 = scmp.lt.s32.totalorder %s5964_s27, %s5958_s4 }
  0x9f   : > { %576 = vmatpush1.msra.mxu0 %v6370_v10  ;;  %730 = vmatpush1.msra.mxu1 %v6370_v10  ;;  %v667_v32 = vld [vmem:[%s7782_s2 + $0xd8] sm:$0xff]  ;;  %v666_v34 = vld [vmem:[%s7782_s2 + $0xd0] sm:$0xff]  ;;  %v5208_v37 = vld [vmem:[%s7782_s2 + $0x248] sm:$0xff] }
  0xa0   : > { %577 = vmatprep.subr.mxu0 %v6375_v11  ;;  %731 = vmatprep.subr.mxu1 %v6375_v11  ;;  %v537_v35 = vld [vmem:[#allocation5 + $0x18] sm:$0xff]  ;;  %v665_v38 = vld [vmem:[%s7782_s2 + $0xc8] sm:$0xff]  ;;  %v5207_v39 = vld [vmem:[%s7782_s2 + $0x240] sm:$0xff]  ;;  %p5967_p1 = por %p5966_p13, %p5965_p4 }
  0xa1   : > { %578 = vmatpush1.msra.mxu0 %v6380_v12  ;;  %732 = vmatpush1.msra.mxu1 %v6380_v12  ;;  %v692_v36 = vld [vmem:[#allocation5 + $0x38] sm:$0xff]  ;;  %v664_v40 = vld [vmem:[%s7782_s2 + $0xc0] sm:$0xff]  ;;  %v5205_v43 = vld [vmem:[%s7782_s2 + $0x230] sm:$0xff] }
  0xa2   : > { %579 = vmatprep.subr.mxu0 %v6385_v13  ;;  %733 = vmatprep.subr.mxu1 %v6385_v13  ;;  %v5206_v41 = vld [vmem:[%s7782_s2 + $0x238] sm:$0xff]  ;;  %v662_v44 = vld [vmem:[%s7782_s2 + $0xb0] sm:$0xff]  ;;  %v5204_v45 = vld [vmem:[%s7782_s2 + $0x228] sm:$0xff]  ;;  %p5968_p3 = pnand %p5967_p1, %p5961_p9 }
  0xa3   : > { %580 = vmatpush1.msra.mxu0 %v6390_v14  ;;  %734 = vmatpush1.msra.mxu1 %v6390_v14  ;;  %v663_v42 = vld [vmem:[%s7782_s2 + $0xb8] sm:$0xff]  ;;  %v661_v46 = vld [vmem:[%s7782_s2 + $0xa8] sm:$0xff]  ;;  %v5203_v47 = vld [vmem:[%s7782_s2 + $0x220] sm:$0xff] }
  0xa4   : > { %581 = vmatprep.subr.mxu0 %v6395_v15  ;;  %735 = vmatprep.subr.mxu1 %v6395_v15  ;;  %v660_v48 = vld [vmem:[%s7782_s2 + $0xa0] sm:$0xff]  ;;  %v5202_v49 = vld [vmem:[%s7782_s2 + $0x218] sm:$0xff]  ;;  %v5201_v51 = vld [vmem:[%s7782_s2 + $0x210] sm:$0xff] }
  0xa5   : > { %582 = vmatpush1.msra.mxu0 %v6400_v16  ;;  %736 = vmatpush1.msra.mxu1 %v6400_v16  ;;  %v659_v50 = vld [vmem:[%s7782_s2 + $0x98] sm:$0xff]  ;;  %v658_v52 = vld [vmem:[%s7782_s2 + $0x90] sm:$0xff]  ;;  %v5200_v53 = vld [vmem:[%s7782_s2 + $0x208] sm:$0xff] }
  0xa6   : > { %5175 = vmatmul.mubr.msk.f32.vlgmr.msra.gmra.mxu0 %vm538_vm0, %v534_v17  ;;  %5179 = vmatmul.mubr.msk.f32.vlgmr.msra.gmra.mxu1 %vm538_vm0, %v689_v18  ;;  %v657_v54 = vld [vmem:[%s7782_s2 + $0x88] sm:$0xff]  ;;  %v5199_v55 = vld [vmem:[%s7782_s2 + $0x200] sm:$0xff]  ;;  %v5198_v57 = vld [vmem:[%s7782_s2 + $0x1f8] sm:$0xff] }
  0xa7   : > { %621 = vmatprep.mubr.f32.mxu0 %v6049_v0  ;;  %775 = vmatprep.mubr.f32.mxu1 %v6049_v0  ;;  %v656_v56 = vld [vmem:[%s7782_s2 + $0x80] sm:$0xff]  ;;  %v655_v58 = vld [vmem:[%s7782_s2 + $0x78] sm:$0xff]  ;;  %v5197_v59 = vld [vmem:[%s7782_s2 + $0x1f0] sm:$0xff] }
  0xa8   : > { %855 = vmatprep.subr.mxu0 %v5214_v19  ;;  %956 = vmatprep.subr.mxu1 %v671_v20  ;;  %v654_v60 = vld [vmem:[%s7782_s2 + $0x70] sm:$0xff]  ;;  %v5196_v61 = vld [vmem:[%s7782_s2 + $0x1e8] sm:$0xff]  ;;  %v5195_v63 = vld [vmem:[%s7782_s2 + $0x1e0] sm:$0xff] }
  0xa9   : > { %856 = vmatpush1.msra.mxu0 %v5213_v21  ;;  %957 = vmatpush1.msra.mxu1 %v670_v22  ;;  %v653_v62 = vld [vmem:[%s7782_s2 + $0x68] sm:$0xff]  ;;  %v652_v17 = vld [vmem:[%s7782_s2 + $0x60] sm:$0xff]  ;;  %v5194_v18 = vld [vmem:[%s7782_s2 + $0x1d8] sm:$0xff] }
  0xaa   : > { %5176 = vmatmul.mubr.msk.f32.gmra.mxu0 %vm538_vm0, %v535_v23  ;;  %5180 = vmatmul.mubr.msk.f32.gmra.mxu1 %vm538_vm0, %v690_v24  ;;  %v651_v19 = vld [vmem:[%s7782_s2 + $0x58] sm:$0xff]  ;;  %v5193_v20 = vld [vmem:[%s7782_s2 + $0x1d0] sm:$0xff]  ;;  %v5192_v22 = vld [vmem:[%s7782_s2 + $0x1c8] sm:$0xff] }
  0xab   : > { %627 = vmatprep.mubr.f32.mxu0 %v6049_v0  ;;  %781 = vmatprep.mubr.f32.mxu1 %v6049_v0  ;;  %v650_v21 = vld [vmem:[%s7782_s2 + $0x50] sm:$0xff]  ;;  %v649_v23 = vld [vmem:[%s7782_s2 + $0x48] sm:$0xff]  ;;  %v5191_v24 = vld [vmem:[%s7782_s2 + $0x1c0] sm:$0xff] }
  0xac   : > { %857 = vmatprep.subr.mxu0 %v5212_v25  ;;  %958 = vmatprep.subr.mxu1 %v669_v26  ;;  %v648_v25 = vld [vmem:[%s7782_s2 + $0x40] sm:$0xff]  ;;  %v5190_v26 = vld [vmem:[%s7782_s2 + $0x1b8] sm:$0xff] }
  0xad   : > { %858 = vmatpush1.msra.mxu0 %v5211_v27  ;;  %959 = vmatpush1.msra.mxu1 %v668_v28  ;;  %v647_v27 = vld [vmem:[%s7782_s2 + $0x38] sm:$0xff]  ;;  %v5189_v28 = vld [vmem:[%s7782_s2 + $0x1b0] sm:$0xff] }
  0xae   : > { %5177 = vmatmul.mubr.msk.f32.gmra.mxu0 %vm538_vm0, %v536_v29  ;;  %5181 = vmatmul.mubr.msk.f32.gmra.mxu1 %vm538_vm0, %v691_v30  ;;  %v646_v29 = vld [vmem:[%s7782_s2 + $0x30] sm:$0xff]  ;;  %v5188_v30 = vld [vmem:[%s7782_s2 + $0x1a8] sm:$0xff] }
  0xaf   : > { %633 = vmatprep.mubr.f32.mxu0 %v6049_v0  ;;  %787 = vmatprep.mubr.f32.mxu1 %v6049_v0 }
  0xb0   : > { %859 = vmatprep.subr.mxu0 %v5210_v31  ;;  %960 = vmatprep.subr.mxu1 %v667_v32  ;;  %v645_v31 = vld [vmem:[%s7782_s2 + $0x28] sm:$0xff]  ;;  %v5187_v32 = vld [vmem:[%s7782_s2 + $0x1a0] sm:$0xff] }
  0xb1   : > { %860 = vmatpush1.msra.mxu0 %v5209_v33  ;;  %961 = vmatpush1.msra.mxu1 %v666_v34  ;;  %v644_v33 = vld [vmem:[%s7782_s2 + $0x20] sm:$0xff]  ;;  %v5186_v34 = vld [vmem:[%s7782_s2 + $0x198] sm:$0xff] }
  0xb2   : > { %5178 = vmatmul.mubr.msk.f32.gmra.mxu0 %vm538_vm0, %v537_v35  ;;  %5182 = vmatmul.mubr.msk.f32.gmra.mxu1 %vm538_vm0, %v692_v36  ;;  %v643_v35 = vld [vmem:[%s7782_s2 + $0x18] sm:$0xff]  ;;  %v5185_v36 = vld [vmem:[%s7782_s2 + $0x190] sm:$0xff] }
  0xb3   : > { %861 = vmatprep.subr.mxu0 %v5208_v37  ;;  %962 = vmatprep.subr.mxu1 %v665_v38  ;;  %v642_v37 = vld [vmem:[%s7782_s2 + $0x10] sm:$0xff]  ;;  %v5184_v38 = vld [vmem:[%s7782_s2 + $0x188] sm:$0xff] }
  0xb4   : > { %862 = vmatpush1.msra.mxu0 %v5207_v39  ;;  %963 = vmatpush1.msra.mxu1 %v664_v40  ;;  %v641_v39 = vld [vmem:[%s7782_s2 + $0x8] sm:$0xff]  ;;  %v5183_v40 = vld [vmem:[%s7782_s2 + $0x180] sm:$0xff] }
  0xb5   : > { %863 = vmatprep.subr.mxu0 %v5206_v41  ;;  %964 = vmatprep.subr.mxu1 %v663_v42  ;;  %v640_v41 = vld [vmem:[%s7782_s2] sm:$0xff]  ;;  %v5230_v42 = vld [vmem:[%s7782_s2 + $0x2f8] sm:$0xff] }
  0xb6   : > { %864 = vmatpush1.msra.mxu0 %v5205_v43  ;;  %965 = vmatpush1.msra.mxu1 %v662_v44  ;;  %v687_v43 = vld [vmem:[%s7782_s2 + $0x178] sm:$0xff]  ;;  %v5229_v44 = vld [vmem:[%s7782_s2 + $0x2f0] sm:$0xff] }
  0xb7   : > { %865 = vmatprep.subr.mxu0 %v5204_v45  ;;  %966 = vmatprep.subr.mxu1 %v661_v46  ;;  %v686_v45 = vld [vmem:[%s7782_s2 + $0x170] sm:$0xff]  ;;  %v5228_v46 = vld [vmem:[%s7782_s2 + $0x2e8] sm:$0xff] }
  0xb8   : > { %866 = vmatpush1.msra.mxu0 %v5203_v47  ;;  %967 = vmatpush1.msra.mxu1 %v660_v48  ;;  %v685_v47 = vld [vmem:[%s7782_s2 + $0x168] sm:$0xff]  ;;  %v5227_v48 = vld [vmem:[%s7782_s2 + $0x2e0] sm:$0xff] }
  0xb9   : > { %867 = vmatprep.subr.mxu0 %v5202_v49  ;;  %968 = vmatprep.subr.mxu1 %v659_v50  ;;  %v684_v49 = vld [vmem:[%s7782_s2 + $0x160] sm:$0xff]  ;;  %v5226_v50 = vld [vmem:[%s7782_s2 + $0x2d8] sm:$0xff] }
  0xba   : > { %868 = vmatpush1.msra.mxu0 %v5201_v51  ;;  %969 = vmatpush1.msra.mxu1 %v658_v52  ;;  %v683_v51 = vld [vmem:[%s7782_s2 + $0x158] sm:$0xff]  ;;  %v5225_v52 = vld [vmem:[%s7782_s2 + $0x2d0] sm:$0xff] }
  0xbb   : > { %869 = vmatprep.subr.mxu0 %v5200_v53  ;;  %970 = vmatprep.subr.mxu1 %v657_v54  ;;  %v682_v53 = vld [vmem:[%s7782_s2 + $0x150] sm:$0xff]  ;;  %v5224_v54 = vld [vmem:[%s7782_s2 + $0x2c8] sm:$0xff] }
  0xbc   : > { %870 = vmatpush1.msra.mxu0 %v5199_v55  ;;  %971 = vmatpush1.msra.mxu1 %v656_v56  ;;  %v681_v55 = vld [vmem:[%s7782_s2 + $0x148] sm:$0xff]  ;;  %v5223_v56 = vld [vmem:[%s7782_s2 + $0x2c0] sm:$0xff] }
  0xbd   : > { %871 = vmatprep.subr.mxu0 %v5198_v57  ;;  %972 = vmatprep.subr.mxu1 %v655_v58  ;;  %v680_v57 = vld [vmem:[%s7782_s2 + $0x140] sm:$0xff]  ;;  %v5222_v58 = vld [vmem:[%s7782_s2 + $0x2b8] sm:$0xff] }
  0xbe   : > { %872 = vmatpush1.msra.mxu0 %v5197_v59  ;;  %973 = vmatpush1.msra.mxu1 %v654_v60  ;;  %v679_v59 = vld [vmem:[%s7782_s2 + $0x138] sm:$0xff]  ;;  %v5221_v60 = vld [vmem:[%s7782_s2 + $0x2b0] sm:$0xff] }
  0xbf   : > { %873 = vmatprep.subr.mxu0 %v5196_v61  ;;  %974 = vmatprep.subr.mxu1 %v653_v62  ;;  %v678_v61 = vld [vmem:[%s7782_s2 + $0x130] sm:$0xff]  ;;  %v5220_v62 = vld [vmem:[%s7782_s2 + $0x2a8] sm:$0xff] }
  0xc0   : > { %874 = vmatpush1.msra.mxu0 %v5195_v63  ;;  %975 = vmatpush1.msra.mxu1 %v652_v17  ;;  %v677_v63 = vld [vmem:[%s7782_s2 + $0x128] sm:$0xff]  ;;  %v5219_v17 = vld [vmem:[%s7782_s2 + $0x2a0] sm:$0xff] }
  0xc1   : > { %875 = vmatprep.subr.mxu0 %v5194_v18  ;;  %976 = vmatprep.subr.mxu1 %v651_v19  ;;  %v676_v18 = vld [vmem:[%s7782_s2 + $0x120] sm:$0xff]  ;;  %v5218_v19 = vld [vmem:[%s7782_s2 + $0x298] sm:$0xff] }
  0xc2   : > { %876 = vmatpush1.msra.mxu0 %v5193_v20  ;;  %977 = vmatpush1.msra.mxu1 %v650_v21  ;;  %v675_v20 = vld [vmem:[%s7782_s2 + $0x118] sm:$0xff]  ;;  %v5217_v21 = vld [vmem:[%s7782_s2 + $0x290] sm:$0xff] }
  0xc3   : > { %877 = vmatprep.subr.mxu0 %v5192_v22  ;;  %978 = vmatprep.subr.mxu1 %v649_v23  ;;  %v674_v22 = vld [vmem:[%s7782_s2 + $0x110] sm:$0xff]  ;;  %v5216_v23 = vld [vmem:[%s7782_s2 + $0x288] sm:$0xff] }
  0xc4   : > { %878 = vmatpush1.msra.mxu0 %v5191_v24  ;;  %979 = vmatpush1.msra.mxu1 %v648_v25  ;;  %v673_v24 = vld [vmem:[%s7782_s2 + $0x108] sm:$0xff]  ;;  %v5215_v25 = vld [vmem:[%s7782_s2 + $0x280] sm:$0xff] }
  0xc5   : > { %879 = vmatprep.subr.mxu0 %v5190_v26  ;;  %980 = vmatprep.subr.mxu1 %v647_v27  ;;  %v672_v26 = vld [vmem:[%s7782_s2 + $0x100] sm:$0xff]  ;;  %v5274_v27 = vld [vmem:[%s7782_s2 + $0x3f8] sm:$0xff] }
  0xc6   : > { %880 = vmatpush1.msra.mxu0 %v5189_v28  ;;  %981 = vmatpush1.msra.mxu1 %v646_v29 }
  0xc7   : > { %881 = vmatprep.subr.mxu0 %v5188_v30  ;;  %982 = vmatprep.subr.mxu1 %v645_v31 }
  0xc8   : > { %882 = vmatpush1.msra.mxu0 %v5187_v32  ;;  %983 = vmatpush1.msra.mxu1 %v644_v33  ;;  %v5273_v32 = vld [vmem:[%s7782_s2 + $0x3f0] sm:$0xff]  ;;  %v5272_v33 = vld [vmem:[%s7782_s2 + $0x3e8] sm:$0xff] }
  0xc9   : > { %883 = vmatprep.subr.mxu0 %v5186_v34  ;;  %984 = vmatprep.subr.mxu1 %v643_v35 }
  0xca   : > { %884 = vmatpush1.msra.mxu0 %v5185_v36  ;;  %985 = vmatpush1.msra.mxu1 %v642_v37 }
  0xcb   : > { %885 = vmatprep.subr.mxu0 %v5184_v38  ;;  %986 = vmatprep.subr.mxu1 %v641_v39  ;;  %v5271_v38 = vld [vmem:[%s7782_s2 + $0x3e0] sm:$0xff] }
  0xcc   : > { %886 = vmatpush1.msra.mxu0 %v5183_v40  ;;  %987 = vmatpush1.msra.mxu1 %v640_v41 }
  0xcd   : > { %903 = vmatprep.subr.mxu0 %v5230_v42  ;;  %1004 = vmatprep.subr.mxu1 %v687_v43  ;;  %v5270_v43 = vld [vmem:[%s7782_s2 + $0x3d8] sm:$0xff] }
  0xce   : > { %904 = vmatpush2.msra.mxu0 %v5229_v44  ;;  %1005 = vmatpush2.msra.mxu1 %v686_v45 }
  0xcf   : > { %905 = vmatprep.subr.mxu0 %v5228_v46  ;;  %1006 = vmatprep.subr.mxu1 %v685_v47 }
  0xd0   : > { %906 = vmatpush2.msra.mxu0 %v5227_v48  ;;  %1007 = vmatpush2.msra.mxu1 %v684_v49  ;;  %v5269_v48 = vld [vmem:[%s7782_s2 + $0x3d0] sm:$0xff]  ;;  %v5268_v49 = vld [vmem:[%s7782_s2 + $0x3c8] sm:$0xff] }
  0xd1   : > { %907 = vmatprep.subr.mxu0 %v5226_v50  ;;  %1008 = vmatprep.subr.mxu1 %v683_v51  ;;  %v1046_v50 = vld [vmem:[#allocation5 + $0x40] sm:$0xff] }
  0xd2   : > { %908 = vmatpush2.msra.mxu0 %v5225_v52  ;;  %1009 = vmatpush2.msra.mxu1 %v682_v53  ;;  %v5267_v51 = vld [vmem:[%s7782_s2 + $0x3c0] sm:$0xff]  ;;  %v5266_v52 = vld [vmem:[%s7782_s2 + $0x3b8] sm:$0xff]  ;;  %v1047_v53 = vld [vmem:[#allocation5 + $0x48] sm:$0xff] }
  0xd3   : > { %909 = vmatprep.subr.mxu0 %v5224_v54  ;;  %1010 = vmatprep.subr.mxu1 %v681_v55  ;;  %v5265_v54 = vld [vmem:[%s7782_s2 + $0x3b0] sm:$0xff]  ;;  %v5255_v55 = vld [vmem:[%s7782_s2 + $0x360] sm:$0xff] }
  0xd4   : > { %910 = vmatpush2.msra.mxu0 %v5223_v56  ;;  %1011 = vmatpush2.msra.mxu1 %v680_v57  ;;  %v5327_v56 = vld [vmem:[%s7782_s2 + $0x560] sm:$0xff]  ;;  %v5254_v57 = vld [vmem:[%s7782_s2 + $0x358] sm:$0xff] }
  0xd5   : > { %911 = vmatprep.subr.mxu0 %v5222_v58  ;;  %1012 = vmatprep.subr.mxu1 %v679_v59  ;;  %v5326_v58 = vld [vmem:[%s7782_s2 + $0x558] sm:$0xff]  ;;  %v5253_v59 = vld [vmem:[%s7782_s2 + $0x350] sm:$0xff] }
  0xd6   : > { %912 = vmatpush2.msra.mxu0 %v5221_v60  ;;  %1013 = vmatpush2.msra.mxu1 %v678_v61  ;;  %v1312_v60 = vld [vmem:[#allocation5 + $0x70] sm:$0xff]  ;;  %v5252_v61 = vld [vmem:[%s7782_s2 + $0x348] sm:$0xff] }
  0xd7   : > { %913 = vmatprep.subr.mxu0 %v5220_v62  ;;  %1014 = vmatprep.subr.mxu1 %v677_v63  ;;  %v5325_v62 = vld [vmem:[%s7782_s2 + $0x550] sm:$0xff]  ;;  %v5324_v63 = vld [vmem:[%s7782_s2 + $0x548] sm:$0xff] }
  0xd8   : > { %914 = vmatpush2.msra.mxu0 %v5219_v17  ;;  %1015 = vmatpush2.msra.mxu1 %v676_v18  ;;  %v5251_v17 = vld [vmem:[%s7782_s2 + $0x340] sm:$0xff] }
  0xd9   : > { %915 = vmatprep.subr.mxu0 %v5218_v19  ;;  %1016 = vmatprep.subr.mxu1 %v675_v20  ;;  %v5323_v18 = vld [vmem:[%s7782_s2 + $0x540] sm:$0xff]  ;;  %v5250_v19 = vld [vmem:[%s7782_s2 + $0x338] sm:$0xff] }
  0xda   : > { %916 = vmatpush2.msra.mxu0 %v5217_v21  ;;  %1017 = vmatpush2.msra.mxu1 %v674_v22  ;;  %v1313_v20 = vld [vmem:[#allocation5 + $0x78] sm:$0xff]  ;;  %v5249_v22 = vld [vmem:[%s7782_s2 + $0x330] sm:$0xff] }
  0xdb   : > { %917 = vmatprep.subr.mxu0 %v5216_v23  ;;  %1018 = vmatprep.subr.mxu1 %v673_v24  ;;  %v5322_v21 = vld [vmem:[%s7782_s2 + $0x538] sm:$0xff]  ;;  %v5321_v23 = vld [vmem:[%s7782_s2 + $0x530] sm:$0xff]  ;;  %v5248_v24 = vld [vmem:[%s7782_s2 + $0x328] sm:$0xff] }
  0xdc   : > { %918 = vmatpush2.msra.mxu0 %v5215_v25  ;;  %1019 = vmatpush2.msra.mxu1 %v672_v26  ;;  %v5320_v25 = vld [vmem:[%s7782_s2 + $0x528] sm:$0xff]  ;;  %v5247_v26 = vld [vmem:[%s7782_s2 + $0x320] sm:$0xff] }
  0xdd   : > { %1078 = vmatprep.subr.mxu0 %v6329_v1  ;;  %1212 = vmatprep.subr.mxu1 %v5274_v27  ;;  %v5319_v27 = vld [vmem:[%s7782_s2 + $0x520] sm:$0xff] }
 0x166   : > { %v617_v28 = vpop.f32.mrf.mxu0  ;;  %v771_v29 = vpop.f32.mrf.mxu1 }
 0x168   : > { %v619_v30 = vpop.f32.mrf.mxu0  ;;  %v773_v31 = vpop.f32.mrf.mxu1 }
 0x169   : > { %5231 = vmatprep.mubr.msk.f32.mxu0 %vm538_vm0, %v773_v31  ;;  %5235 = vmatprep.mubr.msk.f32.mxu1 %vm538_vm0, %v619_v30  ;;  %v5245_v30 = vld [vmem:[%s7782_s2 + $0x310] sm:$0xff] }
 0x16a   : > { %v623_v34 = vpop.f32.mrf.mxu0  ;;  %v777_v35 = vpop.f32.mrf.mxu1  ;;  %920 = vmatmul.mubr.f32.vlgmr.msra.gmra.mxu0 %v771_v29  ;;  %1021 = vmatmul.mubr.f32.vlgmr.msra.gmra.mxu1 %v617_v28  ;;  %v5246_v28 = vld [vmem:[%s7782_s2 + $0x318] sm:$0xff]  ;;  %v5317_v31 = vld [vmem:[%s7782_s2 + $0x510] sm:$0xff] }
 0x16b   : > { %1079 = vmatpush1.msra.mxu0 %v6332_v2  ;;  %1213 = vmatpush1.msra.mxu1 %v5273_v32  ;;  %v5318_v29 = vld [vmem:[%s7782_s2 + $0x518] sm:$0xff]  ;;  %v5244_v32 = vld [vmem:[%s7782_s2 + $0x308] sm:$0xff] }
 0x16c   : > { %v625_v36 = vpop.f32.mrf.mxu0  ;;  %v779_v37 = vpop.f32.mrf.mxu1  ;;  %1080 = vmatprep.subr.mxu0 %v6335_v3  ;;  %1214 = vmatprep.subr.mxu1 %v5272_v33  ;;  %v5316_v33 = vld [vmem:[%s7782_s2 + $0x508] sm:$0xff] }
 0x16d   : > { %5232 = vmatprep.mubr.msk.f32.mxu0 %vm538_vm0, %v779_v37  ;;  %5236 = vmatprep.mubr.msk.f32.mxu1 %vm538_vm0, %v625_v36  ;;  %v5290_v36 = vld [vmem:[%s7782_s2 + $0x478] sm:$0xff] }
 0x16e   : > { %1081 = vmatpush1.msra.mxu0 %v6340_v4  ;;  %v629_v39 = vpop.f32.mrf.mxu0  ;;  %v783_v40 = vpop.f32.mrf.mxu1  ;;  %1027 = vmatmul.mubr.f32.gmra.mxu1 %v623_v34  ;;  %v5243_v34 = vld [vmem:[%s7782_s2 + $0x300] sm:$0xff]  ;;  %v5314_v37 = vld [vmem:[%s7782_s2 + $0x4f8] sm:$0xff] }
 0x16f   : > { %926 = vmatmul.mubr.f32.gmra.mxu0 %v777_v35  ;;  %1082 = vmatprep.subr.mxu0 %v6345_v5  ;;  %v5315_v35 = vld [vmem:[%s7782_s2 + $0x500] sm:$0xff] }
 0x170   : > { %1083 = vmatpush1.msra.mxu0 %v6350_v6  ;;  %v631_v41 = vpop.f32.mrf.mxu0  ;;  %v785_v42 = vpop.f32.mrf.mxu1  ;;  %1215 = vmatpush1.msra.mxu1 %v5271_v38  ;;  %v5289_v38 = vld [vmem:[%s7782_s2 + $0x470] sm:$0xff] }
 0x171   : > { %1084 = vmatprep.subr.mxu0 %v6355_v7  ;;  %5233 = vmatprep.mubr.msk.f32.mxu0 %vm538_vm0, %v785_v42  ;;  %v5287_v42 = vld [vmem:[%s7782_s2 + $0x460] sm:$0xff] }
 0x172   : > { %5237 = vmatprep.mubr.msk.f32.mxu1 %vm538_vm0, %v631_v41  ;;  %1085 = vmatpush1.msra.mxu0 %v6360_v8  ;;  %v635_v44 = vpop.f32.mrf.mxu0  ;;  %v789_v45 = vpop.f32.mrf.mxu1  ;;  %v5312_v41 = vld [vmem:[%s7782_s2 + $0x4e8] sm:$0xff] }
 0x173   : > { %932 = vmatmul.mubr.f32.gmra.mxu0 %v783_v40  ;;  %1033 = vmatmul.mubr.f32.gmra.mxu1 %v629_v39  ;;  %v5313_v39 = vld [vmem:[%s7782_s2 + $0x4f0] sm:$0xff]  ;;  %v5288_v40 = vld [vmem:[%s7782_s2 + $0x468] sm:$0xff] }
 0x174   : > { %1086 = vmatprep.subr.mxu0 %v6365_v9  ;;  %v637_v46 = vpop.f32.mrf.mxu0  ;;  %v791_v47 = vpop.f32.mrf.mxu1  ;;  %1216 = vmatprep.subr.mxu1 %v5270_v43  ;;  %v5311_v43 = vld [vmem:[%s7782_s2 + $0x4e0] sm:$0xff] }
 0x175   : > { %1087 = vmatpush1.msra.mxu0 %v6370_v10  ;;  %5234 = vmatprep.mubr.msk.f32.mxu0 %vm538_vm0, %v791_v47  ;;  %v5309_v47 = vld [vmem:[%s7782_s2 + $0x4d0] sm:$0xff] }
 0x176   : > { %1088 = vmatprep.subr.mxu0 %v6375_v11  ;;  %5238 = vmatprep.mubr.msk.f32.mxu1 %vm538_vm0, %v637_v46  ;;  %v5285_v46 = vld [vmem:[%s7782_s2 + $0x450] sm:$0xff] }
 0x177   : > { %1089 = vmatpush1.msra.mxu0 %v6380_v12  ;;  %1039 = vmatmul.mubr.f32.gmra.mxu1 %v635_v44  ;;  %v5286_v44 = vld [vmem:[%s7782_s2 + $0x458] sm:$0xff] }
 0x178   : > { %938 = vmatmul.mubr.f32.gmra.mxu0 %v789_v45  ;;  %1090 = vmatprep.subr.mxu0 %v6385_v13  ;;  %v5310_v45 = vld [vmem:[%s7782_s2 + $0x4d8] sm:$0xff] }
 0x179   : > { %1091 = vmatpush1.msra.mxu0 %v6390_v14  ;;  %1126 = vmatprep.mubr.f32.mxu0 %v6049_v0 }
 0x17a   : > { %1092 = vmatprep.subr.mxu0 %v6395_v15  ;;  %1217 = vmatpush1.msra.mxu1 %v5269_v48  ;;  %v5284_v48 = vld [vmem:[%s7782_s2 + $0x448] sm:$0xff] }
 0x17b   : > { %1093 = vmatpush1.msra.mxu0 %v6400_v16  ;;  %1218 = vmatprep.subr.mxu1 %v5268_v49  ;;  %v5308_v49 = vld [vmem:[%s7782_s2 + $0x4c8] sm:$0xff] }
 0x17c   : > { %5239 = vmatmul.mubr.msk.f32.vlgmr.msra.gmra.mxu0 %vm538_vm0, %v1046_v50  ;;  %1342 = vmatprep.subr.mxu0 %v6329_v1  ;;  %v5264_v1 = vld [vmem:[%s7782_s2 + $0x3a8] sm:$0xff]  ;;  %v5283_v50 = vld [vmem:[%s7782_s2 + $0x440] sm:$0xff] }
 0x17d   : > { %1343 = vmatpush1.msra.mxu0 %v6332_v2  ;;  %1132 = vmatprep.mubr.f32.mxu0 %v6049_v0  ;;  %v1048_v2 = vld [vmem:[#allocation5 + $0x50] sm:$0xff] }
 0x17e   : > { %1344 = vmatprep.subr.mxu0 %v6335_v3  ;;  %1219 = vmatpush1.msra.mxu1 %v5267_v51  ;;  %v5263_v3 = vld [vmem:[%s7782_s2 + $0x3a0] sm:$0xff] }
 0x17f   : > { %1345 = vmatpush1.msra.mxu0 %v6340_v4  ;;  %1220 = vmatprep.subr.mxu1 %v5266_v52  ;;  %v5262_v4 = vld [vmem:[%s7782_s2 + $0x398] sm:$0xff]  ;;  %v5307_v51 = vld [vmem:[%s7782_s2 + $0x4c0] sm:$0xff] }
 0x180   : > { %5240 = vmatmul.mubr.msk.f32.gmra.mxu0 %vm538_vm0, %v1047_v53  ;;  %1346 = vmatprep.subr.mxu0 %v6345_v5  ;;  %v1049_v5 = vld [vmem:[#allocation5 + $0x58] sm:$0xff] }
 0x181   : > { %1347 = vmatpush1.msra.mxu0 %v6350_v6  ;;  %1138 = vmatprep.mubr.f32.mxu0 %v6049_v0  ;;  %v5261_v6 = vld [vmem:[%s7782_s2 + $0x390] sm:$0xff]  ;;  %v5282_v52 = vld [vmem:[%s7782_s2 + $0x438] sm:$0xff] }
 0x182   : > { %1348 = vmatprep.subr.mxu0 %v6355_v7  ;;  %1221 = vmatpush1.msra.mxu1 %v5265_v54  ;;  %v5260_v7 = vld [vmem:[%s7782_s2 + $0x388] sm:$0xff]  ;;  %v5306_v53 = vld [vmem:[%s7782_s2 + $0x4b8] sm:$0xff]  ;;  %v5281_v54 = vld [vmem:[%s7782_s2 + $0x430] sm:$0xff] }
 0x183   : > { %1349 = vmatpush1.msra.mxu0 %v6360_v8  ;;  %1222 = vmatprep.subr.mxu1 %v5264_v1  ;;  %v1310_v8 = vld [vmem:[#allocation5 + $0x60] sm:$0xff]  ;;  %v5305_v1 = vld [vmem:[%s7782_s2 + $0x4b0] sm:$0xff] }
 0x184   : > { %5241 = vmatmul.mubr.msk.f32.gmra.mxu0 %vm538_vm0, %v1048_v2  ;;  %1350 = vmatprep.subr.mxu0 %v6365_v9  ;;  %v5259_v9 = vld [vmem:[%s7782_s2 + $0x380] sm:$0xff]  ;;  %v5280_v2 = vld [vmem:[%s7782_s2 + $0x428] sm:$0xff] }
 0x185   : > { %1351 = vmatpush1.msra.mxu0 %v6370_v10  ;;  %1144 = vmatprep.mubr.f32.mxu0 %v6049_v0  ;;  %v5258_v10 = vld [vmem:[%s7782_s2 + $0x378] sm:$0xff] }
 0x186   : > { %1352 = vmatprep.subr.mxu0 %v6375_v11  ;;  %1223 = vmatpush1.msra.mxu1 %v5263_v3  ;;  %v5330_v11 = vld [vmem:[%s7782_s2 + $0x578] sm:$0xff]  ;;  %v5304_v3 = vld [vmem:[%s7782_s2 + $0x4a8] sm:$0xff] }
 0x187   : > { %1353 = vmatpush1.msra.mxu0 %v6380_v12  ;;  %1224 = vmatprep.subr.mxu1 %v5262_v4  ;;  %v5257_v12 = vld [vmem:[%s7782_s2 + $0x370] sm:$0xff]  ;;  %v5279_v4 = vld [vmem:[%s7782_s2 + $0x420] sm:$0xff] }
 0x188   : > { %5242 = vmatmul.mubr.msk.f32.gmra.mxu0 %vm538_vm0, %v1049_v5  ;;  %1354 = vmatprep.subr.mxu0 %v6385_v13  ;;  %v5329_v13 = vld [vmem:[%s7782_s2 + $0x570] sm:$0xff]  ;;  %v5303_v5 = vld [vmem:[%s7782_s2 + $0x4a0] sm:$0xff] }
 0x189   : > { %1355 = vmatpush1.msra.mxu0 %v6390_v14  ;;  %1390 = vmatprep.mubr.f32.mxu0 %v6049_v0  ;;  %v5256_v14 = vld [vmem:[%s7782_s2 + $0x368] sm:$0xff] }
 0x18a   : > { %1356 = vmatprep.subr.mxu0 %v6395_v15  ;;  %1225 = vmatpush1.msra.mxu1 %v5261_v6  ;;  %v1311_v15 = vld [vmem:[#allocation5 + $0x68] sm:$0xff]  ;;  %v5278_v6 = vld [vmem:[%s7782_s2 + $0x418] sm:$0xff] }
 0x18b   : > { %1357 = vmatpush1.msra.mxu0 %v6400_v16  ;;  %1226 = vmatprep.subr.mxu1 %v5260_v7  ;;  %v5328_v16 = vld [vmem:[%s7782_s2 + $0x568] sm:$0xff]  ;;  %v5302_v7 = vld [vmem:[%s7782_s2 + $0x498] sm:$0xff] }
 0x18c   : > { %5295 = vmatmul.mubr.msk.f32.vlgmr.msra.gmra.mxu0 %vm538_vm0, %v1310_v8  ;;  %1227 = vmatpush1.msra.mxu1 %v5259_v9  ;;  %v5277_v8 = vld [vmem:[%s7782_s2 + $0x410] sm:$0xff] }
 0x18d   : > { %1396 = vmatprep.mubr.f32.mxu0 %v6049_v0  ;;  %1228 = vmatprep.subr.mxu1 %v5258_v10  ;;  %v5301_v9 = vld [vmem:[%s7782_s2 + $0x490] sm:$0xff]  ;;  %v5276_v10 = vld [vmem:[%s7782_s2 + $0x408] sm:$0xff] }
 0x18e   : > { %1476 = vmatprep.subr.mxu0 %v5330_v11  ;;  %1229 = vmatpush1.msra.mxu1 %v5257_v12  ;;  %v5300_v11 = vld [vmem:[%s7782_s2 + $0x488] sm:$0xff]  ;;  %v5275_v12 = vld [vmem:[%s7782_s2 + $0x400] sm:$0xff] }
 0x18f   : > { %1477 = vmatpush1.msra.mxu0 %v5329_v13  ;;  %1230 = vmatprep.subr.mxu1 %v5256_v14  ;;  %v5299_v13 = vld [vmem:[%s7782_s2 + $0x480] sm:$0xff]  ;;  %v5346_v14 = vld [vmem:[%s7782_s2 + $0x5f8] sm:$0xff] }
 0x190   : > { %5296 = vmatmul.mubr.msk.f32.gmra.mxu0 %vm538_vm0, %v1311_v15  ;;  %1478 = vmatprep.subr.mxu0 %v5328_v16  ;;  %v5345_v15 = vld [vmem:[%s7782_s2 + $0x5f0] sm:$0xff]  ;;  %v5344_v16 = vld [vmem:[%s7782_s2 + $0x5e8] sm:$0xff] }
 0x191   : > { %1402 = vmatprep.mubr.f32.mxu0 %v6049_v0  ;;  %1231 = vmatpush1.msra.mxu1 %v5255_v55  ;;  %v5343_v55 = vld [vmem:[%s7782_s2 + $0x5e0] sm:$0xff] }
 0x192   : > { %1479 = vmatpush1.msra.mxu0 %v5327_v56  ;;  %1232 = vmatprep.subr.mxu1 %v5254_v57  ;;  %v5342_v56 = vld [vmem:[%s7782_s2 + $0x5d8] sm:$0xff]  ;;  %v5341_v57 = vld [vmem:[%s7782_s2 + $0x5d0] sm:$0xff] }
 0x193   : > { %1480 = vmatprep.subr.mxu0 %v5326_v58  ;;  %1233 = vmatpush1.msra.mxu1 %v5253_v59  ;;  %v5340_v58 = vld [vmem:[%s7782_s2 + $0x5c8] sm:$0xff]  ;;  %v5339_v59 = vld [vmem:[%s7782_s2 + $0x5c0] sm:$0xff] }
 0x194   : > { %5297 = vmatmul.mubr.msk.f32.gmra.mxu0 %vm538_vm0, %v1312_v60  ;;  %1234 = vmatprep.subr.mxu1 %v5252_v61  ;;  %v5338_v60 = vld [vmem:[%s7782_s2 + $0x5b8] sm:$0xff]  ;;  %v5337_v61 = vld [vmem:[%s7782_s2 + $0x5b0] sm:$0xff] }
 0x195   : > { %1408 = vmatprep.mubr.f32.mxu0 %v6049_v0  ;;  %1481 = vmatpush1.msra.mxu0 %v5325_v62  ;;  %v5336_v62 = vld [vmem:[%s7782_s2 + $0x5a8] sm:$0xff] }
 0x196   : > { %1482 = vmatprep.subr.mxu0 %v5324_v63  ;;  %1235 = vmatpush1.msra.mxu1 %v5251_v17  ;;  %v5335_v63 = vld [vmem:[%s7782_s2 + $0x5a0] sm:$0xff]  ;;  %v5334_v17 = vld [vmem:[%s7782_s2 + $0x598] sm:$0xff] }
 0x197   : > { %1483 = vmatpush1.msra.mxu0 %v5323_v18  ;;  %1236 = vmatprep.subr.mxu1 %v5250_v19  ;;  %v5333_v18 = vld [vmem:[%s7782_s2 + $0x590] sm:$0xff]  ;;  %v5332_v19 = vld [vmem:[%s7782_s2 + $0x588] sm:$0xff] }
 0x198   : > { %5298 = vmatmul.mubr.msk.f32.gmra.mxu0 %vm538_vm0, %v1313_v20  ;;  %1484 = vmatprep.subr.mxu0 %v5322_v21  ;;  %v5331_v20 = vld [vmem:[%s7782_s2 + $0x580] sm:$0xff] }
 0x199   : > { %1237 = vmatpush1.msra.mxu1 %v5249_v22  ;;  %1485 = vmatpush1.msra.mxu0 %v5321_v23 }
 0x19a   : > { %1238 = vmatprep.subr.mxu1 %v5248_v24  ;;  %1486 = vmatprep.subr.mxu0 %v5320_v25 }
 0x19b   : > { %1239 = vmatpush1.msra.mxu1 %v5247_v26  ;;  %1487 = vmatpush1.msra.mxu0 %v5319_v27 }
 0x19c   : > { %1240 = vmatprep.subr.mxu1 %v5246_v28  ;;  %1488 = vmatprep.subr.mxu0 %v5318_v29 }
 0x19d   : > { %1241 = vmatpush1.msra.mxu1 %v5245_v30  ;;  %1489 = vmatpush1.msra.mxu0 %v5317_v31 }
 0x19e   : > { %1242 = vmatprep.subr.mxu1 %v5244_v32  ;;  %1490 = vmatprep.subr.mxu0 %v5316_v33 }
 0x19f   : > { %1243 = vmatpush1.msra.mxu1 %v5243_v34  ;;  %1491 = vmatpush1.msra.mxu0 %v5315_v35 }
 0x1a0   : > { %1260 = vmatprep.subr.mxu1 %v5290_v36  ;;  %1492 = vmatprep.subr.mxu0 %v5314_v37 }
 0x1a1   : > { %1261 = vmatpush2.msra.mxu1 %v5289_v38  ;;  %1493 = vmatpush1.msra.mxu0 %v5313_v39 }
 0x1a2   : > { %1262 = vmatprep.subr.mxu1 %v5288_v40  ;;  %1494 = vmatprep.subr.mxu0 %v5312_v41 }
 0x1a3   : > { %1263 = vmatpush2.msra.mxu1 %v5287_v42  ;;  %1495 = vmatpush1.msra.mxu0 %v5311_v43 }
 0x1a4   : > { %1264 = vmatprep.subr.mxu1 %v5286_v44  ;;  %1496 = vmatprep.subr.mxu0 %v5310_v45 }
 0x1a5   : > { %1265 = vmatpush2.msra.mxu1 %v5285_v46  ;;  %1497 = vmatpush1.msra.mxu0 %v5309_v47 }
 0x1a6   : > { %1266 = vmatprep.subr.mxu1 %v5284_v48  ;;  %1498 = vmatprep.subr.mxu0 %v5308_v49 }
 0x1a7   : > { %1267 = vmatpush2.msra.mxu1 %v5283_v50  ;;  %1499 = vmatpush1.msra.mxu0 %v5307_v51  ;;  %v1698_v50 = vld [vmem:[#allocation7 + $0xf8] sm:$0xff]  ;;  %v1697_v51 = vld [vmem:[#allocation7 + $0xf0] sm:$0xff] }
 0x1a8   : > { %1268 = vmatprep.subr.mxu1 %v5282_v52  ;;  %1500 = vmatprep.subr.mxu0 %v5306_v53  ;;  %v1696_v52 = vld [vmem:[#allocation7 + $0xe8] sm:$0xff]  ;;  %v1695_v53 = vld [vmem:[#allocation7 + $0xe0] sm:$0xff] }
 0x1a9   : > { %1269 = vmatpush2.msra.mxu1 %v5281_v54  ;;  %1501 = vmatpush1.msra.mxu0 %v5305_v1  ;;  %v1694_v54 = vld [vmem:[#allocation7 + $0xd8] sm:$0xff] }
 0x1aa   : > { %1270 = vmatprep.subr.mxu1 %v5280_v2  ;;  %1502 = vmatprep.subr.mxu0 %v5304_v3  ;;  %v1693_v2 = vld [vmem:[#allocation7 + $0xd0] sm:$0xff]  ;;  %v1692_v3 = vld [vmem:[#allocation7 + $0xc8] sm:$0xff] }
 0x1ab   : > { %1271 = vmatpush2.msra.mxu1 %v5279_v4  ;;  %1503 = vmatpush1.msra.mxu0 %v5303_v5  ;;  %v1691_v4 = vld [vmem:[#allocation7 + $0xc0] sm:$0xff]  ;;  %v1690_v5 = vld [vmem:[#allocation7 + $0xb8] sm:$0xff] }
 0x1ac   : > { %1272 = vmatprep.subr.mxu1 %v5278_v6  ;;  %1504 = vmatprep.subr.mxu0 %v5302_v7  ;;  %v1689_v7 = vld [vmem:[#allocation7 + $0xb0] sm:$0xff] }
 0x1ad   : > { %1273 = vmatpush2.msra.mxu1 %v5277_v8  ;;  %1505 = vmatpush1.msra.mxu0 %v5301_v9  ;;  %v1688_v8 = vld [vmem:[#allocation7 + $0xa8] sm:$0xff]  ;;  %v1687_v9 = vld [vmem:[#allocation7 + $0xa0] sm:$0xff] }
 0x1ae   : > { %1274 = vmatprep.subr.mxu1 %v5276_v10  ;;  %1506 = vmatprep.subr.mxu0 %v5300_v11  ;;  %v1686_v10 = vld [vmem:[#allocation7 + $0x98] sm:$0xff] }
 0x1af   : > { %1275 = vmatpush2.msra.mxu1 %v5275_v12  ;;  %1507 = vmatpush1.msra.mxu0 %v5299_v13  ;;  %v1685_v12 = vld [vmem:[#allocation7 + $0x90] sm:$0xff]  ;;  %v1684_v13 = vld [vmem:[#allocation7 + $0x88] sm:$0xff] }
 0x1b0   : > { %1524 = vmatprep.subr.mxu0 %v5346_v14 }
 0x1b1   : > { %1525 = vmatpush2.msra.mxu0 %v5345_v15  ;;  %v1683_v15 = vld [vmem:[#allocation7 + $0x80] sm:$0xff] }
 0x1b2   : > { %1526 = vmatprep.subr.mxu0 %v5344_v16  ;;  %v1682_v16 = vld [vmem:[#allocation7 + $0x78] sm:$0xff] }
 0x1b3   : > { %1527 = vmatpush2.msra.mxu0 %v5343_v55 }
 0x1b4   : > { %1528 = vmatprep.subr.mxu0 %v5342_v56  ;;  %v1681_v56 = vld [vmem:[#allocation7 + $0x70] sm:$0xff] }
 0x1b5   : > { %1529 = vmatpush2.msra.mxu0 %v5341_v57  ;;  %v1680_v57 = vld [vmem:[#allocation7 + $0x68] sm:$0xff] }
 0x1b6   : > { %1530 = vmatprep.subr.mxu0 %v5340_v58  ;;  %v1679_v58 = vld [vmem:[#allocation7 + $0x60] sm:$0xff] }
 0x1b7   : > { %1531 = vmatpush2.msra.mxu0 %v5339_v59  ;;  %v1678_v59 = vld [vmem:[#allocation7 + $0x58] sm:$0xff] }
 0x1b8   : > { %1532 = vmatprep.subr.mxu0 %v5338_v60 }
 0x1b9   : > { %1533 = vmatpush2.msra.mxu0 %v5337_v61  ;;  %v1677_v61 = vld [vmem:[#allocation7 + $0x50] sm:$0xff] }
 0x1ba   : > { %1534 = vmatprep.subr.mxu0 %v5336_v62  ;;  %v1676_v62 = vld [vmem:[#allocation7 + $0x48] sm:$0xff] }
 0x1bb   : > { %1535 = vmatpush2.msra.mxu0 %v5335_v63  ;;  %v1675_v63 = vld [vmem:[#allocation7 + $0x40] sm:$0xff] }
 0x1bc   : > { %1536 = vmatprep.subr.mxu0 %v5334_v17  ;;  %v1674_v17 = vld [vmem:[#allocation7 + $0x38] sm:$0xff] }
 0x1bd   : > { %1537 = vmatpush2.msra.mxu0 %v5333_v18 }
 0x1be   : > { %1538 = vmatprep.subr.mxu0 %v5332_v19  ;;  %v1673_v19 = vld [vmem:[#allocation7 + $0x30] sm:$0xff] }
 0x1bf   : > { %1539 = vmatpush2.msra.mxu0 %v5331_v20  ;;  %v1672_v20 = vld [vmem:[#allocation7 + $0x28] sm:$0xff] }
 0x1c0   : > { %1959 = vmatprep.subr.mxu0 %v1698_v50 }
 0x22a   : > { %v7054_v21 = vpop.f32.mrf.mxu0  ;;  %v7079_v45 = vpop.f32.mrf.mxu1 }
 0x22c   : > { %v7056_v22 = vpop.f32.mrf.mxu0  ;;  %v7081_v46 = vpop.f32.mrf.mxu1 }
 0x22e   : > { %v7083_v47 = vpop.f32.mrf.mxu1 }
 0x22f   : > { %v7058_v23 = vpop.f32.mrf.mxu0 }
 0x230   : > { %v7085_v48 = vpop.f32.mrf.mxu1 }
 0x231   : > { %v7060_v24 = vpop.f32.mrf.mxu0 }
 0x233   : > { %v7062_v25 = vpop.f32.mrf.mxu0  ;;  %v7087_v49 = vpop.f32.mrf.mxu1 }
 0x235   : > { %v7064_v26 = vpop.f32.mrf.mxu0  ;;  %v7089_v1 = vpop.f32.mrf.mxu1 }
 0x237   : > { %v7091_v6 = vpop.f32.mrf.mxu1 }
 0x238   : > { %v7066_v27 = vpop.f32.mrf.mxu0 }
 0x239   : > { %v7093_v11 = vpop.f32.mrf.mxu1 }
 0x23a   : > { %v7068_v28 = vpop.f32.mrf.mxu0 }
 0x23c   : > { %v1128_v29 = vpop.f32.mrf.mxu0 }
 0x23e   : > { %v1130_v30 = vpop.f32.mrf.mxu0 }
 0x23f   : > { %5291 = vmatprep.mubr.msk.f32.mxu1 %vm538_vm0, %v1130_v30  ;;  %v1670_v30 = vld [vmem:[#allocation7 + $0x18] sm:$0xff] }
 0x240   : > { %v1134_v31 = vpop.f32.mrf.mxu0  ;;  %1277 = vmatmul.mubr.f32.vlgmr.msra.gmra.mxu1 %v1128_v29  ;;  %v1671_v29 = vld [vmem:[#allocation7 + $0x20] sm:$0xff] }
 0x242   : > { %v1136_v32 = vpop.f32.mrf.mxu0 }
 0x243   : > { %5292 = vmatprep.mubr.msk.f32.mxu1 %vm538_vm0, %v1136_v32  ;;  %v1669_v32 = vld [vmem:[#allocation7 + $0x10] sm:$0xff] }
 0x244   : > { %v1140_v33 = vpop.f32.mrf.mxu0  ;;  %1283 = vmatmul.mubr.f32.gmra.mxu1 %v1134_v31 }
 0x246   : > { %v1142_v34 = vpop.f32.mrf.mxu0 }
 0x247   : > { %5293 = vmatprep.mubr.msk.f32.mxu1 %vm538_vm0, %v1142_v34 }
 0x248   : > { %v1146_v35 = vpop.f32.mrf.mxu0  ;;  %1289 = vmatmul.mubr.f32.gmra.mxu1 %v1140_v33  ;;  %v1668_v33 = vld [vmem:[#allocation7 + $0x8] sm:$0xff] }
 0x24a   : > { %v1148_v36 = vpop.f32.mrf.mxu0 }
 0x24b   : > { %5294 = vmatprep.mubr.msk.f32.mxu1 %vm538_vm0, %v1148_v36  ;;  %v1730_v36 = vld [vmem:[#allocation7 + $0x1f8] sm:$0xff] }
 0x24c   : > { %1295 = vmatmul.mubr.f32.gmra.mxu1 %v1146_v35  ;;  %v1392_v37 = vpop.f32.mrf.mxu0  ;;  %v1667_v35 = vld [vmem:[#allocation7] sm:$0xff] }
 0x24d   : > { %1654 = vmatprep.mubr.f32.mxu1 %v6049_v0 }
 0x24e   : > { %v1394_v38 = vpop.f32.mrf.mxu0 }
 0x24f   : > { %5347 = vmatprep.mubr.msk.f32.mxu0 %vm538_vm0, %v1394_v38 }
 0x250   : > { %v1398_v39 = vpop.f32.mrf.mxu0  ;;  %1541 = vmatmul.mubr.f32.vlgmr.msra.gmra.mxu0 %v1392_v37 }
 0x251   : > { %1960 = vmatpush1.msra.mxu0 %v1697_v51  ;;  %v1725_v51 = vld [vmem:[#allocation7 + $0x1d0] sm:$0xff] }
 0x252   : > { %v1400_v40 = vpop.f32.mrf.mxu0  ;;  %1961 = vmatprep.subr.mxu0 %v1696_v52  ;;  %v1724_v52 = vld [vmem:[#allocation7 + $0x1c8] sm:$0xff] }
 0x253   : > { %5348 = vmatprep.mubr.msk.f32.mxu0 %vm538_vm0, %v1400_v40  ;;  %1962 = vmatpush1.msra.mxu0 %v1695_v53  ;;  %v1728_v40 = vld [vmem:[#allocation7 + $0x1e8] sm:$0xff] }
 0x254   : > { %v1404_v41 = vpop.f32.mrf.mxu0  ;;  %1547 = vmatmul.mubr.f32.gmra.mxu0 %v1398_v39  ;;  %1963 = vmatprep.subr.mxu0 %v1694_v54  ;;  %v1729_v39 = vld [vmem:[#allocation7 + $0x1f0] sm:$0xff]  ;;  %v1723_v54 = vld [vmem:[#allocation7 + $0x1c0] sm:$0xff] }
 0x255   : > { %1964 = vmatpush1.msra.mxu0 %v1693_v2  ;;  %v1722_v2 = vld [vmem:[#allocation7 + $0x1b8] sm:$0xff] }
 0x256   : > { %v1406_v42 = vpop.f32.mrf.mxu0  ;;  %1965 = vmatprep.subr.mxu0 %v1692_v3  ;;  %v1041_v3 = vadd.f32 %v7091_v6, %v7066_v27  ;;  %v1031_v27 = vadd.f32 %v7085_v48, %v7060_v24  ;;  %v1716_v24 = vld [vmem:[#allocation7 + $0x188] sm:$0xff]  ;;  %v1023_v48 = vadd.f32 %v7079_v45, %v7054_v21 }
 0x257   : > { %5349 = vmatprep.mubr.msk.f32.mxu0 %vm538_vm0, %v1406_v42  ;;  %1966 = vmatpush1.msra.mxu0 %v1691_v4  ;;  %v1727_v42 = vld [vmem:[#allocation7 + $0x1e0] sm:$0xff] }
 0x258   : > { %v1410_v43 = vpop.f32.mrf.mxu0  ;;  %1553 = vmatmul.mubr.f32.gmra.mxu0 %v1404_v41  ;;  %1967 = vmatprep.subr.mxu0 %v1690_v5 }
 0x259   : > { %1968 = vmatpush1.msra.mxu0 %v1689_v7  ;;  %v1721_v7 = vld [vmem:[#allocation7 + $0x1b0] sm:$0xff] }
 0x25a   : > { %v1412_v44 = vpop.f32.mrf.mxu0  ;;  %1969 = vmatprep.subr.mxu0 %v1688_v8  ;;  %v1037_v8 = vadd.f32 %v7089_v1, %v7064_v26  ;;  %v1029_v26 = vadd.f32 %v7083_v47, %v7058_v23  ;;  %v1715_v47 = vld [vmem:[#allocation7 + $0x180] sm:$0xff] }
 0x25b   : > { %5350 = vmatprep.mubr.msk.f32.mxu0 %vm538_vm0, %v1412_v44  ;;  %1970 = vmatpush1.msra.mxu0 %v1687_v9  ;;  %v1043_v9 = vadd.f32 %v7093_v11, %v7068_v28 }
 0x25c   : > { %1559 = vmatmul.mubr.f32.gmra.mxu0 %v1410_v43  ;;  %1971 = vmatprep.subr.mxu0 %v1686_v10  ;;  %v1726_v43 = vld [vmem:[#allocation7 + $0x1d8] sm:$0xff]  ;;  %v1720_v10 = vld [vmem:[#allocation7 + $0x1a8] sm:$0xff] }
 0x25d   : > { %1972 = vmatpush1.msra.mxu0 %v1685_v12  ;;  %v1035_v12 = vadd.f32 %v7087_v49, %v7062_v25  ;;  %v1025_v25 = vadd.f32 %v7081_v46, %v7056_v22  ;;  %v1714_v22 = vld [vmem:[#allocation7 + $0x178] sm:$0xff] }
 0x25e   : > { %1973 = vmatprep.subr.mxu0 %v1684_v13 }
 0x25f   : > { %1974 = vmatpush1.msra.mxu0 %v1683_v15 }
 0x260   : > { %1975 = vmatprep.subr.mxu0 %v1682_v16  ;;  %v1719_v16 = vld [vmem:[#allocation7 + $0x1a0] sm:$0xff] }
 0x261   : > { %1976 = vmatpush1.msra.mxu0 %v1681_v56 }
 0x262   : > { %1977 = vmatprep.subr.mxu0 %v1680_v57  ;;  %v1718_v57 = vld [vmem:[#allocation7 + $0x198] sm:$0xff] }
 0x263   : > { %1978 = vmatpush1.msra.mxu0 %v1679_v58  ;;  %v1717_v58 = vld [vmem:[#allocation7 + $0x190] sm:$0xff] }
 0x264   : > { %1979 = vmatprep.subr.mxu0 %v1678_v59 }
 0x265   : > { %1980 = vmatpush1.msra.mxu0 %v1677_v61 }
 0x266   : > { %1981 = vmatprep.subr.mxu0 %v1676_v62 }
 0x267   : > { %1982 = vmatpush1.msra.mxu0 %v1675_v63 }
 0x268   : > { %1983 = vmatprep.subr.mxu0 %v1674_v17 }
 0x269   : > { %1984 = vmatpush1.msra.mxu0 %v1673_v19 }
 0x26a   : > { %1985 = vmatprep.subr.mxu0 %v1672_v20 }
 0x26b   : > { %1986 = vmatpush1.msra.mxu0 %v1671_v29  ;;  %v1713_v29 = vld [vmem:[#allocation7 + $0x170] sm:$0xff] }
 0x26c   : > { %1987 = vmatprep.subr.mxu0 %v1670_v30 }
 0x26d   : > { %1988 = vmatpush1.msra.mxu0 %v1669_v32  ;;  %v1710_v32 = vld [vmem:[#allocation7 + $0x158] sm:$0xff] }
 0x26e   : > { %1989 = vmatprep.subr.mxu0 %v1668_v33 }
 0x26f   : > { %1990 = vmatpush1.msra.mxu0 %v1667_v35  ;;  %v1709_v35 = vld [vmem:[#allocation7 + $0x150] sm:$0xff] }
 0x270   : > { %1991 = vmatprep.subr.mxu0 %v1730_v36 }
 0x271   : > { %1992 = vmatpush2.msra.mxu0 %v1729_v39  ;;  %v1707_v39 = vld [vmem:[#allocation7 + $0x140] sm:$0xff] }
 0x272   : > { %1993 = vmatprep.subr.mxu0 %v1728_v40  ;;  %v1706_v40 = vld [vmem:[#allocation7 + $0x138] sm:$0xff] }
 0x273   : > { %1994 = vmatpush2.msra.mxu0 %v1727_v42  ;;  %v1705_v42 = vld [vmem:[#allocation7 + $0x130] sm:$0xff] }
 0x274   : > { %1995 = vmatprep.subr.mxu0 %v1726_v43  ;;  %v1704_v43 = vld [vmem:[#allocation7 + $0x128] sm:$0xff] }
 0x275   : > { %1996 = vmatpush2.msra.mxu0 %v1725_v51  ;;  %v1848_v51 = vld [vmem:[#allocation7 + $0x2f0] sm:$0xff] }
 0x276   : > { %1997 = vmatprep.subr.mxu0 %v1724_v52  ;;  %v1847_v52 = vld [vmem:[#allocation7 + $0x2e8] sm:$0xff] }
 0x277   : > { %1998 = vmatpush2.msra.mxu0 %v1723_v54  ;;  %v1846_v54 = vld [vmem:[#allocation7 + $0x2e0] sm:$0xff] }
 0x278   : > { %1999 = vmatprep.subr.mxu0 %v1722_v2  ;;  %v5354_v2 = vld [vmem:[%s7783_s3 + $0x18] sm:$0xff] }
 0x279   : > { %2000 = vmatpush2.msra.mxu0 %v1721_v7  ;;  %v1842_v7 = vld [vmem:[#allocation7 + $0x2c0] sm:$0xff] }
 0x27a   : > { %2001 = vmatprep.subr.mxu0 %v1720_v10  ;;  %v1839_v10 = vld [vmem:[#allocation7 + $0x2a8] sm:$0xff] }
 0x27b   : > { %2002 = vmatpush2.msra.mxu0 %v1719_v16  ;;  %v1835_v16 = vld [vmem:[#allocation7 + $0x288] sm:$0xff] }
 0x27c   : > { %2003 = vmatprep.subr.mxu0 %v1718_v57  ;;  %v1831_v57 = vld [vmem:[#allocation7 + $0x268] sm:$0xff] }
 0x27d   : > { %2004 = vmatpush2.msra.mxu0 %v1717_v58  ;;  %v1826_v58 = vld [vmem:[#allocation7 + $0x240] sm:$0xff] }
 0x27e   : > { %2005 = vmatprep.subr.mxu0 %v1716_v24  ;;  %v1821_v24 = vld [vmem:[#allocation7 + $0x218] sm:$0xff] }
 0x27f   : > { %2006 = vmatpush2.msra.mxu0 %v1715_v47  ;;  %v1881_v47 = vld [vmem:[#allocation7 + $0x3f8] sm:$0xff] }
 0x280   : > { %2007 = vmatprep.subr.mxu0 %v1714_v22  ;;  %v1878_v22 = vld [vmem:[#allocation7 + $0x3e0] sm:$0xff] }
 0x281   : > { %2008 = vmatpush2.msra.mxu0 %v1713_v29  ;;  %v1875_v29 = vld [vmem:[#allocation7 + $0x3c8] sm:$0xff] }
 0x300   : > { %v7095_v14 = vpop.f32.mrf.mxu1 }
 0x301   : > { %v1301_v46 = vadd.f32 %v7095_v14, %v1023_v48  ;;  %v1711_v14 = vld [vmem:[#allocation7 + $0x160] sm:$0xff]  ;;  %v1820_v48 = vld [vmem:[#allocation7 + $0x210] sm:$0xff] }
 0x302   : > { %v7097_v55 = vpop.f32.mrf.mxu1 }
 0x303   : > { %v1302_v63 = vadd.f32 %v7097_v55, %v1025_v25  ;;  %v1712_v55 = vld [vmem:[#allocation7 + $0x168] sm:$0xff]  ;;  %v1825_v25 = vld [vmem:[#allocation7 + $0x238] sm:$0xff] }
 0x304   : > { %v7099_v60 = vpop.f32.mrf.mxu1  ;;  %2009 = vmatprep.subr.mxu0 %v1712_v55  ;;  %v1873_v55 = vld [vmem:[#allocation7 + $0x3b8] sm:$0xff] }
 0x305   : > { %v1303_v62 = vadd.f32 %v7099_v60, %v1029_v26  ;;  %2010 = vmatpush2.msra.mxu0 %v1711_v14  ;;  %v1830_v26 = vld [vmem:[#allocation7 + $0x260] sm:$0xff]  ;;  %v1871_v14 = vld [vmem:[#allocation7 + $0x3a8] sm:$0xff] }
 0x306   : > { %v7101_v18 = vpop.f32.mrf.mxu1  ;;  %2011 = vmatprep.subr.mxu0 %v1710_v32  ;;  %v1870_v32 = vld [vmem:[#allocation7 + $0x3a0] sm:$0xff] }
 0x307   : > { %v1304_v49 = vadd.f32 %v7101_v18, %v1031_v27  ;;  %2012 = vmatpush2.msra.mxu0 %v1709_v35  ;;  %v1834_v27 = vld [vmem:[#allocation7 + $0x280] sm:$0xff]  ;;  %v1869_v35 = vld [vmem:[#allocation7 + $0x398] sm:$0xff] }
 0x308   : > { %v1290_v31 = vpop.f32.mrf.mxu1 }
 0x309   : > { %v1305_v28 = vadd.f32 %v1290_v31, %v1035_v12  ;;  %v1838_v12 = vld [vmem:[#allocation7 + $0x2a0] sm:$0xff] }
 0x30a   : > { %v1292_v37 = vpop.f32.mrf.mxu1 }
 0x30b   : > { %v1306_v6 = vadd.f32 %v1292_v37, %v1037_v8  ;;  %v1841_v8 = vld [vmem:[#allocation7 + $0x2b8] sm:$0xff] }
 0x30c   : > { %v1296_v44 = vpop.f32.mrf.mxu1 }
 0x30d   : > { %v1307_v13 = vadd.f32 %v1296_v44, %v1041_v3  ;;  %v5353_v44 = vld [vmem:[%s7783_s3 + $0x10] sm:$0xff]  ;;  %v1845_v3 = vld [vmem:[#allocation7 + $0x2d8] sm:$0xff] }
 0x30e   : > { %v1298_v4 = vpop.f32.mrf.mxu1 }
 0x30f   : > { %v1308_v56 = vadd.f32 %v1298_v4, %v1043_v9  ;;  %v1844_v4 = vld [vmem:[#allocation7 + $0x2d0] sm:$0xff] }
 0x310   : > { %v7103_v34 = vpop.f32.mrf.mxu0  ;;  %v1840_v9 = vld [vmem:[#allocation7 + $0x2b0] sm:$0xff] }
 0x311   : > { %v1565_v60 = vadd.f32 %v7103_v34, %v1301_v46  ;;  %v1708_v34 = vld [vmem:[#allocation7 + $0x148] sm:$0xff]  ;;  %v1877_v46 = vld [vmem:[#allocation7 + $0x3d8] sm:$0xff] }
 0x312   : > { %v7105_v38 = vpop.f32.mrf.mxu0  ;;  %2013 = vmatprep.subr.mxu0 %v1708_v34  ;;  %v1868_v34 = vld [vmem:[#allocation7 + $0x390] sm:$0xff] }
 0x313   : > { %v1566_v21 = vadd.f32 %v7105_v38, %v1302_v63  ;;  %v7148_v37 = vmax.f32 %v1565_v60, 0.0  ;;  %v1581_v38 = vld [vmem:[%s7783_s3] sm:$0xff]  ;;  %2014 = vmatpush2.msra.mxu0 %v1707_v39  ;;  %v1880_v63 = vld [vmem:[#allocation7 + $0x3f0] sm:$0xff] }
 0x314   : > { %v1548_v41 = vpop.f32.mrf.mxu0  ;;  %2015 = vmatprep.subr.mxu0 %v1706_v40  ;;  %v1872_v60 = vld [vmem:[#allocation7 + $0x3b0] sm:$0xff]  ;;  %v1866_v39 = vld [vmem:[#allocation7 + $0x380] sm:$0xff]  ;;  %v1865_v40 = vld [vmem:[#allocation7 + $0x378] sm:$0xff] }
 0x315   : > { %v1567_v18 = vadd.f32 %v1548_v41, %v1303_v62  ;;  %v7145_v36 = vmax.f32 %v1566_v21, 0.0  ;;  %v1582_v41 = vld [vmem:[%s7783_s3 + $0x8] sm:$0xff]  ;;  %2016 = vmatpush2.msra.mxu0 %v1705_v42  ;;  %v1874_v21 = vld [vmem:[#allocation7 + $0x3c0] sm:$0xff] }
 0x316   : > { %v1550_v50 = vpop.f32.mrf.mxu0  ;;  %2017 = vmatprep.subr.mxu0 %v1704_v43  ;;  %v1819_v62 = vld [vmem:[#allocation7 + $0x208] sm:$0xff]  ;;  %v1862_v43 = vld [vmem:[#allocation7 + $0x360] sm:$0xff] }
 0x317   : > { %v1568_v17 = vadd.f32 %v1550_v50, %v1304_v49  ;;  %v7142_v33 = vmax.f32 %v1567_v18, 0.0  ;;  %v1849_v50 = vld [vmem:[#allocation7 + $0x2f8] sm:$0xff]  ;;  %v1824_v49 = vld [vmem:[#allocation7 + $0x230] sm:$0xff]  ;;  %v1863_v42 = vld [vmem:[#allocation7 + $0x368] sm:$0xff] }
 0x318   : > { %v1554_v53 = vpop.f32.mrf.mxu0  ;;  %v1876_v18 = vld [vmem:[#allocation7 + $0x3d0] sm:$0xff] }
 0x319   : > { %v1569_v23 = vadd.f32 %v1554_v53, %v1305_v28  ;;  %v7139_v31 = vmax.f32 %v1568_v17, 0.0  ;;  %v1703_v53 = vld [vmem:[#allocation7 + $0x120] sm:$0xff]  ;;  %v1829_v28 = vld [vmem:[#allocation7 + $0x258] sm:$0xff]  ;;  %v1879_v17 = vld [vmem:[#allocation7 + $0x3e8] sm:$0xff] }
 0x31a   : > { %v1556_v5 = vpop.f32.mrf.mxu0  ;;  %2018 = vmatpush2.msra.mxu0 %v1703_v53  ;;  %v1857_v53 = vld [vmem:[#allocation7 + $0x338] sm:$0xff] }
 0x31b   : > { %v1570_v59 = vadd.f32 %v1556_v5, %v1306_v6  ;;  %v7136_v30 = vmax.f32 %v1569_v23, 0.0  ;;  %v1843_v5 = vld [vmem:[#allocation7 + $0x2c8] sm:$0xff]  ;;  %v1833_v6 = vld [vmem:[#allocation7 + $0x278] sm:$0xff]  ;;  %v1818_v23 = vld [vmem:[#allocation7 + $0x200] sm:$0xff] }
 0x31c   : > { %v1560_v15 = vpop.f32.mrf.mxu0 }
 0x31d   : > { %v1571_v1 = vadd.f32 %v1560_v15, %v1307_v13  ;;  %v7132_v45 = vmax.f32 %v1570_v59, 0.0  ;;  %v1837_v13 = vld [vmem:[#allocation7 + $0x298] sm:$0xff]  ;;  %v1836_v15 = vld [vmem:[#allocation7 + $0x290] sm:$0xff]  ;;  %v1823_v59 = vld [vmem:[#allocation7 + $0x228] sm:$0xff] }
 0x31e   : > { %v1562_v11 = vpop.f32.mrf.mxu0 }
 0x31f   : > { %v1572_v61 = vadd.f32 %v1562_v11, %v1308_v56  ;;  %v7129_v20 = vmax.f32 %v1571_v1, 0.0  ;;  %v1832_v56 = vld [vmem:[#allocation7 + $0x270] sm:$0xff]  ;;  %v1827_v11 = vld [vmem:[#allocation7 + $0x248] sm:$0xff] }
 0x320   : > { %v1828_v1 = vld [vmem:[#allocation7 + $0x250] sm:$0xff] }
 0x321   : > { %v7126_v19 = vmax.f32 %v1572_v61, 0.0  ;;  %v1822_v61 = vld [vmem:[#allocation7 + $0x220] sm:$0xff] }
 0x323   : > { %1614 = vmatprep.subr.mxu1 %v7126_v19 }
 0x324   : > { %1615 = vmatpush1.msra.mxu1 %v7129_v20 }
 0x325   : > { %1616 = vmatprep.subr.mxu1 %v7132_v45 }
 0x326   : > { %1617 = vmatpush1.msra.mxu1 %v7136_v30 }
 0x327   : > { %1618 = vmatprep.subr.mxu1 %v7139_v31 }
 0x328   : > { %1619 = vmatpush1.msra.mxu1 %v7142_v33 }
 0x329   : > { %1620 = vmatprep.subr.mxu1 %v7145_v36 }
 0x32a   : > { %1621 = vmatpush1.msra.mxu1 %v7148_v37 }
 0x32b   : > { %5351 = vmatmul.mubr.msk.f32.vlgmr.msra.gmra.mxu1 %vm1583_vm1, %v1581_v38  ;;  %1764 = vmatprep.subr.mxu1 %v7126_v19  ;;  %v1867_v38 = vld [vmem:[#allocation7 + $0x388] sm:$0xff] }
 0x32c   : > { %1765 = vmatpush1.msra.mxu1 %v7129_v20  ;;  %1660 = vmatprep.mubr.f32.mxu1 %v6049_v0 }
 0x32d   : > { %1766 = vmatprep.subr.mxu1 %v7132_v45 }
 0x32e   : > { %1767 = vmatpush1.msra.mxu1 %v7136_v30 }
 0x32f   : > { %5352 = vmatmul.mubr.msk.f32.gmra.mxu1 %vm1583_vm1, %v1582_v41  ;;  %1768 = vmatprep.subr.mxu1 %v7139_v31  ;;  %v1864_v41 = vld [vmem:[#allocation7 + $0x370] sm:$0xff] }
 0x330   : > { %1769 = vmatpush1.msra.mxu1 %v7142_v33  ;;  %1804 = vmatprep.mubr.f32.mxu1 %v6049_v0 }
 0x331   : > { %1770 = vmatprep.subr.mxu1 %v7145_v36 }
 0x332   : > { %1771 = vmatpush1.msra.mxu1 %v7148_v37 }
 0x333   : > { %5355 = vmatmul.mubr.msk.f32.vlgmr.msra.gmra.mxu1 %vm1583_vm1, %v5353_v44  ;;  %1882 = vmatprep.subr.mxu1 %v1849_v50  ;;  %v1861_v44 = vld [vmem:[#allocation7 + $0x358] sm:$0xff]  ;;  %v1860_v50 = vld [vmem:[#allocation7 + $0x350] sm:$0xff] }
 0x334   : > { %1883 = vmatpush1.msra.mxu1 %v1848_v51  ;;  %1810 = vmatprep.mubr.f32.mxu1 %v6049_v0  ;;  %v1859_v51 = vld [vmem:[#allocation7 + $0x348] sm:$0xff] }
 0x335   : > { %1884 = vmatprep.subr.mxu1 %v1847_v52  ;;  %v1858_v52 = vld [vmem:[#allocation7 + $0x340] sm:$0xff] }
 0x336   : > { %1885 = vmatpush1.msra.mxu1 %v1846_v54  ;;  %v1856_v54 = vld [vmem:[#allocation7 + $0x330] sm:$0xff] }
 0x337   : > { %5356 = vmatmul.mubr.msk.f32.gmra.mxu1 %vm1583_vm1, %v5354_v2  ;;  %1886 = vmatprep.subr.mxu1 %v1845_v3  ;;  %v1855_v2 = vld [vmem:[#allocation7 + $0x328] sm:$0xff]  ;;  %v1702_v3 = vld [vmem:[#allocation7 + $0x118] sm:$0xff] }
 0x338   : > { %1887 = vmatpush1.msra.mxu1 %v1844_v4  ;;  %v1854_v4 = vld [vmem:[#allocation7 + $0x320] sm:$0xff]  ;;  %2019 = vmatprep.subr.mxu0 %v1702_v3  ;;  %v2372_v3 = vld [vmem:[#allocation7 + $0x688] sm:$0xff] }
 0x339   : > { %1888 = vmatprep.subr.mxu1 %v1843_v5  ;;  %v1701_v5 = vld [vmem:[#allocation7 + $0x110] sm:$0xff] }
 0x33a   : > { %1889 = vmatpush1.msra.mxu1 %v1842_v7  ;;  %v1853_v7 = vld [vmem:[#allocation7 + $0x318] sm:$0xff]  ;;  %2020 = vmatpush2.msra.mxu0 %v1701_v5  ;;  %v2371_v5 = vld [vmem:[#allocation7 + $0x680] sm:$0xff] }
 0x33b   : > { %1890 = vmatprep.subr.mxu1 %v1841_v8  ;;  %v1700_v8 = vld [vmem:[#allocation7 + $0x108] sm:$0xff] }
 0x33c   : > { %1891 = vmatpush1.msra.mxu1 %v1840_v9  ;;  %v1852_v9 = vld [vmem:[#allocation7 + $0x310] sm:$0xff]  ;;  %2021 = vmatprep.subr.mxu0 %v1700_v8  ;;  %v2370_v8 = vld [vmem:[#allocation7 + $0x678] sm:$0xff] }
 0x33d   : > { %1892 = vmatprep.subr.mxu1 %v1839_v10  ;;  %v1699_v10 = vld [vmem:[#allocation7 + $0x100] sm:$0xff] }
 0x33e   : > { %1893 = vmatpush1.msra.mxu1 %v1838_v12  ;;  %v1851_v12 = vld [vmem:[#allocation7 + $0x308] sm:$0xff]  ;;  %2022 = vmatpush2.msra.mxu0 %v1699_v10  ;;  %v2369_v10 = vld [vmem:[#allocation7 + $0x670] sm:$0xff] }
 0x33f   : > { %1894 = vmatprep.subr.mxu1 %v1837_v13  ;;  %v1850_v13 = vld [vmem:[#allocation7 + $0x300] sm:$0xff] }
 0x340   : > { %1895 = vmatpush1.msra.mxu1 %v1836_v15  ;;  %v2154_v15 = vld [vmem:[#allocation7 + $0x4f8] sm:$0xff] }
 0x341   : > { %1896 = vmatprep.subr.mxu1 %v1835_v16  ;;  %2187 = vmatprep.subr.mxu0 %v2154_v15  ;;  %v2186_v15 = vld [vmem:[#allocation7 + $0x5f8] sm:$0xff] }
 0x342   : > { %1897 = vmatpush1.msra.mxu1 %v1834_v27 }
 0x343   : > { %1898 = vmatprep.subr.mxu1 %v1833_v6  ;;  %v2153_v6 = vld [vmem:[#allocation7 + $0x4f0] sm:$0xff] }
 0x344   : > { %1899 = vmatpush1.msra.mxu1 %v1832_v56  ;;  %v2152_v56 = vld [vmem:[#allocation7 + $0x4e8] sm:$0xff] }
 0x345   : > { %1900 = vmatprep.subr.mxu1 %v1831_v57 }
 0x346   : > { %1901 = vmatpush1.msra.mxu1 %v1830_v26  ;;  %v2151_v26 = vld [vmem:[#allocation7 + $0x4e0] sm:$0xff] }
 0x347   : > { %1902 = vmatprep.subr.mxu1 %v1829_v28  ;;  %v2150_v28 = vld [vmem:[#allocation7 + $0x4d8] sm:$0xff] }
 0x348   : > { %1903 = vmatpush1.msra.mxu1 %v1828_v1 }
 0x349   : > { %1904 = vmatprep.subr.mxu1 %v1827_v11  ;;  %v2149_v11 = vld [vmem:[#allocation7 + $0x4d0] sm:$0xff] }
 0x34a   : > { %1905 = vmatpush1.msra.mxu1 %v1826_v58  ;;  %v2148_v58 = vld [vmem:[#allocation7 + $0x4c8] sm:$0xff] }
 0x34b   : > { %1906 = vmatprep.subr.mxu1 %v1825_v25 }
 0x34c   : > { %1907 = vmatpush1.msra.mxu1 %v1824_v49  ;;  %v2147_v49 = vld [vmem:[#allocation7 + $0x4c0] sm:$0xff] }
 0x34d   : > { %1908 = vmatprep.subr.mxu1 %v1823_v59  ;;  %v2146_v59 = vld [vmem:[#allocation7 + $0x4b8] sm:$0xff] }
 0x34e   : > { %1909 = vmatpush1.msra.mxu1 %v1822_v61 }
 0x34f   : > { %1910 = vmatprep.subr.mxu1 %v1821_v24  ;;  %v2145_v24 = vld [vmem:[#allocation7 + $0x4b0] sm:$0xff] }
 0x350   : > { %1911 = vmatpush1.msra.mxu1 %v1820_v48  ;;  %v2144_v48 = vld [vmem:[#allocation7 + $0x4a8] sm:$0xff] }
 0x351   : > { %1912 = vmatprep.subr.mxu1 %v1819_v62 }
 0x352   : > { %1913 = vmatpush1.msra.mxu1 %v1818_v23 }
 0x353   : > { %1914 = vmatprep.subr.mxu1 %v1881_v47  ;;  %v2143_v47 = vld [vmem:[#allocation7 + $0x4a0] sm:$0xff] }
 0x354   : > { %1915 = vmatpush2.msra.mxu1 %v1880_v63  ;;  %v2142_v63 = vld [vmem:[#allocation7 + $0x498] sm:$0xff] }
 0x355   : > { %1916 = vmatprep.subr.mxu1 %v1879_v17  ;;  %v5357_v17 = vld [vmem:[%s7783_s3 + $0x20] sm:$0xff] }
 0x356   : > { %1917 = vmatpush2.msra.mxu1 %v1878_v22  ;;  %v2141_v22 = vld [vmem:[#allocation7 + $0x490] sm:$0xff] }
 0x357   : > { %1918 = vmatprep.subr.mxu1 %v1877_v46  ;;  %v2140_v46 = vld [vmem:[#allocation7 + $0x488] sm:$0xff] }
 0x358   : > { %1919 = vmatpush2.msra.mxu1 %v1876_v18  ;;  %v5358_v18 = vld [vmem:[%s7783_s3 + $0x28] sm:$0xff] }
 0x359   : > { %1920 = vmatprep.subr.mxu1 %v1875_v29  ;;  %v2139_v29 = vld [vmem:[#allocation7 + $0x480] sm:$0xff] }
 0x35a   : > { %1921 = vmatpush2.msra.mxu1 %v1874_v21  ;;  %v2386_v21 = vld [vmem:[#allocation7 + $0x6f8] sm:$0xff] }
 0x35b   : > { %1922 = vmatprep.subr.mxu1 %v1873_v55  ;;  %v2136_v55 = vld [vmem:[#allocation7 + $0x468] sm:$0xff] }
 0x35c   : > { %1923 = vmatpush2.msra.mxu1 %v1872_v60  ;;  %v5362_v60 = vld [vmem:[%s7783_s3 + $0x38] sm:$0xff] }
 0x35d   : > { %1924 = vmatprep.subr.mxu1 %v1871_v14  ;;  %v2381_v14 = vld [vmem:[#allocation7 + $0x6d0] sm:$0xff] }
 0x35e   : > { %1925 = vmatpush2.msra.mxu1 %v1870_v32  ;;  %v2380_v32 = vld [vmem:[#allocation7 + $0x6c8] sm:$0xff] }
 0x35f   : > { %1926 = vmatprep.subr.mxu1 %v1869_v35  ;;  %v2134_v35 = vld [vmem:[#allocation7 + $0x458] sm:$0xff] }
 0x360   : > { %1927 = vmatpush2.msra.mxu1 %v1868_v34  ;;  %v2379_v34 = vld [vmem:[#allocation7 + $0x6c0] sm:$0xff] }
 0x361   : > { %1928 = vmatprep.subr.mxu1 %v1867_v38  ;;  %v2133_v38 = vld [vmem:[#allocation7 + $0x450] sm:$0xff] }
 0x362   : > { %1929 = vmatpush2.msra.mxu1 %v1866_v39  ;;  %v2378_v39 = vld [vmem:[#allocation7 + $0x6b8] sm:$0xff] }
 0x363   : > { %1930 = vmatprep.subr.mxu1 %v1865_v40  ;;  %v2132_v40 = vld [vmem:[#allocation7 + $0x448] sm:$0xff] }
 0x364   : > { %1931 = vmatpush2.msra.mxu1 %v1864_v41  ;;  %v2377_v41 = vld [vmem:[#allocation7 + $0x6b0] sm:$0xff] }
 0x365   : > { %1932 = vmatprep.subr.mxu1 %v1863_v42  ;;  %v2131_v42 = vld [vmem:[#allocation7 + $0x440] sm:$0xff] }
 0x366   : > { %1933 = vmatpush2.msra.mxu1 %v1862_v43  ;;  %v2376_v43 = vld [vmem:[#allocation7 + $0x6a8] sm:$0xff] }
 0x367   : > { %1934 = vmatprep.subr.mxu1 %v1861_v44  ;;  %v2130_v44 = vld [vmem:[#allocation7 + $0x438] sm:$0xff] }
 0x368   : > { %1935 = vmatpush2.msra.mxu1 %v1860_v50  ;;  %v2375_v50 = vld [vmem:[#allocation7 + $0x6a0] sm:$0xff] }
 0x369   : > { %1936 = vmatprep.subr.mxu1 %v1859_v51  ;;  %v2129_v51 = vld [vmem:[#allocation7 + $0x430] sm:$0xff] }
 0x36a   : > { %1937 = vmatpush2.msra.mxu1 %v1858_v52  ;;  %v2374_v52 = vld [vmem:[#allocation7 + $0x698] sm:$0xff] }
 0x36b   : > { %1938 = vmatprep.subr.mxu1 %v1857_v53  ;;  %v2128_v53 = vld [vmem:[#allocation7 + $0x428] sm:$0xff] }
 0x36c   : > { %1939 = vmatpush2.msra.mxu1 %v1856_v54  ;;  %v2373_v54 = vld [vmem:[#allocation7 + $0x690] sm:$0xff] }
 0x36d   : > { %1940 = vmatprep.subr.mxu1 %v1855_v2  ;;  %v2127_v2 = vld [vmem:[#allocation7 + $0x420] sm:$0xff] }
 0x36e   : > { %1941 = vmatpush2.msra.mxu1 %v1854_v4  ;;  %v2126_v4 = vld [vmem:[#allocation7 + $0x418] sm:$0xff] }
 0x36f   : > { %1942 = vmatprep.subr.mxu1 %v1853_v7  ;;  %v2125_v7 = vld [vmem:[#allocation7 + $0x410] sm:$0xff] }
 0x370   : > { %1943 = vmatpush2.msra.mxu1 %v1852_v9  ;;  %v2124_v9 = vld [vmem:[#allocation7 + $0x408] sm:$0xff] }
 0x371   : > { %1944 = vmatprep.subr.mxu1 %v1851_v12  ;;  %v2123_v12 = vld [vmem:[#allocation7 + $0x400] sm:$0xff] }
 0x372   : > { %1945 = vmatpush2.msra.mxu1 %v1850_v13  ;;  %v2368_v13 = vld [vmem:[#allocation7 + $0x668] sm:$0xff] }
 0x373   : > { %2069 = vmatprep.subr.mxu1 %v7126_v19 }
 0x3eb   : > { %v1656_v16 = vpop.f32.mrf.mxu1 }
 0x3ed   : > { %v1658_v27 = vpop.f32.mrf.mxu1 }
 0x3ee   : > { %2023 = vmatprep.mubr.f32.mxu0 %v1658_v27  ;;  %v2185_v27 = vld [vmem:[#allocation7 + $0x5f0] sm:$0xff] }
 0x3ef   : > { %v1662_v57 = vpop.f32.mrf.mxu1  ;;  %2024 = vmatmul.mubr.f32.vlgmr.msra.gmra.mxu0 %v1656_v16  ;;  %v2367_v16 = vld [vmem:[#allocation7 + $0x660] sm:$0xff] }
 0x3f0   : > { %2188 = vmatpush1.msra.mxu0 %v2153_v6  ;;  %v2366_v6 = vld [vmem:[#allocation7 + $0x658] sm:$0xff] }
 0x3f1   : > { %v1664_v1 = vpop.f32.mrf.mxu1  ;;  %2189 = vmatprep.subr.mxu0 %v2152_v56  ;;  %v2184_v56 = vld [vmem:[#allocation7 + $0x5e8] sm:$0xff] }
 0x3f2   : > { %2029 = vmatprep.mubr.f32.mxu0 %v1664_v1  ;;  %2190 = vmatpush1.msra.mxu0 %v2151_v26  ;;  %v2183_v26 = vld [vmem:[#allocation7 + $0x5e0] sm:$0xff]  ;;  %v2182_v1 = vld [vmem:[#allocation7 + $0x5d8] sm:$0xff] }
 0x3f3   : > { %v1806_v25 = vpop.f32.mrf.mxu1  ;;  %2030 = vmatmul.mubr.f32.gmra.mxu0 %v1662_v57  ;;  %2191 = vmatprep.subr.mxu0 %v2150_v28  ;;  %v2365_v57 = vld [vmem:[#allocation7 + $0x650] sm:$0xff]  ;;  %v2364_v28 = vld [vmem:[#allocation7 + $0x648] sm:$0xff] }
 0x3f4   : > { %2192 = vmatpush1.msra.mxu0 %v2149_v11  ;;  %v2363_v11 = vld [vmem:[#allocation7 + $0x640] sm:$0xff] }
 0x3f5   : > { %v1808_v61 = vpop.f32.mrf.mxu1  ;;  %2193 = vmatprep.subr.mxu0 %v2148_v58  ;;  %v2181_v58 = vld [vmem:[#allocation7 + $0x5d0] sm:$0xff] }
 0x3f6   : > { %1946 = vmatprep.mubr.f32.mxu1 %v1808_v61  ;;  %2194 = vmatpush1.msra.mxu0 %v2147_v49  ;;  %v2180_v49 = vld [vmem:[#allocation7 + $0x5c8] sm:$0xff]  ;;  %v2179_v61 = vld [vmem:[#allocation7 + $0x5c0] sm:$0xff] }
 0x3f7   : > { %v1812_v62 = vpop.f32.mrf.mxu1  ;;  %1947 = vmatmul.mubr.f32.vlgmr.msra.gmra.mxu1 %v1806_v25  ;;  %2195 = vmatprep.subr.mxu0 %v2146_v59  ;;  %v2362_v25 = vld [vmem:[#allocation7 + $0x638] sm:$0xff]  ;;  %v2361_v59 = vld [vmem:[#allocation7 + $0x630] sm:$0xff] }
 0x3f8   : > { %2070 = vmatpush1.msra.mxu1 %v7129_v20  ;;  %2196 = vmatpush1.msra.mxu0 %v2145_v24  ;;  %v2360_v24 = vld [vmem:[#allocation7 + $0x628] sm:$0xff] }
 0x3f9   : > { %2071 = vmatprep.subr.mxu1 %v7132_v45  ;;  %v1814_v23 = vpop.f32.mrf.mxu1  ;;  %2197 = vmatprep.subr.mxu0 %v2144_v48  ;;  %v2178_v48 = vld [vmem:[#allocation7 + $0x5b8] sm:$0xff] }
 0x3fa   : > { %2072 = vmatpush1.msra.mxu1 %v7136_v30  ;;  %1952 = vmatprep.mubr.f32.mxu1 %v1814_v23  ;;  %v2177_v23 = vld [vmem:[#allocation7 + $0x5b0] sm:$0xff] }
 0x3fb   : > { %2073 = vmatprep.subr.mxu1 %v7139_v31  ;;  %1953 = vmatmul.mubr.f32.gmra.mxu1 %v1812_v62  ;;  %v2359_v62 = vld [vmem:[#allocation7 + $0x620] sm:$0xff] }
 0x3fc   : > { %2074 = vmatpush1.msra.mxu1 %v7142_v33  ;;  %2109 = vmatprep.mubr.f32.mxu1 %v6049_v0 }
 0x3fd   : > { %2075 = vmatprep.subr.mxu1 %v7145_v36  ;;  %2198 = vmatpush1.msra.mxu0 %v2143_v47  ;;  %v2358_v47 = vld [vmem:[#allocation7 + $0x618] sm:$0xff] }
 0x3fe   : > { %2076 = vmatpush1.msra.mxu1 %v7148_v37  ;;  %2199 = vmatprep.subr.mxu0 %v2142_v63  ;;  %v2176_v63 = vld [vmem:[#allocation7 + $0x5a8] sm:$0xff] }
 0x3ff   : > { %2301 = vmatprep.subr.mxu1 %v7126_v19  ;;  %5359 = vmatmul.mubr.msk.f32.vlgmr.msra.gmra.mxu1 %vm1583_vm1, %v5357_v17  ;;  %v2138_v19 = vld [vmem:[#allocation7 + $0x478] sm:$0xff]  ;;  %v2357_v17 = vld [vmem:[#allocation7 + $0x610] sm:$0xff] }
 0x400   : > { %2302 = vmatpush1.msra.mxu1 %v7129_v20  ;;  %2115 = vmatprep.mubr.f32.mxu1 %v6049_v0  ;;  %v5361_v20 = vld [vmem:[%s7783_s3 + $0x30] sm:$0xff] }
 0x401   : > { %2303 = vmatprep.subr.mxu1 %v7132_v45  ;;  %2200 = vmatpush1.msra.mxu0 %v2141_v22  ;;  %v2385_v45 = vld [vmem:[#allocation7 + $0x6f0] sm:$0xff]  ;;  %v2175_v22 = vld [vmem:[#allocation7 + $0x5a0] sm:$0xff] }
 0x402   : > { %2304 = vmatpush1.msra.mxu1 %v7136_v30  ;;  %2201 = vmatprep.subr.mxu0 %v2140_v46  ;;  %v2384_v30 = vld [vmem:[#allocation7 + $0x6e8] sm:$0xff] }
 0x403   : > { %2305 = vmatprep.subr.mxu1 %v7139_v31  ;;  %5360 = vmatmul.mubr.msk.f32.gmra.mxu1 %vm1583_vm1, %v5358_v18  ;;  %v2137_v31 = vld [vmem:[#allocation7 + $0x470] sm:$0xff]  ;;  %v2356_v46 = vld [vmem:[#allocation7 + $0x608] sm:$0xff]  ;;  %v2355_v18 = vld [vmem:[#allocation7 + $0x600] sm:$0xff] }
 0x404   : > { %2306 = vmatpush1.msra.mxu1 %v7142_v33  ;;  %2341 = vmatprep.mubr.f32.mxu1 %v6049_v0  ;;  %v2383_v33 = vld [vmem:[#allocation7 + $0x6e0] sm:$0xff] }
 0x405   : > { %2307 = vmatprep.subr.mxu1 %v7145_v36  ;;  %2202 = vmatpush1.msra.mxu0 %v2139_v29  ;;  %v2382_v36 = vld [vmem:[#allocation7 + $0x6d8] sm:$0xff] }
 0x406   : > { %2308 = vmatpush1.msra.mxu1 %v7148_v37  ;;  %2203 = vmatprep.subr.mxu0 %v2138_v19  ;;  %v2135_v37 = vld [vmem:[#allocation7 + $0x460] sm:$0xff]  ;;  %v2418_v29 = vld [vmem:[#allocation7 + $0x7f8] sm:$0xff]  ;;  %v2417_v19 = vld [vmem:[#allocation7 + $0x7f0] sm:$0xff] }
 0x407   : > { %5363 = vmatmul.mubr.msk.f32.vlgmr.msra.gmra.mxu1 %vm1583_vm1, %v5361_v20  ;;  %2419 = vmatprep.subr.mxu1 %v2386_v21  ;;  %v2416_v20 = vld [vmem:[#allocation7 + $0x7e8] sm:$0xff]  ;;  %v2415_v21 = vld [vmem:[#allocation7 + $0x7e0] sm:$0xff] }
 0x408   : > { %2347 = vmatprep.mubr.f32.mxu1 %v6049_v0  ;;  %2420 = vmatpush1.msra.mxu1 %v2385_v45  ;;  %v2174_v45 = vld [vmem:[#allocation7 + $0x598] sm:$0xff] }
 0x409   : > { %2421 = vmatprep.subr.mxu1 %v2384_v30  ;;  %2204 = vmatpush1.msra.mxu0 %v2137_v31  ;;  %v2414_v30 = vld [vmem:[#allocation7 + $0x7d8] sm:$0xff]  ;;  %v2173_v31 = vld [vmem:[#allocation7 + $0x590] sm:$0xff] }
 0x40a   : > { %2422 = vmatpush1.msra.mxu1 %v2383_v33  ;;  %2205 = vmatprep.subr.mxu0 %v2136_v55  ;;  %v2413_v33 = vld [vmem:[#allocation7 + $0x7d0] sm:$0xff]  ;;  %v2172_v55 = vld [vmem:[#allocation7 + $0x588] sm:$0xff] }
 0x40b   : > { %5364 = vmatmul.mubr.msk.f32.gmra.mxu1 %vm1583_vm1, %v5362_v60  ;;  %2423 = vmatprep.subr.mxu1 %v2382_v36  ;;  %v2412_v60 = vld [vmem:[#allocation7 + $0x7c8] sm:$0xff]  ;;  %v2171_v36 = vld [vmem:[#allocation7 + $0x580] sm:$0xff] }
 0x40c   : > { %2424 = vmatpush1.msra.mxu1 %v2381_v14  ;;  %2206 = vmatpush1.msra.mxu0 %v2135_v37  ;;  %v2411_v14 = vld [vmem:[#allocation7 + $0x7c0] sm:$0xff]  ;;  %v2170_v37 = vld [vmem:[#allocation7 + $0x578] sm:$0xff] }
 0x40d   : > { %2425 = vmatprep.subr.mxu1 %v2380_v32  ;;  %2207 = vmatprep.subr.mxu0 %v2134_v35  ;;  %v2410_v32 = vld [vmem:[#allocation7 + $0x7b8] sm:$0xff]  ;;  %v2169_v35 = vld [vmem:[#allocation7 + $0x570] sm:$0xff] }
 0x40e   : > { %2426 = vmatpush1.msra.mxu1 %v2379_v34  ;;  %2208 = vmatpush1.msra.mxu0 %v2133_v38  ;;  %v2409_v34 = vld [vmem:[#allocation7 + $0x7b0] sm:$0xff]  ;;  %v2168_v38 = vld [vmem:[#allocation7 + $0x568] sm:$0xff] }
 0x40f   : > { %2427 = vmatprep.subr.mxu1 %v2378_v39  ;;  %2209 = vmatprep.subr.mxu0 %v2132_v40  ;;  %v2408_v39 = vld [vmem:[#allocation7 + $0x7a8] sm:$0xff]  ;;  %v2167_v40 = vld [vmem:[#allocation7 + $0x560] sm:$0xff] }
 0x410   : > { %2428 = vmatpush1.msra.mxu1 %v2377_v41  ;;  %2210 = vmatpush1.msra.mxu0 %v2131_v42  ;;  %v2407_v41 = vld [vmem:[#allocation7 + $0x7a0] sm:$0xff]  ;;  %v2166_v42 = vld [vmem:[#allocation7 + $0x558] sm:$0xff] }
 0x411   : > { %2429 = vmatprep.subr.mxu1 %v2376_v43  ;;  %2211 = vmatprep.subr.mxu0 %v2130_v44  ;;  %v2406_v43 = vld [vmem:[#allocation7 + $0x798] sm:$0xff]  ;;  %v2165_v44 = vld [vmem:[#allocation7 + $0x550] sm:$0xff] }
 0x412   : > { %2430 = vmatpush1.msra.mxu1 %v2375_v50  ;;  %2212 = vmatpush1.msra.mxu0 %v2129_v51  ;;  %v2405_v50 = vld [vmem:[#allocation7 + $0x790] sm:$0xff]  ;;  %v2164_v51 = vld [vmem:[#allocation7 + $0x548] sm:$0xff] }
 0x413   : > { %2431 = vmatprep.subr.mxu1 %v2374_v52  ;;  %2213 = vmatprep.subr.mxu0 %v2128_v53  ;;  %v2404_v52 = vld [vmem:[#allocation7 + $0x788] sm:$0xff]  ;;  %v2163_v53 = vld [vmem:[#allocation7 + $0x540] sm:$0xff] }
 0x414   : > { %2432 = vmatpush1.msra.mxu1 %v2373_v54  ;;  %2214 = vmatpush1.msra.mxu0 %v2127_v2  ;;  %v2403_v54 = vld [vmem:[#allocation7 + $0x780] sm:$0xff]  ;;  %v2162_v2 = vld [vmem:[#allocation7 + $0x538] sm:$0xff] }
 0x415   : > { %2433 = vmatprep.subr.mxu1 %v2372_v3  ;;  %2215 = vmatprep.subr.mxu0 %v2126_v4  ;;  %v2402_v3 = vld [vmem:[#allocation7 + $0x778] sm:$0xff]  ;;  %v2161_v4 = vld [vmem:[#allocation7 + $0x530] sm:$0xff] }
 0x416   : > { %2434 = vmatpush1.msra.mxu1 %v2371_v5  ;;  %2216 = vmatpush1.msra.mxu0 %v2125_v7  ;;  %v2401_v5 = vld [vmem:[#allocation7 + $0x770] sm:$0xff]  ;;  %v2160_v7 = vld [vmem:[#allocation7 + $0x528] sm:$0xff] }
 0x417   : > { %2435 = vmatprep.subr.mxu1 %v2370_v8  ;;  %2217 = vmatprep.subr.mxu0 %v2124_v9  ;;  %v2400_v8 = vld [vmem:[#allocation7 + $0x768] sm:$0xff]  ;;  %v2159_v9 = vld [vmem:[#allocation7 + $0x520] sm:$0xff] }
 0x418   : > { %2436 = vmatpush1.msra.mxu1 %v2369_v10  ;;  %2218 = vmatpush1.msra.mxu0 %v2123_v12  ;;  %v2399_v10 = vld [vmem:[#allocation7 + $0x760] sm:$0xff]  ;;  %v2158_v12 = vld [vmem:[#allocation7 + $0x518] sm:$0xff] }
 0x419   : > { %2437 = vmatprep.subr.mxu1 %v2368_v13  ;;  %2219 = vmatprep.subr.mxu0 %v2186_v15  ;;  %v2398_v13 = vld [vmem:[#allocation7 + $0x758] sm:$0xff]  ;;  %v2157_v15 = vld [vmem:[#allocation7 + $0x510] sm:$0xff] }
 0x41a   : > { %2438 = vmatpush1.msra.mxu1 %v2367_v16  ;;  %2220 = vmatpush2.msra.mxu0 %v2185_v27  ;;  %v2397_v16 = vld [vmem:[#allocation7 + $0x750] sm:$0xff]  ;;  %v2156_v27 = vld [vmem:[#allocation7 + $0x508] sm:$0xff] }
 0x41b   : > { %2439 = vmatprep.subr.mxu1 %v2366_v6  ;;  %2221 = vmatprep.subr.mxu0 %v2184_v56  ;;  %v2396_v6 = vld [vmem:[#allocation7 + $0x748] sm:$0xff]  ;;  %v2155_v56 = vld [vmem:[#allocation7 + $0x500] sm:$0xff] }
 0x41c   : > { %2440 = vmatpush1.msra.mxu1 %v2365_v57  ;;  %2222 = vmatpush2.msra.mxu0 %v2183_v26  ;;  %v2395_v57 = vld [vmem:[#allocation7 + $0x740] sm:$0xff]  ;;  %v2394_v26 = vld [vmem:[#allocation7 + $0x738] sm:$0xff] }
 0x41d   : > { %2441 = vmatprep.subr.mxu1 %v2364_v28  ;;  %2223 = vmatprep.subr.mxu0 %v2182_v1  ;;  %v2393_v28 = vld [vmem:[#allocation7 + $0x730] sm:$0xff]  ;;  %v2392_v1 = vld [vmem:[#allocation7 + $0x728] sm:$0xff] }
 0x41e   : > { %2442 = vmatpush1.msra.mxu1 %v2363_v11  ;;  %2224 = vmatpush2.msra.mxu0 %v2181_v58  ;;  %v2391_v11 = vld [vmem:[#allocation7 + $0x720] sm:$0xff]  ;;  %v2390_v58 = vld [vmem:[#allocation7 + $0x718] sm:$0xff] }
 0x41f   : > { %2443 = vmatprep.subr.mxu1 %v2362_v25  ;;  %2225 = vmatprep.subr.mxu0 %v2180_v49  ;;  %v2389_v25 = vld [vmem:[#allocation7 + $0x710] sm:$0xff]  ;;  %v2388_v49 = vld [vmem:[#allocation7 + $0x708] sm:$0xff] }
 0x420   : > { %2444 = vmatpush1.msra.mxu1 %v2361_v59  ;;  %2226 = vmatpush2.msra.mxu0 %v2179_v61  ;;  %v2387_v59 = vld [vmem:[#allocation7 + $0x700] sm:$0xff] }
 0x421   : > { %2445 = vmatprep.subr.mxu1 %v2360_v24  ;;  %2227 = vmatprep.subr.mxu0 %v2178_v48 }
 0x422   : > { %2446 = vmatpush1.msra.mxu1 %v2359_v62  ;;  %2228 = vmatpush2.msra.mxu0 %v2177_v23 }
 0x423   : > { %2447 = vmatprep.subr.mxu1 %v2358_v47  ;;  %2229 = vmatprep.subr.mxu0 %v2176_v63 }
 0x424   : > { %2448 = vmatpush1.msra.mxu1 %v2357_v17  ;;  %2230 = vmatpush2.msra.mxu0 %v2175_v22 }
 0x425   : > { %2449 = vmatprep.subr.mxu1 %v2356_v46  ;;  %2231 = vmatprep.subr.mxu0 %v2174_v45 }
 0x426   : > { %2450 = vmatpush1.msra.mxu1 %v2355_v18  ;;  %2232 = vmatpush2.msra.mxu0 %v2173_v31 }
 0x427   : > { %2451 = vmatprep.subr.mxu1 %v2418_v29  ;;  %2233 = vmatprep.subr.mxu0 %v2172_v55 }
 0x428   : > { %2452 = vmatpush2.msra.mxu1 %v2417_v19  ;;  %2234 = vmatpush2.msra.mxu0 %v2171_v36 }
 0x429   : > { %2453 = vmatprep.subr.mxu1 %v2416_v20  ;;  %2235 = vmatprep.subr.mxu0 %v2170_v37 }
 0x42a   : > { %2454 = vmatpush2.msra.mxu1 %v2415_v21  ;;  %2236 = vmatpush2.msra.mxu0 %v2169_v35 }
 0x42b   : > { %2455 = vmatprep.subr.mxu1 %v2414_v30  ;;  %2237 = vmatprep.subr.mxu0 %v2168_v38 }
 0x42c   : > { %2456 = vmatpush2.msra.mxu1 %v2413_v33  ;;  %2238 = vmatpush2.msra.mxu0 %v2167_v40 }
 0x42d   : > { %2457 = vmatprep.subr.mxu1 %v2412_v60  ;;  %2239 = vmatprep.subr.mxu0 %v2166_v42 }
 0x42e   : > { %2458 = vmatpush2.msra.mxu1 %v2411_v14  ;;  %2240 = vmatpush2.msra.mxu0 %v2165_v44 }
 0x42f   : > { %2459 = vmatprep.subr.mxu1 %v2410_v32  ;;  %2241 = vmatprep.subr.mxu0 %v2164_v51 }
 0x430   : > { %2460 = vmatpush2.msra.mxu1 %v2409_v34  ;;  %2242 = vmatpush2.msra.mxu0 %v2163_v53 }
 0x431   : > { %2461 = vmatprep.subr.mxu1 %v2408_v39  ;;  %2243 = vmatprep.subr.mxu0 %v2162_v2 }
 0x432   : > { %2462 = vmatpush2.msra.mxu1 %v2407_v41  ;;  %2244 = vmatpush2.msra.mxu0 %v2161_v4  ;;  %v2752_v4 = vld [vmem:[#allocation10 + $0x2f8] sm:$0xff] }
 0x433   : > { %2463 = vmatprep.subr.mxu1 %v2406_v43  ;;  %2245 = vmatprep.subr.mxu0 %v2160_v7  ;;  %v2611_v7 = vld [vmem:[#allocation10 + $0xf8] sm:$0xff] }
 0x434   : > { %2464 = vmatpush2.msra.mxu1 %v2405_v50  ;;  %2246 = vmatpush2.msra.mxu0 %v2159_v9  ;;  %v2610_v9 = vld [vmem:[#allocation10 + $0xf0] sm:$0xff] }
 0x435   : > { %2465 = vmatprep.subr.mxu1 %v2404_v52  ;;  %2247 = vmatprep.subr.mxu0 %v2158_v12  ;;  %v2609_v12 = vld [vmem:[#allocation10 + $0xe8] sm:$0xff] }
 0x436   : > { %2466 = vmatpush2.msra.mxu1 %v2403_v54  ;;  %2248 = vmatpush2.msra.mxu0 %v2157_v15  ;;  %v2608_v15 = vld [vmem:[#allocation10 + $0xe0] sm:$0xff] }
 0x437   : > { %2467 = vmatprep.subr.mxu1 %v2402_v3  ;;  %2249 = vmatprep.subr.mxu0 %v2156_v27  ;;  %v2645_v3 = vld [vmem:[#allocation8 + $0x8] sm:$0xff]  ;;  %v2607_v27 = vld [vmem:[#allocation10 + $0xd8] sm:$0xff] }
 0x438   : > { %2468 = vmatpush2.msra.mxu1 %v2401_v5  ;;  %2250 = vmatpush2.msra.mxu0 %v2155_v56  ;;  %v2504_v5 = vld [vmem:[#allocation8] sm:$0xff]  ;;  %v2606_v56 = vld [vmem:[#allocation10 + $0xd0] sm:$0xff] }
 0x439   : > { %2469 = vmatprep.subr.mxu1 %v2400_v8  ;;  %v2751_v8 = vld [vmem:[#allocation10 + $0x2f0] sm:$0xff] }
 0x43a   : > { %2470 = vmatpush2.msra.mxu1 %v2399_v10  ;;  %v2750_v10 = vld [vmem:[#allocation10 + $0x2e8] sm:$0xff] }
 0x43b   : > { %2471 = vmatprep.subr.mxu1 %v2398_v13  ;;  %v2749_v13 = vld [vmem:[#allocation10 + $0x2e0] sm:$0xff] }
 0x43c   : > { %2472 = vmatpush2.msra.mxu1 %v2397_v16  ;;  %v2748_v16 = vld [vmem:[#allocation10 + $0x2d8] sm:$0xff] }
 0x43d   : > { %2473 = vmatprep.subr.mxu1 %v2396_v6  ;;  %v2747_v6 = vld [vmem:[#allocation10 + $0x2d0] sm:$0xff] }
 0x43e   : > { %2474 = vmatpush2.msra.mxu1 %v2395_v57  ;;  %v2746_v57 = vld [vmem:[#allocation10 + $0x2c8] sm:$0xff] }
 0x43f   : > { %2475 = vmatprep.subr.mxu1 %v2394_v26  ;;  %v2605_v26 = vld [vmem:[#allocation10 + $0xc8] sm:$0xff] }
 0x440   : > { %2476 = vmatpush2.msra.mxu1 %v2393_v28  ;;  %v2745_v28 = vld [vmem:[#allocation10 + $0x2c0] sm:$0xff] }
 0x441   : > { %2477 = vmatprep.subr.mxu1 %v2392_v1  ;;  %v2604_v1 = vld [vmem:[#allocation10 + $0xc0] sm:$0xff] }
 0x442   : > { %2478 = vmatpush2.msra.mxu1 %v2391_v11  ;;  %v2744_v11 = vld [vmem:[#allocation10 + $0x2b8] sm:$0xff] }
 0x443   : > { %2479 = vmatprep.subr.mxu1 %v2390_v58  ;;  %v2603_v58 = vld [vmem:[#allocation10 + $0xb8] sm:$0xff] }
 0x444   : > { %2480 = vmatpush2.msra.mxu1 %v2389_v25  ;;  %v2743_v25 = vld [vmem:[#allocation10 + $0x2b0] sm:$0xff] }
 0x445   : > { %2481 = vmatprep.subr.mxu1 %v2388_v49  ;;  %v2602_v49 = vld [vmem:[#allocation10 + $0xb0] sm:$0xff] }
 0x446   : > { %2482 = vmatpush2.msra.mxu1 %v2387_v59  ;;  %v2742_v59 = vld [vmem:[#allocation10 + $0x2a8] sm:$0xff] }
 0x4af   : > { %v2025_v19 = vpop.f32.mrf.mxu0 }
 0x4b1   : > { %v2027_v20 = vpop.f32.mrf.mxu0 }
 0x4b3   : > { %v2031_v21 = vpop.f32.mrf.mxu0 }
 0x4b5   : > { %v2033_v45 = vpop.f32.mrf.mxu0 }
 0x4b7   : > { %v1948_v61 = vpop.f32.mrf.mxu1 }
 0x4b8   : > { %v2026_v35 = vadd.f32 %v2025_v19, %v1948_v61  ;;  %v2601_v61 = vld [vmem:[#allocation10 + $0xa8] sm:$0xff]  ;;  %v2595_v19 = vld [vmem:[#allocation10 + $0x78] sm:$0xff] }
 0x4b9   : > { %v1950_v24 = vpop.f32.mrf.mxu1 }
 0x4ba   : > { %v2028_v37 = vadd.f32 %v2027_v20, %v1950_v24  ;;  %v2741_v24 = vld [vmem:[#allocation10 + $0x2a0] sm:$0xff]  ;;  %v2735_v20 = vld [vmem:[#allocation10 + $0x270] sm:$0xff] }
 0x4bb   : > { %v1954_v48 = vpop.f32.mrf.mxu1 }
 0x4bc   : > { %v2032_v60 = vadd.f32 %v2031_v21, %v1954_v48  ;;  %v2600_v48 = vld [vmem:[#allocation10 + $0xa0] sm:$0xff]  ;;  %v2594_v21 = vld [vmem:[#allocation10 + $0x70] sm:$0xff] }
 0x4bd   : > { %v1956_v62 = vpop.f32.mrf.mxu1 }
 0x4be   : > { %v2034_v32 = vadd.f32 %v2033_v45, %v1956_v62  ;;  %v2740_v62 = vld [vmem:[#allocation10 + $0x298] sm:$0xff]  ;;  %v2734_v45 = vld [vmem:[#allocation10 + $0x268] sm:$0xff] }
 0x4bf   : > { %v2111_v23 = vpop.f32.mrf.mxu1 }
 0x4c1   : > { %v2113_v47 = vpop.f32.mrf.mxu1 }
 0x4c2   : > { %2251 = vmatprep.mubr.f32.mxu0 %v2113_v47  ;;  %v2739_v47 = vld [vmem:[#allocation10 + $0x290] sm:$0xff] }
 0x4c3   : > { %v2117_v63 = vpop.f32.mrf.mxu1  ;;  %2252 = vmatmul.mubr.f32.vlgmr.msra.gmra.mxu0 %v2111_v23  ;;  %v2599_v23 = vld [vmem:[#allocation10 + $0x98] sm:$0xff] }
 0x4c5   : > { %v2119_v17 = vpop.f32.mrf.mxu1 }
 0x4c6   : > { %2257 = vmatprep.mubr.f32.mxu0 %v2119_v17  ;;  %v2738_v17 = vld [vmem:[#allocation10 + $0x288] sm:$0xff] }
 0x4c7   : > { %2258 = vmatmul.mubr.f32.gmra.mxu0 %v2117_v63  ;;  %v2343_v22 = vpop.f32.mrf.mxu1  ;;  %v2598_v63 = vld [vmem:[#allocation10 + $0x90] sm:$0xff] }
 0x4c8   : > { %2713 = vmatprep.mubr.f32.mxu0 %v6049_v0 }
 0x4c9   : > { %v2345_v46 = vpop.f32.mrf.mxu1 }
 0x4ca   : > { %2483 = vmatprep.mubr.f32.mxu1 %v2345_v46  ;;  %v2737_v46 = vld [vmem:[#allocation10 + $0x280] sm:$0xff] }
 0x4cb   : > { %v2349_v18 = vpop.f32.mrf.mxu1  ;;  %2484 = vmatmul.mubr.f32.vlgmr.msra.gmra.mxu1 %v2343_v22  ;;  %v2597_v22 = vld [vmem:[#allocation10 + $0x88] sm:$0xff] }
 0x4cd   : > { %v2351_v29 = vpop.f32.mrf.mxu1 }
 0x4ce   : > { %2489 = vmatprep.mubr.f32.mxu1 %v2351_v29  ;;  %v2736_v29 = vld [vmem:[#allocation10 + $0x278] sm:$0xff] }
 0x4cf   : > { %2490 = vmatmul.mubr.f32.gmra.mxu1 %v2349_v18  ;;  %v2596_v18 = vld [vmem:[#allocation10 + $0x80] sm:$0xff] }
 0x4d0   : > { %2573 = vmatprep.mubr.f32.mxu1 %v6049_v0 }
 0x583   : > { %v2253_v30 = vpop.f32.mrf.mxu0 }
 0x584   : > { %v2264_v41 = vadd.f32 %v2253_v30, %v2026_v35  ;;  %v2593_v30 = vld [vmem:[#allocation10 + $0x68] sm:$0xff]  ;;  %v2729_v35 = vld [vmem:[#allocation10 + $0x240] sm:$0xff] }
 0x585   : > { %v2255_v31 = vpop.f32.mrf.mxu0 }
 0x586   : > { %v2265_v39 = vadd.f32 %v2255_v31, %v2028_v37  ;;  %v2733_v31 = vld [vmem:[#allocation10 + $0x260] sm:$0xff]  ;;  %v2730_v37 = vld [vmem:[#allocation10 + $0x248] sm:$0xff] }
 0x587   : > { %v2259_v33 = vpop.f32.mrf.mxu0 }
 0x588   : > { %v2266_v34 = vadd.f32 %v2259_v33, %v2032_v60  ;;  %v2592_v33 = vld [vmem:[#allocation10 + $0x60] sm:$0xff]  ;;  %v2591_v60 = vld [vmem:[#allocation10 + $0x58] sm:$0xff] }
 0x589   : > { %v2261_v36 = vpop.f32.mrf.mxu0 }
 0x58a   : > { %v2267_v40 = vadd.f32 %v2261_v36, %v2034_v32  ;;  %v2731_v36 = vld [vmem:[#allocation10 + $0x250] sm:$0xff]  ;;  %v2589_v32 = vld [vmem:[#allocation10 + $0x48] sm:$0xff] }
 0x58b   : > { %v2485_v55 = vpop.f32.mrf.mxu1 }
 0x58c   : > { %v2496_v51 = vadd.f32 %v2485_v55, %v2264_v41  ;;  %v2732_v55 = vld [vmem:[#allocation10 + $0x258] sm:$0xff]  ;;  %v2586_v41 = vld [vmem:[#allocation10 + $0x30] sm:$0xff] }
 0x58d   : > { %v2487_v14 = vpop.f32.mrf.mxu1 }
 0x58e   : > { %v2497_v44 = vadd.f32 %v2487_v14, %v2265_v39  ;;  %v7226_v2 = vmax.f32 %v2496_v51, 0.0  ;;  %v2590_v14 = vld [vmem:[#allocation10 + $0x50] sm:$0xff]  ;;  %v2587_v39 = vld [vmem:[#allocation10 + $0x38] sm:$0xff] }
 0x58f   : > { %v2491_v38 = vpop.f32.mrf.mxu1  ;;  %v2724_v51 = vld [vmem:[#allocation10 + $0x218] sm:$0xff] }
 0x590   : > { %v2498_v42 = vadd.f32 %v2491_v38, %v2266_v34  ;;  %v7222_v54 = vmax.f32 %v2497_v44, 0.0  ;;  %v2588_v34 = vld [vmem:[#allocation10 + $0x40] sm:$0xff]  ;;  %v2728_v38 = vld [vmem:[#allocation10 + $0x238] sm:$0xff] }
 0x591   : > { %v2493_v43 = vpop.f32.mrf.mxu1  ;;  %v2725_v44 = vld [vmem:[#allocation10 + $0x220] sm:$0xff] }
 0x592   : > { %v2499_v50 = vadd.f32 %v2493_v43, %v2267_v40  ;;  %v7220_v53 = vmax.f32 %v2498_v42, 0.0  ;;  %v2727_v40 = vld [vmem:[#allocation10 + $0x230] sm:$0xff]  ;;  %v2726_v42 = vld [vmem:[#allocation10 + $0x228] sm:$0xff] }
 0x593   : > { %v2585_v43 = vld [vmem:[#allocation10 + $0x28] sm:$0xff] }
 0x594   : > { %v7218_v52 = vmax.f32 %v2499_v50, 0.0  ;;  %v2584_v50 = vld [vmem:[#allocation10 + $0x20] sm:$0xff] }
 0x596   : > { %2537 = vmatprep.subr.mxu1 %v7218_v52  ;;  %2677 = vmatprep.subr.mxu0 %v7218_v52 }
 0x597   : > { %2538 = vmatpush1.msra.mxu1 %v7220_v53  ;;  %2678 = vmatpush1.msra.mxu0 %v7220_v53 }
 0x598   : > { %2539 = vmatprep.subr.mxu1 %v7222_v54  ;;  %2679 = vmatprep.subr.mxu0 %v7222_v54 }
 0x599   : > { %2540 = vmatpush1.msra.mxu1 %v7226_v2  ;;  %2680 = vmatpush1.msra.mxu0 %v7226_v2 }
 0x59a   : > { %5366 = vmatmul.mubr.msk.f32.vlgmr.msra.gmra.mxu0 %vm2505_vm2, %v2645_v3  ;;  %2785 = vmatprep.subr.mxu1 %v2752_v4  ;;  %v2583_v3 = vld [vmem:[#allocation10 + $0x18] sm:$0xff]  ;;  %v2723_v4 = vld [vmem:[#allocation10 + $0x210] sm:$0xff] }
 0x59b   : > { %5365 = vmatmul.mubr.msk.f32.vlgmr.msra.gmra.mxu1 %vm2505_vm2, %v2504_v5  ;;  %2856 = vmatprep.subr.mxu0 %v2611_v7  ;;  %v2582_v5 = vld [vmem:[#allocation10 + $0x10] sm:$0xff]  ;;  %v2722_v7 = vld [vmem:[#allocation10 + $0x208] sm:$0xff] }
 0x59c   : > { %2786 = vmatpush1.msra.mxu1 %v2751_v8  ;;  %2857 = vmatpush1.msra.mxu0 %v2610_v9  ;;  %v2581_v8 = vld [vmem:[#allocation10 + $0x8] sm:$0xff]  ;;  %v2721_v9 = vld [vmem:[#allocation10 + $0x200] sm:$0xff] }
 0x59d   : > { %2787 = vmatprep.subr.mxu1 %v2750_v10  ;;  %2858 = vmatprep.subr.mxu0 %v2609_v12  ;;  %v2580_v10 = vld [vmem:[#allocation10] sm:$0xff]  ;;  %v2784_v12 = vld [vmem:[#allocation10 + $0x3f8] sm:$0xff] }
 0x59e   : > { %2788 = vmatpush1.msra.mxu1 %v2749_v13  ;;  %2859 = vmatpush1.msra.mxu0 %v2608_v15  ;;  %v2643_v13 = vld [vmem:[#allocation10 + $0x1f8] sm:$0xff]  ;;  %v2783_v15 = vld [vmem:[#allocation10 + $0x3f0] sm:$0xff] }
 0x59f   : > { %2789 = vmatprep.subr.mxu1 %v2748_v16  ;;  %2860 = vmatprep.subr.mxu0 %v2607_v27  ;;  %v2642_v16 = vld [vmem:[#allocation10 + $0x1f0] sm:$0xff]  ;;  %v2782_v27 = vld [vmem:[#allocation10 + $0x3e8] sm:$0xff] }
 0x5a0   : > { %2790 = vmatpush1.msra.mxu1 %v2747_v6  ;;  %2861 = vmatpush1.msra.mxu0 %v2606_v56  ;;  %v2641_v6 = vld [vmem:[#allocation10 + $0x1e8] sm:$0xff]  ;;  %v2781_v56 = vld [vmem:[#allocation10 + $0x3e0] sm:$0xff] }
 0x5a1   : > { %2791 = vmatprep.subr.mxu1 %v2746_v57  ;;  %2862 = vmatprep.subr.mxu0 %v2605_v26  ;;  %v2640_v57 = vld [vmem:[#allocation10 + $0x1e0] sm:$0xff]  ;;  %v2780_v26 = vld [vmem:[#allocation10 + $0x3d8] sm:$0xff] }
 0x5a2   : > { %2792 = vmatpush1.msra.mxu1 %v2745_v28  ;;  %2863 = vmatpush1.msra.mxu0 %v2604_v1  ;;  %v2639_v28 = vld [vmem:[#allocation10 + $0x1d8] sm:$0xff]  ;;  %v2779_v1 = vld [vmem:[#allocation10 + $0x3d0] sm:$0xff] }
 0x5a3   : > { %2793 = vmatprep.subr.mxu1 %v2744_v11  ;;  %2864 = vmatprep.subr.mxu0 %v2603_v58  ;;  %v2638_v11 = vld [vmem:[#allocation10 + $0x1d0] sm:$0xff]  ;;  %v2778_v58 = vld [vmem:[#allocation10 + $0x3c8] sm:$0xff] }
 0x5a4   : > { %2794 = vmatpush1.msra.mxu1 %v2743_v25  ;;  %2865 = vmatpush1.msra.mxu0 %v2602_v49  ;;  %v2637_v25 = vld [vmem:[#allocation10 + $0x1c8] sm:$0xff]  ;;  %v2777_v49 = vld [vmem:[#allocation10 + $0x3c0] sm:$0xff] }
 0x5a5   : > { %2795 = vmatprep.subr.mxu1 %v2742_v59  ;;  %2866 = vmatprep.subr.mxu0 %v2601_v61  ;;  %v2636_v59 = vld [vmem:[#allocation10 + $0x1c0] sm:$0xff]  ;;  %v2776_v61 = vld [vmem:[#allocation10 + $0x3b8] sm:$0xff] }
 0x5a6   : > { %2796 = vmatpush1.msra.mxu1 %v2741_v24  ;;  %2867 = vmatpush1.msra.mxu0 %v2600_v48  ;;  %v2635_v24 = vld [vmem:[#allocation10 + $0x1b8] sm:$0xff]  ;;  %v2775_v48 = vld [vmem:[#allocation10 + $0x3b0] sm:$0xff] }
 0x5a7   : > { %2797 = vmatprep.subr.mxu1 %v2740_v62  ;;  %2868 = vmatprep.subr.mxu0 %v2599_v23  ;;  %v2634_v62 = vld [vmem:[#allocation10 + $0x1b0] sm:$0xff]  ;;  %v2774_v23 = vld [vmem:[#allocation10 + $0x3a8] sm:$0xff] }
 0x5a8   : > { %2798 = vmatpush1.msra.mxu1 %v2739_v47  ;;  %2869 = vmatpush1.msra.mxu0 %v2598_v63  ;;  %v2633_v47 = vld [vmem:[#allocation10 + $0x1a8] sm:$0xff]  ;;  %v2773_v63 = vld [vmem:[#allocation10 + $0x3a0] sm:$0xff] }
 0x5a9   : > { %2799 = vmatprep.subr.mxu1 %v2738_v17  ;;  %2870 = vmatprep.subr.mxu0 %v2597_v22  ;;  %v2632_v17 = vld [vmem:[#allocation10 + $0x1a0] sm:$0xff]  ;;  %v2772_v22 = vld [vmem:[#allocation10 + $0x398] sm:$0xff] }
 0x5aa   : > { %2800 = vmatpush1.msra.mxu1 %v2737_v46  ;;  %2871 = vmatpush1.msra.mxu0 %v2596_v18  ;;  %v2631_v46 = vld [vmem:[#allocation10 + $0x198] sm:$0xff]  ;;  %v2771_v18 = vld [vmem:[#allocation10 + $0x390] sm:$0xff] }
 0x5ab   : > { %2801 = vmatprep.subr.mxu1 %v2736_v29  ;;  %2872 = vmatprep.subr.mxu0 %v2595_v19  ;;  %v2630_v29 = vld [vmem:[#allocation10 + $0x190] sm:$0xff]  ;;  %v2770_v19 = vld [vmem:[#allocation10 + $0x388] sm:$0xff] }
 0x5ac   : > { %2802 = vmatpush1.msra.mxu1 %v2735_v20  ;;  %2873 = vmatpush1.msra.mxu0 %v2594_v21  ;;  %v2629_v20 = vld [vmem:[#allocation10 + $0x188] sm:$0xff]  ;;  %v2769_v21 = vld [vmem:[#allocation10 + $0x380] sm:$0xff] }
 0x5ad   : > { %2803 = vmatprep.subr.mxu1 %v2734_v45  ;;  %2874 = vmatprep.subr.mxu0 %v2593_v30  ;;  %v2628_v45 = vld [vmem:[#allocation10 + $0x180] sm:$0xff]  ;;  %v2768_v30 = vld [vmem:[#allocation10 + $0x378] sm:$0xff] }
 0x5ae   : > { %2804 = vmatpush1.msra.mxu1 %v2733_v31  ;;  %2875 = vmatpush1.msra.mxu0 %v2592_v33  ;;  %v2627_v31 = vld [vmem:[#allocation10 + $0x178] sm:$0xff]  ;;  %v2767_v33 = vld [vmem:[#allocation10 + $0x370] sm:$0xff] }
 0x5af   : > { %2805 = vmatprep.subr.mxu1 %v2732_v55  ;;  %2876 = vmatprep.subr.mxu0 %v2591_v60  ;;  %v2626_v55 = vld [vmem:[#allocation10 + $0x170] sm:$0xff]  ;;  %v2766_v60 = vld [vmem:[#allocation10 + $0x368] sm:$0xff] }
 0x5b0   : > { %2806 = vmatpush1.msra.mxu1 %v2731_v36  ;;  %2877 = vmatpush1.msra.mxu0 %v2590_v14  ;;  %v2625_v36 = vld [vmem:[#allocation10 + $0x168] sm:$0xff]  ;;  %v2765_v14 = vld [vmem:[#allocation10 + $0x360] sm:$0xff] }
 0x5b1   : > { %2807 = vmatprep.subr.mxu1 %v2730_v37  ;;  %2878 = vmatprep.subr.mxu0 %v2589_v32  ;;  %v2624_v37 = vld [vmem:[#allocation10 + $0x160] sm:$0xff]  ;;  %v2764_v32 = vld [vmem:[#allocation10 + $0x358] sm:$0xff] }
 0x5b2   : > { %2808 = vmatpush1.msra.mxu1 %v2729_v35  ;;  %2879 = vmatpush1.msra.mxu0 %v2588_v34  ;;  %v2623_v35 = vld [vmem:[#allocation10 + $0x158] sm:$0xff]  ;;  %v2763_v34 = vld [vmem:[#allocation10 + $0x350] sm:$0xff] }
 0x5b3   : > { %2809 = vmatprep.subr.mxu1 %v2728_v38  ;;  %2880 = vmatprep.subr.mxu0 %v2587_v39  ;;  %v2622_v38 = vld [vmem:[#allocation10 + $0x150] sm:$0xff]  ;;  %v2762_v39 = vld [vmem:[#allocation10 + $0x348] sm:$0xff] }
 0x5b4   : > { %2810 = vmatpush1.msra.mxu1 %v2727_v40  ;;  %2881 = vmatpush1.msra.mxu0 %v2586_v41  ;;  %v2621_v40 = vld [vmem:[#allocation10 + $0x148] sm:$0xff]  ;;  %v2761_v41 = vld [vmem:[#allocation10 + $0x340] sm:$0xff] }
 0x5b5   : > { %2811 = vmatprep.subr.mxu1 %v2726_v42  ;;  %2882 = vmatprep.subr.mxu0 %v2585_v43  ;;  %v2620_v42 = vld [vmem:[#allocation10 + $0x140] sm:$0xff]  ;;  %v2760_v43 = vld [vmem:[#allocation10 + $0x338] sm:$0xff] }
 0x5b6   : > { %2812 = vmatpush1.msra.mxu1 %v2725_v44  ;;  %2883 = vmatpush1.msra.mxu0 %v2584_v50  ;;  %v2619_v44 = vld [vmem:[#allocation10 + $0x138] sm:$0xff]  ;;  %v2759_v50 = vld [vmem:[#allocation10 + $0x330] sm:$0xff] }
 0x5b7   : > { %2813 = vmatprep.subr.mxu1 %v2724_v51  ;;  %2884 = vmatprep.subr.mxu0 %v2583_v3  ;;  %v2618_v51 = vld [vmem:[#allocation10 + $0x130] sm:$0xff]  ;;  %v2758_v3 = vld [vmem:[#allocation10 + $0x328] sm:$0xff] }
 0x5b8   : > { %2814 = vmatpush1.msra.mxu1 %v2723_v4  ;;  %2885 = vmatpush1.msra.mxu0 %v2582_v5  ;;  %v2617_v4 = vld [vmem:[#allocation10 + $0x128] sm:$0xff]  ;;  %v2757_v5 = vld [vmem:[#allocation10 + $0x320] sm:$0xff] }
 0x5b9   : > { %2815 = vmatprep.subr.mxu1 %v2722_v7  ;;  %2886 = vmatprep.subr.mxu0 %v2581_v8  ;;  %v2756_v7 = vld [vmem:[#allocation10 + $0x318] sm:$0xff]  ;;  %v2755_v8 = vld [vmem:[#allocation10 + $0x310] sm:$0xff] }
 0x5ba   : > { %2816 = vmatpush1.msra.mxu1 %v2721_v9  ;;  %2887 = vmatpush1.msra.mxu0 %v2580_v10  ;;  %v2754_v9 = vld [vmem:[#allocation10 + $0x308] sm:$0xff]  ;;  %v2753_v10 = vld [vmem:[#allocation10 + $0x300] sm:$0xff] }
 0x5bb   : > { %2817 = vmatprep.subr.mxu1 %v2784_v12  ;;  %2888 = vmatprep.subr.mxu0 %v2643_v13  ;;  %v2616_v12 = vld [vmem:[#allocation10 + $0x120] sm:$0xff]  ;;  %v2615_v13 = vld [vmem:[#allocation10 + $0x118] sm:$0xff] }
 0x5bc   : > { %2818 = vmatpush2.msra.mxu1 %v2783_v15  ;;  %2889 = vmatpush2.msra.mxu0 %v2642_v16  ;;  %v2614_v15 = vld [vmem:[#allocation10 + $0x110] sm:$0xff]  ;;  %v2613_v16 = vld [vmem:[#allocation10 + $0x108] sm:$0xff] }
 0x5bd   : > { %2819 = vmatprep.subr.mxu1 %v2782_v27  ;;  %2890 = vmatprep.subr.mxu0 %v2641_v6  ;;  %v2612_v27 = vld [vmem:[#allocation10 + $0x100] sm:$0xff]  ;;  %v3035_v6 = vld [vmem:[#allocation10 + $0x4f8] sm:$0xff] }
 0x5be   : > { %2820 = vmatpush2.msra.mxu1 %v2781_v56  ;;  %2891 = vmatpush2.msra.mxu0 %v2640_v57 }
 0x5bf   : > { %2821 = vmatprep.subr.mxu1 %v2780_v26  ;;  %2892 = vmatprep.subr.mxu0 %v2639_v28 }
 0x5c0   : > { %2822 = vmatpush2.msra.mxu1 %v2779_v1  ;;  %2893 = vmatpush2.msra.mxu0 %v2638_v11  ;;  %v3034_v1 = vld [vmem:[#allocation10 + $0x4f0] sm:$0xff] }
 0x5c1   : > { %2823 = vmatprep.subr.mxu1 %v2778_v58  ;;  %2894 = vmatprep.subr.mxu0 %v2637_v25  ;;  %v2928_v11 = vld [vmem:[#allocation8 + $0x10] sm:$0xff]  ;;  %v3033_v58 = vld [vmem:[#allocation10 + $0x4e8] sm:$0xff]  ;;  %v3032_v25 = vld [vmem:[#allocation10 + $0x4e0] sm:$0xff] }
 0x5c2   : > { %2824 = vmatpush2.msra.mxu1 %v2777_v49  ;;  %2895 = vmatpush2.msra.mxu0 %v2636_v59  ;;  %v3142_v49 = vld [vmem:[#allocation8 + $0x18] sm:$0xff] }
 0x5c3   : > { %2825 = vmatprep.subr.mxu1 %v2776_v61  ;;  %2896 = vmatprep.subr.mxu0 %v2635_v24  ;;  %v3031_v59 = vld [vmem:[#allocation10 + $0x4d8] sm:$0xff]  ;;  %v3030_v24 = vld [vmem:[#allocation10 + $0x4d0] sm:$0xff] }
 0x5c4   : > { %2826 = vmatpush2.msra.mxu1 %v2775_v48  ;;  %2897 = vmatpush2.msra.mxu0 %v2634_v62  ;;  %v3249_v61 = vld [vmem:[#allocation10 + $0x6f8] sm:$0xff]  ;;  %v3248_v48 = vld [vmem:[#allocation10 + $0x6f0] sm:$0xff]  ;;  %v3029_v62 = vld [vmem:[#allocation10 + $0x4c8] sm:$0xff] }
 0x5c5   : > { %2827 = vmatprep.subr.mxu1 %v2774_v23  ;;  %2898 = vmatprep.subr.mxu0 %v2633_v47  ;;  %v3028_v23 = vld [vmem:[#allocation10 + $0x4c0] sm:$0xff]  ;;  %v3027_v47 = vld [vmem:[#allocation10 + $0x4b8] sm:$0xff] }
 0x5c6   : > { %2828 = vmatpush2.msra.mxu1 %v2773_v63  ;;  %2899 = vmatpush2.msra.mxu0 %v2632_v17  ;;  %v3026_v63 = vld [vmem:[#allocation10 + $0x4b0] sm:$0xff] }
 0x5c7   : > { %2829 = vmatprep.subr.mxu1 %v2772_v22  ;;  %2900 = vmatprep.subr.mxu0 %v2631_v46  ;;  %v3244_v17 = vld [vmem:[#allocation10 + $0x6d0] sm:$0xff]  ;;  %v3243_v22 = vld [vmem:[#allocation10 + $0x6c8] sm:$0xff]  ;;  %v3024_v46 = vld [vmem:[#allocation10 + $0x4a0] sm:$0xff] }
 0x5c8   : > { %2830 = vmatpush2.msra.mxu1 %v2771_v18  ;;  %2901 = vmatpush2.msra.mxu0 %v2630_v29  ;;  %v3242_v18 = vld [vmem:[#allocation10 + $0x6c0] sm:$0xff]  ;;  %v3023_v29 = vld [vmem:[#allocation10 + $0x498] sm:$0xff] }
 0x5c9   : > { %2831 = vmatprep.subr.mxu1 %v2770_v19  ;;  %2902 = vmatprep.subr.mxu0 %v2629_v20  ;;  %v3241_v19 = vld [vmem:[#allocation10 + $0x6b8] sm:$0xff]  ;;  %v3022_v20 = vld [vmem:[#allocation10 + $0x490] sm:$0xff] }
 0x5ca   : > { %2832 = vmatpush2.msra.mxu1 %v2769_v21  ;;  %2903 = vmatpush2.msra.mxu0 %v2628_v45  ;;  %v3240_v21 = vld [vmem:[#allocation10 + $0x6b0] sm:$0xff]  ;;  %v3021_v45 = vld [vmem:[#allocation10 + $0x488] sm:$0xff] }
 0x5cb   : > { %2833 = vmatprep.subr.mxu1 %v2768_v30  ;;  %2904 = vmatprep.subr.mxu0 %v2627_v31  ;;  %v3239_v30 = vld [vmem:[#allocation10 + $0x6a8] sm:$0xff]  ;;  %v3020_v31 = vld [vmem:[#allocation10 + $0x480] sm:$0xff] }
 0x5cc   : > { %2834 = vmatpush2.msra.mxu1 %v2767_v33  ;;  %2905 = vmatpush2.msra.mxu0 %v2626_v55  ;;  %v3238_v33 = vld [vmem:[#allocation10 + $0x6a0] sm:$0xff]  ;;  %v3019_v55 = vld [vmem:[#allocation10 + $0x478] sm:$0xff] }
 0x5cd   : > { %2835 = vmatprep.subr.mxu1 %v2766_v60  ;;  %2906 = vmatprep.subr.mxu0 %v2625_v36  ;;  %v3237_v60 = vld [vmem:[#allocation10 + $0x698] sm:$0xff]  ;;  %v3018_v36 = vld [vmem:[#allocation10 + $0x470] sm:$0xff] }
 0x5ce   : > { %2836 = vmatpush2.msra.mxu1 %v2765_v14  ;;  %2907 = vmatpush2.msra.mxu0 %v2624_v37  ;;  %v3236_v14 = vld [vmem:[#allocation10 + $0x690] sm:$0xff]  ;;  %v3017_v37 = vld [vmem:[#allocation10 + $0x468] sm:$0xff] }
 0x5cf   : > { %2837 = vmatprep.subr.mxu1 %v2764_v32  ;;  %2908 = vmatprep.subr.mxu0 %v2623_v35  ;;  %v3235_v32 = vld [vmem:[#allocation10 + $0x688] sm:$0xff]  ;;  %v3016_v35 = vld [vmem:[#allocation10 + $0x460] sm:$0xff] }
 0x5d0   : > { %2838 = vmatpush2.msra.mxu1 %v2763_v34  ;;  %2909 = vmatpush2.msra.mxu0 %v2622_v38  ;;  %v3234_v34 = vld [vmem:[#allocation10 + $0x680] sm:$0xff]  ;;  %v3015_v38 = vld [vmem:[#allocation10 + $0x458] sm:$0xff] }
 0x5d1   : > { %2839 = vmatprep.subr.mxu1 %v2762_v39  ;;  %2910 = vmatprep.subr.mxu0 %v2621_v40  ;;  %v3233_v39 = vld [vmem:[#allocation10 + $0x678] sm:$0xff]  ;;  %v3014_v40 = vld [vmem:[#allocation10 + $0x450] sm:$0xff] }
 0x5d2   : > { %2840 = vmatpush2.msra.mxu1 %v2761_v41  ;;  %2911 = vmatpush2.msra.mxu0 %v2620_v42  ;;  %v3232_v41 = vld [vmem:[#allocation10 + $0x670] sm:$0xff]  ;;  %v3013_v42 = vld [vmem:[#allocation10 + $0x448] sm:$0xff] }
 0x5d3   : > { %2841 = vmatprep.subr.mxu1 %v2760_v43  ;;  %2912 = vmatprep.subr.mxu0 %v2619_v44  ;;  %v3231_v43 = vld [vmem:[#allocation10 + $0x668] sm:$0xff]  ;;  %v3012_v44 = vld [vmem:[#allocation10 + $0x440] sm:$0xff] }
 0x5d4   : > { %2842 = vmatpush2.msra.mxu1 %v2759_v50  ;;  %2913 = vmatpush2.msra.mxu0 %v2618_v51  ;;  %v3230_v50 = vld [vmem:[#allocation10 + $0x660] sm:$0xff]  ;;  %v3011_v51 = vld [vmem:[#allocation10 + $0x438] sm:$0xff] }
 0x5d5   : > { %2843 = vmatprep.subr.mxu1 %v2758_v3  ;;  %2914 = vmatprep.subr.mxu0 %v2617_v4  ;;  %v3229_v3 = vld [vmem:[#allocation10 + $0x658] sm:$0xff]  ;;  %v3010_v4 = vld [vmem:[#allocation10 + $0x430] sm:$0xff] }
 0x5d6   : > { %2844 = vmatpush2.msra.mxu1 %v2757_v5  ;;  %2915 = vmatpush2.msra.mxu0 %v2616_v12  ;;  %v3228_v5 = vld [vmem:[#allocation10 + $0x650] sm:$0xff]  ;;  %v3007_v12 = vld [vmem:[#allocation10 + $0x418] sm:$0xff] }
 0x5d7   : > { %2845 = vmatprep.subr.mxu1 %v2756_v7  ;;  %2916 = vmatprep.subr.mxu0 %v2615_v13  ;;  %v3009_v7 = vld [vmem:[#allocation10 + $0x428] sm:$0xff]  ;;  %v3225_v13 = vld [vmem:[#allocation10 + $0x638] sm:$0xff] }
 0x5d8   : > { %2846 = vmatpush2.msra.mxu1 %v2755_v8  ;;  %2917 = vmatpush2.msra.mxu0 %v2614_v15  ;;  %v3227_v8 = vld [vmem:[#allocation10 + $0x648] sm:$0xff]  ;;  %v3006_v15 = vld [vmem:[#allocation10 + $0x410] sm:$0xff] }
 0x5d9   : > { %2847 = vmatprep.subr.mxu1 %v2754_v9  ;;  %2918 = vmatprep.subr.mxu0 %v2613_v16  ;;  %v3008_v9 = vld [vmem:[#allocation10 + $0x420] sm:$0xff]  ;;  %v3224_v16 = vld [vmem:[#allocation10 + $0x630] sm:$0xff] }
 0x5da   : > { %2848 = vmatpush2.msra.mxu1 %v2753_v10  ;;  %2919 = vmatpush2.msra.mxu0 %v2612_v27  ;;  %v3226_v10 = vld [vmem:[#allocation10 + $0x640] sm:$0xff]  ;;  %v3005_v27 = vld [vmem:[#allocation10 + $0x408] sm:$0xff] }
 0x5db   : > { %2960 = vmatprep.subr.mxu1 %v7218_v52  ;;  %3068 = vmatprep.subr.mxu0 %v3035_v6  ;;  %v3223_v6 = vld [vmem:[#allocation10 + $0x628] sm:$0xff] }
 0x65a   : > { %v2715_v56 = vpop.f32.mrf.mxu0 }
 0x65b   : > { %v2575_v57 = vpop.f32.mrf.mxu1 }
 0x65c   : > { %v2717_v26 = vpop.f32.mrf.mxu0 }
 0x65d   : > { %v2577_v28 = vpop.f32.mrf.mxu1  ;;  %2849 = vmatprep.mubr.f32.mxu1 %v2717_v26  ;;  %v3067_v26 = vld [vmem:[#allocation10 + $0x5f8] sm:$0xff] }
 0x65e   : > { %2850 = vmatmul.mubr.f32.vlgmr.msra.gmra.mxu1 %v2715_v56  ;;  %2920 = vmatprep.mubr.f32.mxu0 %v2577_v28  ;;  %v3004_v56 = vld [vmem:[#allocation10 + $0x400] sm:$0xff]  ;;  %v3221_v28 = vld [vmem:[#allocation10 + $0x618] sm:$0xff] }
 0x65f   : > { %2961 = vmatpush1.msra.mxu1 %v7220_v53  ;;  %2921 = vmatmul.mubr.f32.vlgmr.msra.gmra.mxu0 %v2575_v57  ;;  %v3222_v57 = vld [vmem:[#allocation10 + $0x620] sm:$0xff] }
 0x660   : > { %2962 = vmatprep.subr.mxu1 %v7222_v54  ;;  %2996 = vmatprep.mubr.f32.mxu1 %v6049_v0 }
 0x661   : > { %2963 = vmatpush1.msra.mxu1 %v7226_v2  ;;  %3069 = vmatpush1.msra.mxu0 %v3034_v1  ;;  %v3066_v1 = vld [vmem:[#allocation10 + $0x5f0] sm:$0xff] }
 0x662   : > { %3174 = vmatprep.subr.mxu1 %v7218_v52  ;;  %5367 = vmatmul.mubr.msk.f32.vlgmr.msra.gmra.mxu1 %vm2505_vm2, %v2928_v11  ;;  %v3247_v52 = vld [vmem:[#allocation10 + $0x6e8] sm:$0xff]  ;;  %v3220_v11 = vld [vmem:[#allocation10 + $0x610] sm:$0xff] }
 0x663   : > { %3175 = vmatpush1.msra.mxu1 %v7220_v53  ;;  %3210 = vmatprep.mubr.f32.mxu1 %v6049_v0  ;;  %v3246_v53 = vld [vmem:[#allocation10 + $0x6e0] sm:$0xff] }
 0x664   : > { %3176 = vmatprep.subr.mxu1 %v7222_v54  ;;  %3070 = vmatprep.subr.mxu0 %v3033_v58  ;;  %v3245_v54 = vld [vmem:[#allocation10 + $0x6d8] sm:$0xff]  ;;  %v3065_v58 = vld [vmem:[#allocation10 + $0x5e8] sm:$0xff] }
 0x665   : > { %3177 = vmatpush1.msra.mxu1 %v7226_v2  ;;  %3071 = vmatpush1.msra.mxu0 %v3032_v25  ;;  %v3025_v2 = vld [vmem:[#allocation10 + $0x4a8] sm:$0xff] }
 0x666   : > { %5368 = vmatmul.mubr.msk.f32.vlgmr.msra.gmra.mxu1 %vm2505_vm2, %v3142_v49  ;;  %3072 = vmatprep.subr.mxu0 %v3031_v59  ;;  %v3219_v25 = vld [vmem:[#allocation10 + $0x608] sm:$0xff]  ;;  %v3064_v49 = vld [vmem:[#allocation10 + $0x5e0] sm:$0xff] }
 0x667   : > { %3282 = vmatprep.subr.mxu1 %v3249_v61  ;;  %3073 = vmatpush1.msra.mxu0 %v3030_v24  ;;  %v3218_v59 = vld [vmem:[#allocation10 + $0x600] sm:$0xff]  ;;  %v3063_v61 = vld [vmem:[#allocation10 + $0x5d8] sm:$0xff] }
 0x668   : > { %3283 = vmatpush1.msra.mxu1 %v3248_v48  ;;  %3074 = vmatprep.subr.mxu0 %v3029_v62  ;;  %v3281_v24 = vld [vmem:[#allocation10 + $0x7f8] sm:$0xff]  ;;  %v3062_v48 = vld [vmem:[#allocation10 + $0x5d0] sm:$0xff] }
 0x669   : > { %3284 = vmatprep.subr.mxu1 %v3247_v52  ;;  %3075 = vmatpush1.msra.mxu0 %v3028_v23  ;;  %v3280_v62 = vld [vmem:[#allocation10 + $0x7f0] sm:$0xff]  ;;  %v3061_v52 = vld [vmem:[#allocation10 + $0x5c8] sm:$0xff] }
 0x66a   : > { %3285 = vmatpush1.msra.mxu1 %v3246_v53  ;;  %3076 = vmatprep.subr.mxu0 %v3027_v47  ;;  %v3279_v23 = vld [vmem:[#allocation10 + $0x7e8] sm:$0xff]  ;;  %v3060_v53 = vld [vmem:[#allocation10 + $0x5c0] sm:$0xff] }
 0x66b   : > { %3286 = vmatprep.subr.mxu1 %v3245_v54  ;;  %3077 = vmatpush1.msra.mxu0 %v3026_v63  ;;  %v3278_v47 = vld [vmem:[#allocation10 + $0x7e0] sm:$0xff]  ;;  %v3059_v54 = vld [vmem:[#allocation10 + $0x5b8] sm:$0xff] }
 0x66c   : > { %3287 = vmatpush1.msra.mxu1 %v3244_v17  ;;  %3078 = vmatprep.subr.mxu0 %v3025_v2  ;;  %v3277_v63 = vld [vmem:[#allocation10 + $0x7d8] sm:$0xff]  ;;  %v3058_v17 = vld [vmem:[#allocation10 + $0x5b0] sm:$0xff] }
 0x66d   : > { %3288 = vmatprep.subr.mxu1 %v3243_v22  ;;  %3079 = vmatpush1.msra.mxu0 %v3024_v46  ;;  %v3276_v2 = vld [vmem:[#allocation10 + $0x7d0] sm:$0xff]  ;;  %v3057_v22 = vld [vmem:[#allocation10 + $0x5a8] sm:$0xff] }
 0x66e   : > { %3289 = vmatpush1.msra.mxu1 %v3242_v18  ;;  %3080 = vmatprep.subr.mxu0 %v3023_v29  ;;  %v3275_v46 = vld [vmem:[#allocation10 + $0x7c8] sm:$0xff]  ;;  %v3056_v18 = vld [vmem:[#allocation10 + $0x5a0] sm:$0xff] }
 0x66f   : > { %3290 = vmatprep.subr.mxu1 %v3241_v19  ;;  %3081 = vmatpush1.msra.mxu0 %v3022_v20  ;;  %v3274_v29 = vld [vmem:[#allocation10 + $0x7c0] sm:$0xff]  ;;  %v3055_v19 = vld [vmem:[#allocation10 + $0x598] sm:$0xff] }
 0x670   : > { %3291 = vmatpush1.msra.mxu1 %v3240_v21  ;;  %3082 = vmatprep.subr.mxu0 %v3021_v45  ;;  %v3273_v20 = vld [vmem:[#allocation10 + $0x7b8] sm:$0xff]  ;;  %v3054_v21 = vld [vmem:[#allocation10 + $0x590] sm:$0xff] }
 0x671   : > { %3292 = vmatprep.subr.mxu1 %v3239_v30  ;;  %3083 = vmatpush1.msra.mxu0 %v3020_v31  ;;  %v3272_v45 = vld [vmem:[#allocation10 + $0x7b0] sm:$0xff]  ;;  %v3053_v30 = vld [vmem:[#allocation10 + $0x588] sm:$0xff] }
 0x672   : > { %3293 = vmatpush1.msra.mxu1 %v3238_v33  ;;  %3084 = vmatprep.subr.mxu0 %v3019_v55  ;;  %v3271_v31 = vld [vmem:[#allocation10 + $0x7a8] sm:$0xff]  ;;  %v3052_v33 = vld [vmem:[#allocation10 + $0x580] sm:$0xff] }
 0x673   : > { %3294 = vmatprep.subr.mxu1 %v3237_v60  ;;  %3085 = vmatpush1.msra.mxu0 %v3018_v36  ;;  %v3270_v55 = vld [vmem:[#allocation10 + $0x7a0] sm:$0xff]  ;;  %v3051_v60 = vld [vmem:[#allocation10 + $0x578] sm:$0xff] }
 0x674   : > { %3295 = vmatpush1.msra.mxu1 %v3236_v14  ;;  %3086 = vmatprep.subr.mxu0 %v3017_v37  ;;  %v3269_v36 = vld [vmem:[#allocation10 + $0x798] sm:$0xff]  ;;  %v3050_v14 = vld [vmem:[#allocation10 + $0x570] sm:$0xff] }
 0x675   : > { %3296 = vmatprep.subr.mxu1 %v3235_v32  ;;  %3087 = vmatpush1.msra.mxu0 %v3016_v35  ;;  %v3268_v37 = vld [vmem:[#allocation10 + $0x790] sm:$0xff]  ;;  %v3049_v32 = vld [vmem:[#allocation10 + $0x568] sm:$0xff] }
 0x676   : > { %3297 = vmatpush1.msra.mxu1 %v3234_v34  ;;  %3088 = vmatprep.subr.mxu0 %v3015_v38  ;;  %v3267_v35 = vld [vmem:[#allocation10 + $0x788] sm:$0xff]  ;;  %v3048_v34 = vld [vmem:[#allocation10 + $0x560] sm:$0xff] }
 0x677   : > { %3298 = vmatprep.subr.mxu1 %v3233_v39  ;;  %3089 = vmatpush1.msra.mxu0 %v3014_v40  ;;  %v3266_v38 = vld [vmem:[#allocation10 + $0x780] sm:$0xff]  ;;  %v3047_v39 = vld [vmem:[#allocation10 + $0x558] sm:$0xff] }
 0x678   : > { %3299 = vmatpush1.msra.mxu1 %v3232_v41  ;;  %3090 = vmatprep.subr.mxu0 %v3013_v42  ;;  %v3265_v40 = vld [vmem:[#allocation10 + $0x778] sm:$0xff]  ;;  %v3046_v41 = vld [vmem:[#allocation10 + $0x550] sm:$0xff] }
 0x679   : > { %3300 = vmatprep.subr.mxu1 %v3231_v43  ;;  %3091 = vmatpush1.msra.mxu0 %v3012_v44  ;;  %v3264_v42 = vld [vmem:[#allocation10 + $0x770] sm:$0xff]  ;;  %v3045_v43 = vld [vmem:[#allocation10 + $0x548] sm:$0xff] }
 0x67a   : > { %3301 = vmatpush1.msra.mxu1 %v3230_v50  ;;  %3092 = vmatprep.subr.mxu0 %v3011_v51  ;;  %v3263_v44 = vld [vmem:[#allocation10 + $0x768] sm:$0xff]  ;;  %v3044_v50 = vld [vmem:[#allocation10 + $0x540] sm:$0xff] }
 0x67b   : > { %3302 = vmatprep.subr.mxu1 %v3229_v3  ;;  %3093 = vmatpush1.msra.mxu0 %v3010_v4  ;;  %v3262_v51 = vld [vmem:[#allocation10 + $0x760] sm:$0xff]  ;;  %v3043_v3 = vld [vmem:[#allocation10 + $0x538] sm:$0xff] }
 0x67c   : > { %3303 = vmatpush1.msra.mxu1 %v3228_v5  ;;  %3094 = vmatprep.subr.mxu0 %v3009_v7  ;;  %v3261_v4 = vld [vmem:[#allocation10 + $0x758] sm:$0xff]  ;;  %v3042_v5 = vld [vmem:[#allocation10 + $0x530] sm:$0xff] }
 0x67d   : > { %3304 = vmatprep.subr.mxu1 %v3227_v8  ;;  %3095 = vmatpush1.msra.mxu0 %v3008_v9  ;;  %v3260_v7 = vld [vmem:[#allocation10 + $0x750] sm:$0xff]  ;;  %v3041_v8 = vld [vmem:[#allocation10 + $0x528] sm:$0xff] }
 0x67e   : > { %3305 = vmatpush1.msra.mxu1 %v3226_v10  ;;  %3096 = vmatprep.subr.mxu0 %v3007_v12  ;;  %v3259_v9 = vld [vmem:[#allocation10 + $0x748] sm:$0xff]  ;;  %v3040_v10 = vld [vmem:[#allocation10 + $0x520] sm:$0xff] }
 0x67f   : > { %3306 = vmatprep.subr.mxu1 %v3225_v13  ;;  %3097 = vmatpush1.msra.mxu0 %v3006_v15  ;;  %v3258_v12 = vld [vmem:[#allocation10 + $0x740] sm:$0xff]  ;;  %v3039_v13 = vld [vmem:[#allocation10 + $0x518] sm:$0xff] }
 0x680   : > { %3307 = vmatpush1.msra.mxu1 %v3224_v16  ;;  %3098 = vmatprep.subr.mxu0 %v3005_v27  ;;  %v3257_v15 = vld [vmem:[#allocation10 + $0x738] sm:$0xff]  ;;  %v3038_v16 = vld [vmem:[#allocation10 + $0x510] sm:$0xff] }
 0x681   : > { %3308 = vmatprep.subr.mxu1 %v3223_v6  ;;  %3099 = vmatpush1.msra.mxu0 %v3004_v56  ;;  %v3256_v27 = vld [vmem:[#allocation10 + $0x730] sm:$0xff]  ;;  %v3037_v6 = vld [vmem:[#allocation10 + $0x508] sm:$0xff] }
 0x682   : > { %3309 = vmatpush1.msra.mxu1 %v3222_v57  ;;  %3100 = vmatprep.subr.mxu0 %v3067_v26  ;;  %v3255_v56 = vld [vmem:[#allocation10 + $0x728] sm:$0xff]  ;;  %v3036_v57 = vld [vmem:[#allocation10 + $0x500] sm:$0xff] }
 0x683   : > { %3310 = vmatprep.subr.mxu1 %v3221_v28  ;;  %3101 = vmatpush2.msra.mxu0 %v3066_v1  ;;  %v3254_v26 = vld [vmem:[#allocation10 + $0x720] sm:$0xff]  ;;  %v3253_v28 = vld [vmem:[#allocation10 + $0x718] sm:$0xff]  ;;  %v3252_v1 = vld [vmem:[#allocation10 + $0x710] sm:$0xff] }
 0x684   : > { %3311 = vmatpush1.msra.mxu1 %v3220_v11  ;;  %3102 = vmatprep.subr.mxu0 %v3065_v58  ;;  %v3251_v11 = vld [vmem:[#allocation10 + $0x708] sm:$0xff]  ;;  %v3250_v58 = vld [vmem:[#allocation10 + $0x700] sm:$0xff] }
 0x685   : > { %3312 = vmatprep.subr.mxu1 %v3219_v25  ;;  %3103 = vmatpush2.msra.mxu0 %v3064_v49  ;;  %v3605_v25 = vld [vmem:[#allocation13 + $0x2f8] sm:$0xff] }
 0x686   : > { %3313 = vmatpush1.msra.mxu1 %v3218_v59  ;;  %3104 = vmatprep.subr.mxu0 %v3063_v61 }
 0x687   : > { %3314 = vmatprep.subr.mxu1 %v3281_v24  ;;  %3105 = vmatpush2.msra.mxu0 %v3062_v48 }
 0x688   : > { %3315 = vmatpush2.msra.mxu1 %v3280_v62  ;;  %3106 = vmatprep.subr.mxu0 %v3061_v52  ;;  %v3604_v52 = vld [vmem:[#allocation13 + $0x2f0] sm:$0xff] }
 0x689   : > { %3316 = vmatprep.subr.mxu1 %v3279_v23  ;;  %3107 = vmatpush2.msra.mxu0 %v3060_v53  ;;  %v3603_v23 = vld [vmem:[#allocation13 + $0x2e8] sm:$0xff]  ;;  %v3602_v53 = vld [vmem:[#allocation13 + $0x2e0] sm:$0xff] }
 0x68a   : > { %3317 = vmatpush2.msra.mxu1 %v3278_v47  ;;  %3108 = vmatprep.subr.mxu0 %v3059_v54  ;;  %v3601_v47 = vld [vmem:[#allocation13 + $0x2d8] sm:$0xff]  ;;  %v3600_v54 = vld [vmem:[#allocation13 + $0x2d0] sm:$0xff] }
 0x68b   : > { %3318 = vmatprep.subr.mxu1 %v3277_v63  ;;  %3109 = vmatpush2.msra.mxu0 %v3058_v17  ;;  %v3599_v63 = vld [vmem:[#allocation13 + $0x2c8] sm:$0xff]  ;;  %v3598_v17 = vld [vmem:[#allocation13 + $0x2c0] sm:$0xff] }
 0x68c   : > { %3319 = vmatpush2.msra.mxu1 %v3276_v2  ;;  %3110 = vmatprep.subr.mxu0 %v3057_v22  ;;  %v3597_v2 = vld [vmem:[#allocation13 + $0x2b8] sm:$0xff]  ;;  %v3596_v22 = vld [vmem:[#allocation13 + $0x2b0] sm:$0xff] }
 0x68d   : > { %3320 = vmatprep.subr.mxu1 %v3275_v46  ;;  %3111 = vmatpush2.msra.mxu0 %v3056_v18  ;;  %v3595_v46 = vld [vmem:[#allocation13 + $0x2a8] sm:$0xff]  ;;  %v3594_v18 = vld [vmem:[#allocation13 + $0x2a0] sm:$0xff] }
 0x68e   : > { %3321 = vmatpush2.msra.mxu1 %v3274_v29  ;;  %3112 = vmatprep.subr.mxu0 %v3055_v19  ;;  %v3593_v29 = vld [vmem:[#allocation13 + $0x298] sm:$0xff]  ;;  %v3592_v19 = vld [vmem:[#allocation13 + $0x290] sm:$0xff] }
 0x68f   : > { %3322 = vmatprep.subr.mxu1 %v3273_v20  ;;  %3113 = vmatpush2.msra.mxu0 %v3054_v21  ;;  %v3591_v20 = vld [vmem:[#allocation13 + $0x288] sm:$0xff]  ;;  %v3590_v21 = vld [vmem:[#allocation13 + $0x280] sm:$0xff] }
 0x690   : > { %3323 = vmatpush2.msra.mxu1 %v3272_v45  ;;  %3114 = vmatprep.subr.mxu0 %v3053_v30  ;;  %v3589_v45 = vld [vmem:[#allocation13 + $0x278] sm:$0xff]  ;;  %v3588_v30 = vld [vmem:[#allocation13 + $0x270] sm:$0xff] }
 0x691   : > { %3324 = vmatprep.subr.mxu1 %v3271_v31  ;;  %3115 = vmatpush2.msra.mxu0 %v3052_v33  ;;  %v3587_v31 = vld [vmem:[#allocation13 + $0x268] sm:$0xff]  ;;  %v3586_v33 = vld [vmem:[#allocation13 + $0x260] sm:$0xff] }
 0x692   : > { %3325 = vmatpush2.msra.mxu1 %v3270_v55  ;;  %3116 = vmatprep.subr.mxu0 %v3051_v60  ;;  %v3585_v55 = vld [vmem:[#allocation13 + $0x258] sm:$0xff]  ;;  %v3584_v60 = vld [vmem:[#allocation13 + $0x250] sm:$0xff] }
 0x693   : > { %3326 = vmatprep.subr.mxu1 %v3269_v36  ;;  %3117 = vmatpush2.msra.mxu0 %v3050_v14  ;;  %v3583_v36 = vld [vmem:[#allocation13 + $0x248] sm:$0xff]  ;;  %v3582_v14 = vld [vmem:[#allocation13 + $0x240] sm:$0xff] }
 0x694   : > { %3327 = vmatpush2.msra.mxu1 %v3268_v37  ;;  %3118 = vmatprep.subr.mxu0 %v3049_v32  ;;  %v3581_v37 = vld [vmem:[#allocation13 + $0x238] sm:$0xff]  ;;  %v3580_v32 = vld [vmem:[#allocation13 + $0x230] sm:$0xff] }
 0x695   : > { %3328 = vmatprep.subr.mxu1 %v3267_v35  ;;  %3119 = vmatpush2.msra.mxu0 %v3048_v34  ;;  %v3579_v35 = vld [vmem:[#allocation13 + $0x228] sm:$0xff]  ;;  %v3578_v34 = vld [vmem:[#allocation13 + $0x220] sm:$0xff] }
 0x696   : > { %3329 = vmatpush2.msra.mxu1 %v3266_v38  ;;  %3120 = vmatprep.subr.mxu0 %v3047_v39  ;;  %v3577_v38 = vld [vmem:[#allocation13 + $0x218] sm:$0xff]  ;;  %v3576_v39 = vld [vmem:[#allocation13 + $0x210] sm:$0xff] }
 0x697   : > { %3330 = vmatprep.subr.mxu1 %v3265_v40  ;;  %3121 = vmatpush2.msra.mxu0 %v3046_v41  ;;  %v3575_v40 = vld [vmem:[#allocation13 + $0x208] sm:$0xff]  ;;  %v3574_v41 = vld [vmem:[#allocation13 + $0x200] sm:$0xff] }
 0x698   : > { %3331 = vmatpush2.msra.mxu1 %v3264_v42  ;;  %3122 = vmatprep.subr.mxu0 %v3045_v43  ;;  %v3637_v42 = vld [vmem:[#allocation13 + $0x3f8] sm:$0xff]  ;;  %v3636_v43 = vld [vmem:[#allocation13 + $0x3f0] sm:$0xff] }
 0x699   : > { %3332 = vmatprep.subr.mxu1 %v3263_v44  ;;  %3123 = vmatpush2.msra.mxu0 %v3044_v50  ;;  %v3635_v44 = vld [vmem:[#allocation13 + $0x3e8] sm:$0xff]  ;;  %v3634_v50 = vld [vmem:[#allocation13 + $0x3e0] sm:$0xff] }
 0x69a   : > { %3333 = vmatpush2.msra.mxu1 %v3262_v51  ;;  %3124 = vmatprep.subr.mxu0 %v3043_v3  ;;  %v3633_v51 = vld [vmem:[#allocation13 + $0x3d8] sm:$0xff]  ;;  %v3632_v3 = vld [vmem:[#allocation13 + $0x3d0] sm:$0xff] }
 0x69b   : > { %3334 = vmatprep.subr.mxu1 %v3261_v4  ;;  %3125 = vmatpush2.msra.mxu0 %v3042_v5  ;;  %v3631_v4 = vld [vmem:[#allocation13 + $0x3c8] sm:$0xff]  ;;  %v3630_v5 = vld [vmem:[#allocation13 + $0x3c0] sm:$0xff] }
 0x69c   : > { %3335 = vmatpush2.msra.mxu1 %v3260_v7  ;;  %3126 = vmatprep.subr.mxu0 %v3041_v8  ;;  %v3629_v7 = vld [vmem:[#allocation13 + $0x3b8] sm:$0xff]  ;;  %v3628_v8 = vld [vmem:[#allocation13 + $0x3b0] sm:$0xff] }
 0x69d   : > { %3336 = vmatprep.subr.mxu1 %v3259_v9  ;;  %3127 = vmatpush2.msra.mxu0 %v3040_v10  ;;  %v3627_v9 = vld [vmem:[#allocation13 + $0x3a8] sm:$0xff]  ;;  %v3626_v10 = vld [vmem:[#allocation13 + $0x3a0] sm:$0xff] }
 0x69e   : > { %3337 = vmatpush2.msra.mxu1 %v3258_v12  ;;  %3128 = vmatprep.subr.mxu0 %v3039_v13  ;;  %v3625_v12 = vld [vmem:[#allocation13 + $0x398] sm:$0xff]  ;;  %v3624_v13 = vld [vmem:[#allocation13 + $0x390] sm:$0xff] }
 0x69f   : > { %3338 = vmatprep.subr.mxu1 %v3257_v15  ;;  %3129 = vmatpush2.msra.mxu0 %v3038_v16  ;;  %v3623_v15 = vld [vmem:[#allocation13 + $0x388] sm:$0xff]  ;;  %v3622_v16 = vld [vmem:[#allocation13 + $0x380] sm:$0xff] }
 0x6a0   : > { %3339 = vmatpush2.msra.mxu1 %v3256_v27  ;;  %3130 = vmatprep.subr.mxu0 %v3037_v6  ;;  %v3621_v27 = vld [vmem:[#allocation13 + $0x378] sm:$0xff]  ;;  %v3620_v6 = vld [vmem:[#allocation13 + $0x370] sm:$0xff] }
 0x6a1   : > { %3340 = vmatprep.subr.mxu1 %v3255_v56  ;;  %3131 = vmatpush2.msra.mxu0 %v3036_v57  ;;  %v3619_v56 = vld [vmem:[#allocation13 + $0x368] sm:$0xff]  ;;  %v3618_v57 = vld [vmem:[#allocation13 + $0x360] sm:$0xff] }
 0x6a2   : > { %3341 = vmatpush2.msra.mxu1 %v3254_v26  ;;  %v3617_v26 = vld [vmem:[#allocation13 + $0x358] sm:$0xff] }
 0x6a3   : > { %3342 = vmatprep.subr.mxu1 %v3253_v28  ;;  %v3616_v28 = vld [vmem:[#allocation13 + $0x350] sm:$0xff] }
 0x6a4   : > { %3343 = vmatpush2.msra.mxu1 %v3252_v1  ;;  %v3615_v1 = vld [vmem:[#allocation13 + $0x348] sm:$0xff] }
 0x6a5   : > { %3344 = vmatprep.subr.mxu1 %v3251_v11  ;;  %v3614_v11 = vld [vmem:[#allocation13 + $0x340] sm:$0xff] }
 0x6a6   : > { %3345 = vmatpush2.msra.mxu1 %v3250_v58  ;;  %v3613_v58 = vld [vmem:[#allocation13 + $0x338] sm:$0xff] }
 0x6a7   : > { %3638 = vmatprep.subr.mxu1 %v3605_v25  ;;  %v3612_v25 = vld [vmem:[#allocation13 + $0x330] sm:$0xff] }
 0x71e   : > { %v7248_v49 = vpop.f32.mrf.mxu1 }
 0x720   : > { %v7250_v59 = vpop.f32.mrf.mxu1 }
 0x722   : > { %v2998_v61 = vpop.f32.mrf.mxu1 }
 0x724   : > { %v3000_v24 = vpop.f32.mrf.mxu1 }
 0x725   : > { %3132 = vmatprep.mubr.f32.mxu0 %v3000_v24  ;;  %v3610_v24 = vld [vmem:[#allocation13 + $0x320] sm:$0xff] }
 0x726   : > { %3133 = vmatmul.mubr.f32.vlgmr.msra.gmra.mxu0 %v2998_v61  ;;  %v3212_v48 = vpop.f32.mrf.mxu1  ;;  %v3611_v61 = vld [vmem:[#allocation13 + $0x328] sm:$0xff] }
 0x727   : > { %3426 = vmatprep.mubr.f32.mxu0 %v6049_v0 }
 0x728   : > { %v3214_v62 = vpop.f32.mrf.mxu1 }
 0x729   : > { %3346 = vmatprep.mubr.f32.mxu1 %v3214_v62  ;;  %v3608_v62 = vld [vmem:[#allocation13 + $0x310] sm:$0xff] }
 0x72a   : > { %3347 = vmatmul.mubr.f32.vlgmr.msra.gmra.mxu1 %v3212_v48  ;;  %v3609_v48 = vld [vmem:[#allocation13 + $0x318] sm:$0xff] }
 0x72b   : > { %3639 = vmatpush1.msra.mxu1 %v3604_v52  ;;  %v3607_v52 = vld [vmem:[#allocation13 + $0x308] sm:$0xff] }
 0x72c   : > { %3640 = vmatprep.subr.mxu1 %v3603_v23  ;;  %v3606_v23 = vld [vmem:[#allocation13 + $0x300] sm:$0xff] }
 0x72d   : > { %3641 = vmatpush1.msra.mxu1 %v3602_v53  ;;  %v2922_v53 = vpop.f32.mrf.mxu0 }
 0x72e   : > { %3642 = vmatprep.subr.mxu1 %v3601_v47 }
 0x72f   : > { %3643 = vmatpush1.msra.mxu1 %v3600_v54  ;;  %v2924_v47 = vpop.f32.mrf.mxu0 }
 0x730   : > { %3644 = vmatprep.subr.mxu1 %v3599_v63  ;;  %v2923_v63 = vadd.f32 %v2922_v53, %v7248_v49  ;;  %v3464_v49 = vld [vmem:[#allocation13 + $0xf8] sm:$0xff]  ;;  %v3481_v53 = vld [vmem:[#allocation13 + $0x180] sm:$0xff] }
 0x731   : > { %3645 = vmatpush1.msra.mxu1 %v3598_v17 }
 0x732   : > { %3646 = vmatprep.subr.mxu1 %v3597_v2  ;;  %v2925_v2 = vadd.f32 %v2924_v47, %v7250_v59  ;;  %v3498_v59 = vld [vmem:[#allocation11 + $0x4] sm:$0xf]  ;;  %v3480_v47 = vld [vmem:[#allocation13 + $0x178] sm:$0xff] }
 0x733   : > { %3647 = vmatpush1.msra.mxu1 %v3596_v22 }
 0x734   : > { %3648 = vmatprep.subr.mxu1 %v3595_v46 }
 0x735   : > { %3649 = vmatpush1.msra.mxu1 %v3594_v18 }
 0x736   : > { %3650 = vmatprep.subr.mxu1 %v3593_v29 }
 0x737   : > { %3651 = vmatpush1.msra.mxu1 %v3592_v19 }
 0x738   : > { %3652 = vmatprep.subr.mxu1 %v3591_v20 }
 0x739   : > { %3653 = vmatpush1.msra.mxu1 %v3590_v21 }
 0x73a   : > { %3654 = vmatprep.subr.mxu1 %v3589_v45 }
 0x73b   : > { %3655 = vmatpush1.msra.mxu1 %v3588_v30  ;;  %v3357_v30 = vld [vmem:[#allocation11] sm:$0xf] }
 0x73c   : > { %3656 = vmatprep.subr.mxu1 %v3587_v31  ;;  %v3463_v31 = vld [vmem:[#allocation13 + $0xf0] sm:$0xff] }
 0x73d   : > { %3657 = vmatpush1.msra.mxu1 %v3586_v33  ;;  %v3462_v33 = vld [vmem:[#allocation13 + $0xe8] sm:$0xff] }
 0x73e   : > { %3658 = vmatprep.subr.mxu1 %v3585_v55  ;;  %v3461_v55 = vld [vmem:[#allocation13 + $0xe0] sm:$0xff] }
 0x73f   : > { %3659 = vmatpush1.msra.mxu1 %v3584_v60  ;;  %v3460_v60 = vld [vmem:[#allocation13 + $0xd8] sm:$0xff] }
 0x740   : > { %3660 = vmatprep.subr.mxu1 %v3583_v36  ;;  %v3459_v36 = vld [vmem:[#allocation13 + $0xd0] sm:$0xff] }
 0x741   : > { %3661 = vmatpush1.msra.mxu1 %v3582_v14  ;;  %v3458_v14 = vld [vmem:[#allocation13 + $0xc8] sm:$0xff] }
 0x742   : > { %3662 = vmatprep.subr.mxu1 %v3581_v37  ;;  %v3457_v37 = vld [vmem:[#allocation13 + $0xc0] sm:$0xff] }
 0x743   : > { %3663 = vmatpush1.msra.mxu1 %v3580_v32  ;;  %v3456_v32 = vld [vmem:[#allocation13 + $0xb8] sm:$0xff] }
 0x744   : > { %3664 = vmatprep.subr.mxu1 %v3579_v35  ;;  %v3455_v35 = vld [vmem:[#allocation13 + $0xb0] sm:$0xff] }
 0x745   : > { %3665 = vmatpush1.msra.mxu1 %v3578_v34  ;;  %v3454_v34 = vld [vmem:[#allocation13 + $0xa8] sm:$0xff] }
 0x746   : > { %3666 = vmatprep.subr.mxu1 %v3577_v38  ;;  %v3453_v38 = vld [vmem:[#allocation13 + $0xa0] sm:$0xff] }
 0x747   : > { %3667 = vmatpush1.msra.mxu1 %v3576_v39  ;;  %v3452_v39 = vld [vmem:[#allocation13 + $0x98] sm:$0xff] }
 0x748   : > { %3668 = vmatprep.subr.mxu1 %v3575_v40  ;;  %v3451_v40 = vld [vmem:[#allocation13 + $0x90] sm:$0xff] }
 0x749   : > { %3669 = vmatpush1.msra.mxu1 %v3574_v41  ;;  %v3450_v41 = vld [vmem:[#allocation13 + $0x88] sm:$0xff] }
 0x74a   : > { %3670 = vmatprep.subr.mxu1 %v3637_v42  ;;  %v3449_v42 = vld [vmem:[#allocation13 + $0x80] sm:$0xff] }
 0x74b   : > { %3671 = vmatpush2.msra.mxu1 %v3636_v43  ;;  %v3448_v43 = vld [vmem:[#allocation13 + $0x78] sm:$0xff] }
 0x74c   : > { %3672 = vmatprep.subr.mxu1 %v3635_v44  ;;  %v3447_v44 = vld [vmem:[#allocation13 + $0x70] sm:$0xff] }
 0x74d   : > { %3673 = vmatpush2.msra.mxu1 %v3634_v50  ;;  %v3446_v50 = vld [vmem:[#allocation13 + $0x68] sm:$0xff] }
 0x74e   : > { %3674 = vmatprep.subr.mxu1 %v3633_v51  ;;  %v3445_v51 = vld [vmem:[#allocation13 + $0x60] sm:$0xff] }
 0x74f   : > { %3675 = vmatpush2.msra.mxu1 %v3632_v3  ;;  %v3444_v3 = vld [vmem:[#allocation13 + $0x58] sm:$0xff] }
 0x750   : > { %3676 = vmatprep.subr.mxu1 %v3631_v4  ;;  %v3443_v4 = vld [vmem:[#allocation13 + $0x50] sm:$0xff] }
 0x751   : > { %3677 = vmatpush2.msra.mxu1 %v3630_v5  ;;  %v3442_v5 = vld [vmem:[#allocation13 + $0x48] sm:$0xff] }
 0x752   : > { %3678 = vmatprep.subr.mxu1 %v3629_v7  ;;  %v3441_v7 = vld [vmem:[#allocation13 + $0x40] sm:$0xff] }
 0x753   : > { %3679 = vmatpush2.msra.mxu1 %v3628_v8  ;;  %v3440_v8 = vld [vmem:[#allocation13 + $0x38] sm:$0xff] }
 0x754   : > { %3680 = vmatprep.subr.mxu1 %v3627_v9  ;;  %v3439_v9 = vld [vmem:[#allocation13 + $0x30] sm:$0xff] }
 0x755   : > { %3681 = vmatpush2.msra.mxu1 %v3626_v10  ;;  %v3438_v10 = vld [vmem:[#allocation13 + $0x28] sm:$0xff] }
 0x756   : > { %3682 = vmatprep.subr.mxu1 %v3625_v12  ;;  %v3437_v12 = vld [vmem:[#allocation13 + $0x20] sm:$0xff] }
 0x757   : > { %3683 = vmatpush2.msra.mxu1 %v3624_v13  ;;  %v3436_v13 = vld [vmem:[#allocation13 + $0x18] sm:$0xff] }
 0x758   : > { %3684 = vmatprep.subr.mxu1 %v3623_v15  ;;  %v3435_v15 = vld [vmem:[#allocation13 + $0x10] sm:$0xff] }
 0x759   : > { %3685 = vmatpush2.msra.mxu1 %v3622_v16  ;;  %v3434_v16 = vld [vmem:[#allocation13 + $0x8] sm:$0xff] }
 0x75a   : > { %3686 = vmatprep.subr.mxu1 %v3621_v27  ;;  %v3433_v27 = vld [vmem:[#allocation13] sm:$0xff] }
 0x75b   : > { %3687 = vmatpush2.msra.mxu1 %v3620_v6  ;;  %v3496_v6 = vld [vmem:[#allocation13 + $0x1f8] sm:$0xff] }
 0x75c   : > { %3688 = vmatprep.subr.mxu1 %v3619_v56  ;;  %v3495_v56 = vld [vmem:[#allocation13 + $0x1f0] sm:$0xff] }
 0x75d   : > { %3689 = vmatpush2.msra.mxu1 %v3618_v57  ;;  %v3494_v57 = vld [vmem:[#allocation13 + $0x1e8] sm:$0xff] }
 0x75e   : > { %3690 = vmatprep.subr.mxu1 %v3617_v26  ;;  %v3493_v26 = vld [vmem:[#allocation13 + $0x1e0] sm:$0xff] }
 0x75f   : > { %3691 = vmatpush2.msra.mxu1 %v3616_v28  ;;  %v3492_v28 = vld [vmem:[#allocation13 + $0x1d8] sm:$0xff] }
 0x760   : > { %3692 = vmatprep.subr.mxu1 %v3615_v1  ;;  %v3491_v1 = vld [vmem:[#allocation13 + $0x1d0] sm:$0xff] }
 0x761   : > { %3693 = vmatpush2.msra.mxu1 %v3614_v11  ;;  %v3490_v11 = vld [vmem:[#allocation13 + $0x1c8] sm:$0xff] }
 0x762   : > { %3694 = vmatprep.subr.mxu1 %v3613_v58  ;;  %v3489_v58 = vld [vmem:[#allocation13 + $0x1c0] sm:$0xff] }
 0x763   : > { %3695 = vmatpush2.msra.mxu1 %v3612_v25  ;;  %v3488_v25 = vld [vmem:[#allocation13 + $0x1b8] sm:$0xff] }
 0x764   : > { %3696 = vmatprep.subr.mxu1 %v3611_v61  ;;  %v3487_v61 = vld [vmem:[#allocation13 + $0x1b0] sm:$0xff] }
 0x765   : > { %3697 = vmatpush2.msra.mxu1 %v3610_v24  ;;  %v3486_v24 = vld [vmem:[#allocation13 + $0x1a8] sm:$0xff] }
 0x766   : > { %3698 = vmatprep.subr.mxu1 %v3609_v48  ;;  %v3485_v48 = vld [vmem:[#allocation13 + $0x1a0] sm:$0xff] }
 0x767   : > { %3699 = vmatpush2.msra.mxu1 %v3608_v62  ;;  %v3484_v62 = vld [vmem:[#allocation13 + $0x198] sm:$0xff] }
 0x768   : > { %3700 = vmatprep.subr.mxu1 %v3607_v52  ;;  %v3483_v52 = vld [vmem:[#allocation13 + $0x190] sm:$0xff] }
 0x769   : > { %3701 = vmatpush2.msra.mxu1 %v3606_v23  ;;  %v3482_v23 = vld [vmem:[#allocation13 + $0x188] sm:$0xff] }
 0x7e6   : > { %v3134_v54 = vpop.f32.mrf.mxu0 }
 0x7e7   : > { %v3139_v22 = vadd.f32 %v3134_v54, %v2923_v63  ;;  %v3479_v54 = vld [vmem:[#allocation13 + $0x170] sm:$0xff]  ;;  %v3478_v63 = vld [vmem:[#allocation13 + $0x168] sm:$0xff] }
 0x7e8   : > { %v3136_v17 = vpop.f32.mrf.mxu0 }
 0x7e9   : > { %v3140_v18 = vadd.f32 %v3136_v17, %v2925_v2  ;;  %v3477_v17 = vld [vmem:[#allocation13 + $0x160] sm:$0xff]  ;;  %v3476_v2 = vld [vmem:[#allocation13 + $0x158] sm:$0xff] }
 0x7ea   : > { %v3348_v46 = vpop.f32.mrf.mxu1 }
 0x7eb   : > { %v3353_v29 = vadd.f32 %v3348_v46, %v3139_v22  ;;  %v3475_v22 = vld [vmem:[#allocation13 + $0x150] sm:$0xff]  ;;  %v3474_v46 = vld [vmem:[#allocation13 + $0x148] sm:$0xff] }
 0x7ec   : > { %v3350_v19 = vpop.f32.mrf.mxu1 }
 0x7ed   : > { %v3354_v20 = vadd.f32 %v3350_v19, %v3140_v18  ;;  %v7257_v45 = vmax.f32 %v3353_v29, 0.0  ;;  %v3473_v18 = vld [vmem:[#allocation13 + $0x140] sm:$0xff]  ;;  %v3472_v29 = vld [vmem:[#allocation13 + $0x138] sm:$0xff]  ;;  %v3471_v19 = vld [vmem:[#allocation13 + $0x130] sm:$0xff] }
 0x7ef   : > { %v7255_v21 = vmax.f32 %v3354_v20, 0.0  ;;  %v3470_v20 = vld [vmem:[#allocation13 + $0x128] sm:$0xff] }
 0x7f1   : > { %3392 = vmatprep.subr.mxu0 %v7255_v21  ;;  %3815 = vmatprep.subr.mxu1 %v7255_v21 }
 0x7f2   : > { %3393 = vmatpush1.msra.mxu0 %v7257_v45 }
 0x7f3   : > { %5369 = vmatmul.mubr.msk.f32.vlgmr.msra.gmra.mxu0 %vm3358_vm3, %v3357_v30  ;;  %3532 = vmatprep.subr.mxu0 %v7255_v21  ;;  %v3469_v30 = vld [vmem:[#allocation13 + $0x120] sm:$0xff] }
 0x7f4   : > { %3533 = vmatpush1.msra.mxu0 %v7257_v45  ;;  %3566 = vmatprep.mubr.f32.mxu0 %v6049_v0 }
 0x7f5   : > { %3709 = vmatprep.subr.mxu0 %v3464_v49  ;;  %v3468_v49 = vld [vmem:[#allocation13 + $0x118] sm:$0xff] }
 0x7f7   : > { %5370 = vmatmul.mubr.msk.f32.vlgmr.msra.gmra.mxu0 %vm3358_vm3, %v3498_v59  ;;  %v3467_v59 = vld [vmem:[#allocation13 + $0x110] sm:$0xff] }
 0x7f8   : > { %3710 = vmatpush1.msra.mxu0 %v3463_v31  ;;  %v3466_v31 = vld [vmem:[#allocation13 + $0x108] sm:$0xff] }
 0x7f9   : > { %3711 = vmatprep.subr.mxu0 %v3462_v33  ;;  %v3465_v33 = vld [vmem:[#allocation13 + $0x100] sm:$0xff] }
 0x7fa   : > { %3712 = vmatpush1.msra.mxu0 %v3461_v55  ;;  %v3888_v55 = vld [vmem:[#allocation13 + $0x4f8] sm:$0xff] }
 0x7fb   : > { %3713 = vmatprep.subr.mxu0 %v3460_v60 }
 0x7fc   : > { %3714 = vmatpush1.msra.mxu0 %v3459_v36 }
 0x7fd   : > { %3715 = vmatprep.subr.mxu0 %v3458_v14  ;;  %v3887_v14 = vld [vmem:[#allocation13 + $0x4f0] sm:$0xff] }
 0x7fe   : > { %3716 = vmatpush1.msra.mxu0 %v3457_v37  ;;  %v3886_v37 = vld [vmem:[#allocation13 + $0x4e8] sm:$0xff] }
 0x7ff   : > { %3717 = vmatprep.subr.mxu0 %v3456_v32 }
 0x800   : > { %3718 = vmatpush1.msra.mxu0 %v3455_v35  ;;  %v3885_v35 = vld [vmem:[#allocation13 + $0x4e0] sm:$0xff] }
 0x801   : > { %3719 = vmatprep.subr.mxu0 %v3454_v34  ;;  %v3884_v34 = vld [vmem:[#allocation13 + $0x4d8] sm:$0xff] }
 0x802   : > { %3720 = vmatpush1.msra.mxu0 %v3453_v38 }
 0x803   : > { %3721 = vmatprep.subr.mxu0 %v3452_v39  ;;  %v3883_v39 = vld [vmem:[#allocation13 + $0x4d0] sm:$0xff] }
 0x804   : > { %3722 = vmatpush1.msra.mxu0 %v3451_v40  ;;  %v3882_v40 = vld [vmem:[#allocation13 + $0x4c8] sm:$0xff] }
 0x805   : > { %3723 = vmatprep.subr.mxu0 %v3450_v41  ;;  %v3781_v41 = vld [vmem:[#allocation11 + $0x8] sm:$0xf] }
 0x806   : > { %3724 = vmatpush1.msra.mxu0 %v3449_v42  ;;  %v3881_v42 = vld [vmem:[#allocation13 + $0x4c0] sm:$0xff] }
 0x807   : > { %3725 = vmatprep.subr.mxu0 %v3448_v43  ;;  %v4102_v43 = vld [vmem:[#allocation13 + $0x6f8] sm:$0xff] }
 0x808   : > { %3726 = vmatpush1.msra.mxu0 %v3447_v44  ;;  %v3880_v44 = vld [vmem:[#allocation13 + $0x4b8] sm:$0xff] }
 0x809   : > { %3727 = vmatprep.subr.mxu0 %v3446_v50  ;;  %v3879_v50 = vld [vmem:[#allocation13 + $0x4b0] sm:$0xff] }
 0x80a   : > { %3728 = vmatpush1.msra.mxu0 %v3445_v51  ;;  %v3995_v51 = vld [vmem:[#allocation11 + $0xc] sm:$0xf] }
 0x80b   : > { %3729 = vmatprep.subr.mxu0 %v3444_v3  ;;  %v3878_v3 = vld [vmem:[#allocation13 + $0x4a8] sm:$0xff] }
 0x80c   : > { %3730 = vmatpush1.msra.mxu0 %v3443_v4  ;;  %v4101_v4 = vld [vmem:[#allocation13 + $0x6f0] sm:$0xff] }
 0x80d   : > { %3731 = vmatprep.subr.mxu0 %v3442_v5  ;;  %v3877_v5 = vld [vmem:[#allocation13 + $0x4a0] sm:$0xff] }
 0x80e   : > { %3732 = vmatpush1.msra.mxu0 %v3441_v7  ;;  %v4100_v7 = vld [vmem:[#allocation13 + $0x6e8] sm:$0xff] }
 0x80f   : > { %3733 = vmatprep.subr.mxu0 %v3440_v8  ;;  %v4099_v8 = vld [vmem:[#allocation13 + $0x6e0] sm:$0xff] }
 0x810   : > { %3734 = vmatpush1.msra.mxu0 %v3439_v9  ;;  %v3875_v9 = vld [vmem:[#allocation13 + $0x490] sm:$0xff] }
 0x811   : > { %3735 = vmatprep.subr.mxu0 %v3438_v10  ;;  %v4098_v10 = vld [vmem:[#allocation13 + $0x6d8] sm:$0xff] }
 0x812   : > { %3736 = vmatpush1.msra.mxu0 %v3437_v12  ;;  %v4097_v12 = vld [vmem:[#allocation13 + $0x6d0] sm:$0xff] }
 0x813   : > { %3737 = vmatprep.subr.mxu0 %v3436_v13  ;;  %v3873_v13 = vld [vmem:[#allocation13 + $0x480] sm:$0xff] }
 0x814   : > { %3738 = vmatpush1.msra.mxu0 %v3435_v15  ;;  %v4096_v15 = vld [vmem:[#allocation13 + $0x6c8] sm:$0xff] }
 0x815   : > { %3739 = vmatprep.subr.mxu0 %v3434_v16  ;;  %v3872_v16 = vld [vmem:[#allocation13 + $0x478] sm:$0xff] }
 0x816   : > { %3740 = vmatpush1.msra.mxu0 %v3433_v27  ;;  %v4095_v27 = vld [vmem:[#allocation13 + $0x6c0] sm:$0xff] }
 0x817   : > { %3741 = vmatprep.subr.mxu0 %v3496_v6  ;;  %v3871_v6 = vld [vmem:[#allocation13 + $0x470] sm:$0xff] }
 0x818   : > { %3742 = vmatpush2.msra.mxu0 %v3495_v56  ;;  %v4094_v56 = vld [vmem:[#allocation13 + $0x6b8] sm:$0xff] }
 0x819   : > { %3743 = vmatprep.subr.mxu0 %v3494_v57  ;;  %v3870_v57 = vld [vmem:[#allocation13 + $0x468] sm:$0xff] }
 0x81a   : > { %3744 = vmatpush2.msra.mxu0 %v3493_v26  ;;  %v4093_v26 = vld [vmem:[#allocation13 + $0x6b0] sm:$0xff] }
 0x81b   : > { %3745 = vmatprep.subr.mxu0 %v3492_v28  ;;  %v3869_v28 = vld [vmem:[#allocation13 + $0x460] sm:$0xff] }
 0x81c   : > { %3746 = vmatpush2.msra.mxu0 %v3491_v1  ;;  %v4092_v1 = vld [vmem:[#allocation13 + $0x6a8] sm:$0xff] }
 0x81d   : > { %3747 = vmatprep.subr.mxu0 %v3490_v11  ;;  %v3868_v11 = vld [vmem:[#allocation13 + $0x458] sm:$0xff] }
 0x81e   : > { %3748 = vmatpush2.msra.mxu0 %v3489_v58  ;;  %v4091_v58 = vld [vmem:[#allocation13 + $0x6a0] sm:$0xff] }
 0x81f   : > { %3749 = vmatprep.subr.mxu0 %v3488_v25  ;;  %v3867_v25 = vld [vmem:[#allocation13 + $0x450] sm:$0xff] }
 0x820   : > { %3750 = vmatpush2.msra.mxu0 %v3487_v61  ;;  %v4090_v61 = vld [vmem:[#allocation13 + $0x698] sm:$0xff] }
 0x821   : > { %3751 = vmatprep.subr.mxu0 %v3486_v24  ;;  %v3866_v24 = vld [vmem:[#allocation13 + $0x448] sm:$0xff] }
 0x822   : > { %3752 = vmatpush2.msra.mxu0 %v3485_v48  ;;  %v4089_v48 = vld [vmem:[#allocation13 + $0x690] sm:$0xff] }
 0x823   : > { %3753 = vmatprep.subr.mxu0 %v3484_v62  ;;  %v3865_v62 = vld [vmem:[#allocation13 + $0x440] sm:$0xff] }
 0x824   : > { %3754 = vmatpush2.msra.mxu0 %v3483_v52  ;;  %v4088_v52 = vld [vmem:[#allocation13 + $0x688] sm:$0xff] }
 0x825   : > { %3755 = vmatprep.subr.mxu0 %v3482_v23  ;;  %v3864_v23 = vld [vmem:[#allocation13 + $0x438] sm:$0xff] }
 0x826   : > { %3756 = vmatpush2.msra.mxu0 %v3481_v53  ;;  %v4087_v53 = vld [vmem:[#allocation13 + $0x680] sm:$0xff] }
 0x827   : > { %3757 = vmatprep.subr.mxu0 %v3480_v47  ;;  %v3863_v47 = vld [vmem:[#allocation13 + $0x430] sm:$0xff] }
 0x828   : > { %3758 = vmatpush2.msra.mxu0 %v3479_v54  ;;  %v4086_v54 = vld [vmem:[#allocation13 + $0x678] sm:$0xff] }
 0x829   : > { %3759 = vmatprep.subr.mxu0 %v3478_v63  ;;  %v3862_v63 = vld [vmem:[#allocation13 + $0x428] sm:$0xff] }
 0x82a   : > { %3760 = vmatpush2.msra.mxu0 %v3477_v17  ;;  %v4085_v17 = vld [vmem:[#allocation13 + $0x670] sm:$0xff] }
 0x82b   : > { %3761 = vmatprep.subr.mxu0 %v3476_v2  ;;  %v3861_v2 = vld [vmem:[#allocation13 + $0x420] sm:$0xff] }
 0x82c   : > { %3762 = vmatpush2.msra.mxu0 %v3475_v22  ;;  %v4084_v22 = vld [vmem:[#allocation13 + $0x668] sm:$0xff] }
 0x82d   : > { %3763 = vmatprep.subr.mxu0 %v3474_v46  ;;  %v3860_v46 = vld [vmem:[#allocation13 + $0x418] sm:$0xff] }
 0x82e   : > { %3764 = vmatpush2.msra.mxu0 %v3473_v18  ;;  %v4083_v18 = vld [vmem:[#allocation13 + $0x660] sm:$0xff] }
 0x82f   : > { %3765 = vmatprep.subr.mxu0 %v3472_v29  ;;  %v3859_v29 = vld [vmem:[#allocation13 + $0x410] sm:$0xff] }
 0x830   : > { %3766 = vmatpush2.msra.mxu0 %v3471_v19  ;;  %v4082_v19 = vld [vmem:[#allocation13 + $0x658] sm:$0xff] }
 0x831   : > { %3767 = vmatprep.subr.mxu0 %v3470_v20  ;;  %v3858_v20 = vld [vmem:[#allocation13 + $0x408] sm:$0xff] }
 0x832   : > { %3768 = vmatpush2.msra.mxu0 %v3469_v30  ;;  %v4081_v30 = vld [vmem:[#allocation13 + $0x650] sm:$0xff] }
 0x833   : > { %3769 = vmatprep.subr.mxu0 %v3468_v49  ;;  %v3857_v49 = vld [vmem:[#allocation13 + $0x400] sm:$0xff] }
 0x834   : > { %3770 = vmatpush2.msra.mxu0 %v3467_v59  ;;  %v4080_v59 = vld [vmem:[#allocation13 + $0x648] sm:$0xff] }
 0x835   : > { %3771 = vmatprep.subr.mxu0 %v3466_v31  ;;  %v3920_v31 = vld [vmem:[#allocation13 + $0x5f8] sm:$0xff] }
 0x836   : > { %3772 = vmatpush2.msra.mxu0 %v3465_v33  ;;  %v4079_v33 = vld [vmem:[#allocation13 + $0x640] sm:$0xff] }
 0x837   : > { %3921 = vmatprep.subr.mxu0 %v3888_v55  ;;  %v3919_v55 = vld [vmem:[#allocation13 + $0x5f0] sm:$0xff] }
 0x8b3   : > { %v3428_v60 = vpop.f32.mrf.mxu0 }
 0x8b5   : > { %v3430_v36 = vpop.f32.mrf.mxu0 }
 0x8b6   : > { %3773 = vmatprep.mubr.f32.mxu0 %v3430_v36  ;;  %v3918_v36 = vld [vmem:[#allocation13 + $0x5e8] sm:$0xff] }
 0x8b7   : > { %v3568_v32 = vpop.f32.mrf.mxu0  ;;  %3774 = vmatmul.mubr.f32.vlgmr.msra.gmra.mxu0 %v3428_v60  ;;  %v4078_v60 = vld [vmem:[#allocation13 + $0x638] sm:$0xff] }
 0x8b8   : > { %3922 = vmatpush1.msra.mxu0 %v3887_v14  ;;  %v4077_v14 = vld [vmem:[#allocation13 + $0x630] sm:$0xff] }
 0x8b9   : > { %v3570_v38 = vpop.f32.mrf.mxu0  ;;  %3923 = vmatprep.subr.mxu0 %v3886_v37  ;;  %v3917_v37 = vld [vmem:[#allocation13 + $0x5e0] sm:$0xff] }
 0x8ba   : > { %3702 = vmatprep.mubr.f32.mxu1 %v3570_v38  ;;  %3924 = vmatpush1.msra.mxu0 %v3885_v35  ;;  %v3916_v35 = vld [vmem:[#allocation13 + $0x5d8] sm:$0xff]  ;;  %v3915_v38 = vld [vmem:[#allocation13 + $0x5d0] sm:$0xff] }
 0x8bb   : > { %3703 = vmatmul.mubr.f32.vlgmr.msra.gmra.mxu1 %v3568_v32  ;;  %3925 = vmatprep.subr.mxu0 %v3884_v34  ;;  %v4076_v32 = vld [vmem:[#allocation13 + $0x628] sm:$0xff]  ;;  %v4075_v34 = vld [vmem:[#allocation13 + $0x620] sm:$0xff] }
 0x8bc   : > { %3816 = vmatpush1.msra.mxu1 %v7257_v45  ;;  %3849 = vmatprep.mubr.f32.mxu1 %v6049_v0 }
 0x8bd   : > { %4029 = vmatprep.subr.mxu1 %v7255_v21  ;;  %3926 = vmatpush1.msra.mxu0 %v3883_v39  ;;  %v3876_v21 = vld [vmem:[#allocation13 + $0x498] sm:$0xff] }
 0x8be   : > { %3927 = vmatprep.subr.mxu0 %v3882_v40  ;;  %v4074_v39 = vld [vmem:[#allocation13 + $0x618] sm:$0xff]  ;;  %v3914_v40 = vld [vmem:[#allocation13 + $0x5c8] sm:$0xff] }
 0x8bf   : > { %5371 = vmatmul.mubr.msk.f32.vlgmr.msra.gmra.mxu1 %vm3358_vm3, %v3781_v41  ;;  %3928 = vmatpush1.msra.mxu0 %v3881_v42  ;;  %v4073_v41 = vld [vmem:[#allocation13 + $0x610] sm:$0xff]  ;;  %v3913_v42 = vld [vmem:[#allocation13 + $0x5c0] sm:$0xff] }
 0x8c0   : > { %4030 = vmatpush1.msra.mxu1 %v7257_v45  ;;  %4063 = vmatprep.mubr.f32.mxu1 %v6049_v0  ;;  %v3874_v45 = vld [vmem:[#allocation13 + $0x488] sm:$0xff] }
 0x8c1   : > { %4135 = vmatprep.subr.mxu1 %v4102_v43  ;;  %3929 = vmatprep.subr.mxu0 %v3880_v44  ;;  %v4072_v43 = vld [vmem:[#allocation13 + $0x608] sm:$0xff]  ;;  %v3912_v44 = vld [vmem:[#allocation13 + $0x5b8] sm:$0xff] }
 0x8c2   : > { %3930 = vmatpush1.msra.mxu0 %v3879_v50  ;;  %v4071_v50 = vld [vmem:[#allocation13 + $0x600] sm:$0xff] }
 0x8c3   : > { %5372 = vmatmul.mubr.msk.f32.vlgmr.msra.gmra.mxu1 %vm3358_vm3, %v3995_v51  ;;  %3931 = vmatprep.subr.mxu0 %v3878_v3  ;;  %v3911_v51 = vld [vmem:[#allocation13 + $0x5b0] sm:$0xff]  ;;  %v4134_v3 = vld [vmem:[#allocation13 + $0x7f8] sm:$0xff] }
 0x8c4   : > { %4136 = vmatpush1.msra.mxu1 %v4101_v4  ;;  %3932 = vmatpush1.msra.mxu0 %v3877_v5  ;;  %v3910_v4 = vld [vmem:[#allocation13 + $0x5a8] sm:$0xff]  ;;  %v4133_v5 = vld [vmem:[#allocation13 + $0x7f0] sm:$0xff] }
 0x8c5   : > { %4137 = vmatprep.subr.mxu1 %v4100_v7  ;;  %3933 = vmatprep.subr.mxu0 %v3876_v21  ;;  %v3909_v7 = vld [vmem:[#allocation13 + $0x5a0] sm:$0xff]  ;;  %v4132_v21 = vld [vmem:[#allocation13 + $0x7e8] sm:$0xff] }
 0x8c6   : > { %4138 = vmatpush1.msra.mxu1 %v4099_v8  ;;  %3934 = vmatpush1.msra.mxu0 %v3875_v9  ;;  %v3908_v8 = vld [vmem:[#allocation13 + $0x598] sm:$0xff]  ;;  %v4131_v9 = vld [vmem:[#allocation13 + $0x7e0] sm:$0xff] }
 0x8c7   : > { %4139 = vmatprep.subr.mxu1 %v4098_v10  ;;  %3935 = vmatprep.subr.mxu0 %v3874_v45  ;;  %v3907_v10 = vld [vmem:[#allocation13 + $0x590] sm:$0xff]  ;;  %v4130_v45 = vld [vmem:[#allocation13 + $0x7d8] sm:$0xff] }
 0x8c8   : > { %4140 = vmatpush1.msra.mxu1 %v4097_v12  ;;  %3936 = vmatpush1.msra.mxu0 %v3873_v13  ;;  %v3906_v12 = vld [vmem:[#allocation13 + $0x588] sm:$0xff]  ;;  %v4129_v13 = vld [vmem:[#allocation13 + $0x7d0] sm:$0xff] }
 0x8c9   : > { %4141 = vmatprep.subr.mxu1 %v4096_v15  ;;  %3937 = vmatprep.subr.mxu0 %v3872_v16  ;;  %v3905_v15 = vld [vmem:[#allocation13 + $0x580] sm:$0xff]  ;;  %v4128_v16 = vld [vmem:[#allocation13 + $0x7c8] sm:$0xff] }
 0x8ca   : > { %4142 = vmatpush1.msra.mxu1 %v4095_v27  ;;  %3938 = vmatpush1.msra.mxu0 %v3871_v6  ;;  %v3904_v27 = vld [vmem:[#allocation13 + $0x578] sm:$0xff]  ;;  %v4127_v6 = vld [vmem:[#allocation13 + $0x7c0] sm:$0xff] }
 0x8cb   : > { %4143 = vmatprep.subr.mxu1 %v4094_v56  ;;  %3939 = vmatprep.subr.mxu0 %v3870_v57  ;;  %v3903_v56 = vld [vmem:[#allocation13 + $0x570] sm:$0xff]  ;;  %v4126_v57 = vld [vmem:[#allocation13 + $0x7b8] sm:$0xff] }
 0x8cc   : > { %4144 = vmatpush1.msra.mxu1 %v4093_v26  ;;  %3940 = vmatpush1.msra.mxu0 %v3869_v28  ;;  %v3902_v26 = vld [vmem:[#allocation13 + $0x568] sm:$0xff]  ;;  %v4125_v28 = vld [vmem:[#allocation13 + $0x7b0] sm:$0xff] }
 0x8cd   : > { %4145 = vmatprep.subr.mxu1 %v4092_v1  ;;  %3941 = vmatprep.subr.mxu0 %v3868_v11  ;;  %v3901_v1 = vld [vmem:[#allocation13 + $0x560] sm:$0xff]  ;;  %v4124_v11 = vld [vmem:[#allocation13 + $0x7a8] sm:$0xff] }
 0x8ce   : > { %4146 = vmatpush1.msra.mxu1 %v4091_v58  ;;  %3942 = vmatpush1.msra.mxu0 %v3867_v25  ;;  %v3900_v58 = vld [vmem:[#allocation13 + $0x558] sm:$0xff]  ;;  %v4123_v25 = vld [vmem:[#allocation13 + $0x7a0] sm:$0xff] }
 0x8cf   : > { %4147 = vmatprep.subr.mxu1 %v4090_v61  ;;  %3943 = vmatprep.subr.mxu0 %v3866_v24  ;;  %v4122_v61 = vld [vmem:[#allocation13 + $0x798] sm:$0xff]  ;;  %v4121_v24 = vld [vmem:[#allocation13 + $0x790] sm:$0xff] }
 0x8d0   : > { %4148 = vmatpush1.msra.mxu1 %v4089_v48  ;;  %3944 = vmatpush1.msra.mxu0 %v3865_v62  ;;  %v4120_v48 = vld [vmem:[#allocation13 + $0x788] sm:$0xff]  ;;  %v4119_v62 = vld [vmem:[#allocation13 + $0x780] sm:$0xff] }
 0x8d1   : > { %4149 = vmatprep.subr.mxu1 %v4088_v52  ;;  %3945 = vmatprep.subr.mxu0 %v3864_v23  ;;  %v4118_v52 = vld [vmem:[#allocation13 + $0x778] sm:$0xff]  ;;  %v3899_v23 = vld [vmem:[#allocation13 + $0x550] sm:$0xff] }
 0x8d2   : > { %4150 = vmatpush1.msra.mxu1 %v4087_v53  ;;  %3946 = vmatpush1.msra.mxu0 %v3863_v47  ;;  %v4117_v53 = vld [vmem:[#allocation13 + $0x770] sm:$0xff]  ;;  %v3898_v47 = vld [vmem:[#allocation13 + $0x548] sm:$0xff] }
 0x8d3   : > { %4151 = vmatprep.subr.mxu1 %v4086_v54  ;;  %3947 = vmatprep.subr.mxu0 %v3862_v63  ;;  %v4116_v54 = vld [vmem:[#allocation13 + $0x768] sm:$0xff]  ;;  %v3897_v63 = vld [vmem:[#allocation13 + $0x540] sm:$0xff] }
 0x8d4   : > { %4152 = vmatpush1.msra.mxu1 %v4085_v17  ;;  %3948 = vmatpush1.msra.mxu0 %v3861_v2  ;;  %v4115_v17 = vld [vmem:[#allocation13 + $0x760] sm:$0xff]  ;;  %v3896_v2 = vld [vmem:[#allocation13 + $0x538] sm:$0xff] }
 0x8d5   : > { %4153 = vmatprep.subr.mxu1 %v4084_v22  ;;  %3949 = vmatprep.subr.mxu0 %v3860_v46  ;;  %v4114_v22 = vld [vmem:[#allocation13 + $0x758] sm:$0xff]  ;;  %v3895_v46 = vld [vmem:[#allocation13 + $0x530] sm:$0xff] }
 0x8d6   : > { %4154 = vmatpush1.msra.mxu1 %v4083_v18  ;;  %3950 = vmatpush1.msra.mxu0 %v3859_v29  ;;  %v4113_v18 = vld [vmem:[#allocation13 + $0x750] sm:$0xff]  ;;  %v3894_v29 = vld [vmem:[#allocation13 + $0x528] sm:$0xff] }
 0x8d7   : > { %4155 = vmatprep.subr.mxu1 %v4082_v19  ;;  %3951 = vmatprep.subr.mxu0 %v3858_v20  ;;  %v4112_v19 = vld [vmem:[#allocation13 + $0x748] sm:$0xff]  ;;  %v3893_v20 = vld [vmem:[#allocation13 + $0x520] sm:$0xff] }
 0x8d8   : > { %4156 = vmatpush1.msra.mxu1 %v4081_v30  ;;  %3952 = vmatpush1.msra.mxu0 %v3857_v49  ;;  %v4111_v30 = vld [vmem:[#allocation13 + $0x740] sm:$0xff]  ;;  %v3892_v49 = vld [vmem:[#allocation13 + $0x518] sm:$0xff] }
 0x8d9   : > { %4157 = vmatprep.subr.mxu1 %v4080_v59  ;;  %3953 = vmatprep.subr.mxu0 %v3920_v31  ;;  %v4110_v59 = vld [vmem:[#allocation13 + $0x738] sm:$0xff]  ;;  %v3891_v31 = vld [vmem:[#allocation13 + $0x510] sm:$0xff] }
 0x8da   : > { %4158 = vmatpush1.msra.mxu1 %v4079_v33  ;;  %3954 = vmatpush2.msra.mxu0 %v3919_v55  ;;  %v4109_v33 = vld [vmem:[#allocation13 + $0x730] sm:$0xff]  ;;  %v3890_v55 = vld [vmem:[#allocation13 + $0x508] sm:$0xff] }
 0x8db   : > { %4159 = vmatprep.subr.mxu1 %v4078_v60  ;;  %3955 = vmatprep.subr.mxu0 %v3918_v36  ;;  %v4108_v60 = vld [vmem:[#allocation13 + $0x728] sm:$0xff]  ;;  %v3889_v36 = vld [vmem:[#allocation13 + $0x500] sm:$0xff] }
 0x8dc   : > { %4160 = vmatpush1.msra.mxu1 %v4077_v14  ;;  %3956 = vmatpush2.msra.mxu0 %v3917_v37  ;;  %v4107_v14 = vld [vmem:[#allocation13 + $0x720] sm:$0xff]  ;;  %v4106_v37 = vld [vmem:[#allocation13 + $0x718] sm:$0xff] }
 0x8dd   : > { %4161 = vmatprep.subr.mxu1 %v4076_v32  ;;  %3957 = vmatprep.subr.mxu0 %v3916_v35  ;;  %v4105_v32 = vld [vmem:[#allocation13 + $0x710] sm:$0xff]  ;;  %v4104_v35 = vld [vmem:[#allocation13 + $0x708] sm:$0xff] }
 0x8de   : > { %4162 = vmatpush1.msra.mxu1 %v4075_v34  ;;  %3958 = vmatpush2.msra.mxu0 %v3915_v38  ;;  %v4103_v34 = vld [vmem:[#allocation13 + $0x700] sm:$0xff]  ;;  %v5411_v38 = vld [vmem:[%s7790_s10 + $0x1f8] sm:$0xff] }
 0x8df   : > { %4163 = vmatprep.subr.mxu1 %v4074_v39  ;;  %3959 = vmatprep.subr.mxu0 %v3914_v40 }
 0x8e0   : > { %4164 = vmatpush1.msra.mxu1 %v4073_v41  ;;  %3960 = vmatpush2.msra.mxu0 %v3913_v42 }
 0x8e1   : > { %4165 = vmatprep.subr.mxu1 %v4072_v43  ;;  %3961 = vmatprep.subr.mxu0 %v3912_v44 }
 0x8e2   : > { %4166 = vmatpush1.msra.mxu1 %v4071_v50  ;;  %3962 = vmatpush2.msra.mxu0 %v3911_v51  ;;  %v5395_v50 = vld [vmem:[%s7790_s10 + $0x178] sm:$0xff]  ;;  %v5410_v51 = vld [vmem:[%s7790_s10 + $0x1f0] sm:$0xff] }
 0x8e3   : > { %4167 = vmatprep.subr.mxu1 %v4134_v3  ;;  %3963 = vmatprep.subr.mxu0 %v3910_v4  ;;  %v5394_v3 = vld [vmem:[%s7790_s10 + $0x170] sm:$0xff]  ;;  %v5409_v4 = vld [vmem:[%s7790_s10 + $0x1e8] sm:$0xff] }
 0x8e4   : > { %4168 = vmatpush2.msra.mxu1 %v4133_v5  ;;  %3964 = vmatpush2.msra.mxu0 %v3909_v7  ;;  %v5393_v5 = vld [vmem:[%s7790_s10 + $0x168] sm:$0xff]  ;;  %v5408_v7 = vld [vmem:[%s7790_s10 + $0x1e0] sm:$0xff] }
 0x8e5   : > { %4169 = vmatprep.subr.mxu1 %v4132_v21  ;;  %3965 = vmatprep.subr.mxu0 %v3908_v8  ;;  %v5392_v21 = vld [vmem:[%s7790_s10 + $0x160] sm:$0xff]  ;;  %v5407_v8 = vld [vmem:[%s7790_s10 + $0x1d8] sm:$0xff] }
 0x8e6   : > { %4170 = vmatpush2.msra.mxu1 %v4131_v9  ;;  %3966 = vmatpush2.msra.mxu0 %v3907_v10  ;;  %v5391_v9 = vld [vmem:[%s7790_s10 + $0x158] sm:$0xff]  ;;  %v5406_v10 = vld [vmem:[%s7790_s10 + $0x1d0] sm:$0xff] }
 0x8e7   : > { %4171 = vmatprep.subr.mxu1 %v4130_v45  ;;  %3967 = vmatprep.subr.mxu0 %v3906_v12  ;;  %v5390_v45 = vld [vmem:[%s7790_s10 + $0x150] sm:$0xff]  ;;  %v5405_v12 = vld [vmem:[%s7790_s10 + $0x1c8] sm:$0xff] }
 0x8e8   : > { %4172 = vmatpush2.msra.mxu1 %v4129_v13  ;;  %3968 = vmatpush2.msra.mxu0 %v3905_v15  ;;  %v5389_v13 = vld [vmem:[%s7790_s10 + $0x148] sm:$0xff]  ;;  %v5404_v15 = vld [vmem:[%s7790_s10 + $0x1c0] sm:$0xff] }
 0x8e9   : > { %4173 = vmatprep.subr.mxu1 %v4128_v16  ;;  %3969 = vmatprep.subr.mxu0 %v3904_v27  ;;  %v5388_v16 = vld [vmem:[%s7790_s10 + $0x140] sm:$0xff]  ;;  %v5403_v27 = vld [vmem:[%s7790_s10 + $0x1b8] sm:$0xff] }
 0x8ea   : > { %4174 = vmatpush2.msra.mxu1 %v4127_v6  ;;  %3970 = vmatpush2.msra.mxu0 %v3903_v56  ;;  %v5387_v6 = vld [vmem:[%s7790_s10 + $0x138] sm:$0xff]  ;;  %v5402_v56 = vld [vmem:[%s7790_s10 + $0x1b0] sm:$0xff] }
 0x8eb   : > { %4175 = vmatprep.subr.mxu1 %v4126_v57  ;;  %3971 = vmatprep.subr.mxu0 %v3902_v26  ;;  %v5386_v57 = vld [vmem:[%s7790_s10 + $0x130] sm:$0xff]  ;;  %v5401_v26 = vld [vmem:[%s7790_s10 + $0x1a8] sm:$0xff] }
 0x8ec   : > { %4176 = vmatpush2.msra.mxu1 %v4125_v28  ;;  %3972 = vmatpush2.msra.mxu0 %v3901_v1  ;;  %v5385_v28 = vld [vmem:[%s7790_s10 + $0x128] sm:$0xff]  ;;  %v5400_v1 = vld [vmem:[%s7790_s10 + $0x1a0] sm:$0xff] }
 0x8ed   : > { %4177 = vmatprep.subr.mxu1 %v4124_v11  ;;  %3973 = vmatprep.subr.mxu0 %v3900_v58  ;;  %v5384_v11 = vld [vmem:[%s7790_s10 + $0x120] sm:$0xff]  ;;  %v5399_v58 = vld [vmem:[%s7790_s10 + $0x198] sm:$0xff] }
 0x8ee   : > { %4178 = vmatpush2.msra.mxu1 %v4123_v25  ;;  %3974 = vmatpush2.msra.mxu0 %v3899_v23  ;;  %v5383_v25 = vld [vmem:[%s7790_s10 + $0x118] sm:$0xff]  ;;  %v5380_v23 = vld [vmem:[%s7790_s10 + $0x100] sm:$0xff] }
 0x8ef   : > { %4179 = vmatprep.subr.mxu1 %v4122_v61  ;;  %3975 = vmatprep.subr.mxu0 %v3898_v47  ;;  %v5398_v61 = vld [vmem:[%s7790_s10 + $0x190] sm:$0xff] }
 0x8f0   : > { %4180 = vmatpush2.msra.mxu1 %v4121_v24  ;;  %3976 = vmatpush2.msra.mxu0 %v3897_v63  ;;  %v5382_v24 = vld [vmem:[%s7790_s10 + $0x110] sm:$0xff] }
 0x8f1   : > { %4181 = vmatprep.subr.mxu1 %v4120_v48  ;;  %3977 = vmatprep.subr.mxu0 %v3896_v2  ;;  %v5397_v48 = vld [vmem:[%s7790_s10 + $0x188] sm:$0xff] }
 0x8f2   : > { %4182 = vmatpush2.msra.mxu1 %v4119_v62  ;;  %3978 = vmatpush2.msra.mxu0 %v3895_v46  ;;  %v5381_v62 = vld [vmem:[%s7790_s10 + $0x108] sm:$0xff] }
 0x8f3   : > { %4183 = vmatprep.subr.mxu1 %v4118_v52  ;;  %3979 = vmatprep.subr.mxu0 %v3894_v29  ;;  %v5396_v52 = vld [vmem:[%s7790_s10 + $0x180] sm:$0xff] }
 0x8f4   : > { %4184 = vmatpush2.msra.mxu1 %v4117_v53  ;;  %3980 = vmatpush2.msra.mxu0 %v3893_v20 }
 0x8f5   : > { %4185 = vmatprep.subr.mxu1 %v4116_v54  ;;  %3981 = vmatprep.subr.mxu0 %v3892_v49 }
 0x8f6   : > { %4186 = vmatpush2.msra.mxu1 %v4115_v17  ;;  %3982 = vmatpush2.msra.mxu0 %v3891_v31  ;;  %v4324_v31 = vld [vmem:[%s7790_s10 + $0xf8] sm:$0xff] }
 0x8f7   : > { %4187 = vmatprep.subr.mxu1 %v4114_v22  ;;  %3983 = vmatprep.subr.mxu0 %v3890_v55  ;;  %v4308_v55 = vld [vmem:[%s7790_s10 + $0x78] sm:$0xff] }
 0x8f8   : > { %4188 = vmatpush2.msra.mxu1 %v4113_v18  ;;  %3984 = vmatpush2.msra.mxu0 %v3889_v36  ;;  %v4307_v36 = vld [vmem:[%s7790_s10 + $0x70] sm:$0xff] }
 0x8f9   : > { %4189 = vmatprep.subr.mxu1 %v4112_v19 }
 0x8fa   : > { %4190 = vmatpush2.msra.mxu1 %v4111_v30 }
 0x8fb   : > { %4191 = vmatprep.subr.mxu1 %v4110_v59  ;;  %v4210_v59 = vld [vmem:[%s7789_s9] sm:$0x1] }
 0x8fc   : > { %4192 = vmatpush2.msra.mxu1 %v4109_v33  ;;  %v5376_v33 = vld [vmem:[%s7789_s9 + $0x1] sm:$0x1] }
 0x8fd   : > { %4193 = vmatprep.subr.mxu1 %v4108_v60  ;;  %v4323_v60 = vld [vmem:[%s7790_s10 + $0xf0] sm:$0xff] }
 0x8fe   : > { %4194 = vmatpush2.msra.mxu1 %v4107_v14  ;;  %v4322_v14 = vld [vmem:[%s7790_s10 + $0xe8] sm:$0xff] }
 0x8ff   : > { %4195 = vmatprep.subr.mxu1 %v4106_v37  ;;  %v4306_v37 = vld [vmem:[%s7790_s10 + $0x68] sm:$0xff] }
 0x900   : > { %4196 = vmatpush2.msra.mxu1 %v4105_v32  ;;  %v4321_v32 = vld [vmem:[%s7790_s10 + $0xe0] sm:$0xff] }
 0x901   : > { %4197 = vmatprep.subr.mxu1 %v4104_v35  ;;  %v4305_v35 = vld [vmem:[%s7790_s10 + $0x60] sm:$0xff] }
 0x902   : > { %4198 = vmatpush2.msra.mxu1 %v4103_v34  ;;  %v4320_v34 = vld [vmem:[%s7790_s10 + $0xd8] sm:$0xff] }
 0x903   : > { %5489 = vmatprep.subr.mxu1 %v5411_v38  ;;  %v4304_v38 = vld [vmem:[%s7790_s10 + $0x58] sm:$0xff] }
 0x977   : > { %v3775_v53 = vpop.f32.mrf.mxu0 }
 0x979   : > { %v3777_v47 = vpop.f32.mrf.mxu0 }
 0x97b   : > { %v7277_v39 = vpop.f32.mrf.mxu1 }
 0x97c   : > { %v3776_v63 = vadd.f32 %v3775_v53, %v7277_v39  ;;  %v4319_v39 = vld [vmem:[%s7790_s10 + $0xd0] sm:$0xff]  ;;  %v5427_v53 = vld [vmem:[%s7790_s10 + $0x258] sm:$0xff] }
 0x97d   : > { %v7279_v40 = vpop.f32.mrf.mxu1 }
 0x97e   : > { %v3778_v2 = vadd.f32 %v3777_v47, %v7279_v40  ;;  %v4303_v40 = vld [vmem:[%s7790_s10 + $0x50] sm:$0xff]  ;;  %v5448_v47 = vld [vmem:[%s7789_s9 + $0x3] sm:$0x1] }
 0x97f   : > { %v3851_v41 = vpop.f32.mrf.mxu1 }
 0x981   : > { %v3853_v42 = vpop.f32.mrf.mxu1 }
 0x982   : > { %3985 = vmatprep.mubr.f32.mxu0 %v3853_v42  ;;  %v4302_v42 = vld [vmem:[%s7790_s10 + $0x48] sm:$0xff] }
 0x983   : > { %3986 = vmatmul.mubr.f32.vlgmr.msra.gmra.mxu0 %v3851_v41  ;;  %v4065_v43 = vpop.f32.mrf.mxu1  ;;  %v4318_v41 = vld [vmem:[%s7790_s10 + $0xc8] sm:$0xff] }
 0x984   : > { %4286 = vmatprep.mubr.f32.mxu0 %v6049_v0 }
 0x985   : > { %v4067_v44 = vpop.f32.mrf.mxu1 }
 0x986   : > { %4199 = vmatprep.mubr.f32.mxu1 %v4067_v44  ;;  %v4301_v44 = vld [vmem:[%s7790_s10 + $0x40] sm:$0xff] }
 0x987   : > { %4200 = vmatmul.mubr.f32.vlgmr.msra.gmra.mxu1 %v4065_v43  ;;  %v4317_v43 = vld [vmem:[%s7790_s10 + $0xc0] sm:$0xff] }
 0x988   : > { %5490 = vmatpush3.msra.mxu1 %v5395_v50  ;;  %v4316_v50 = vld [vmem:[%s7790_s10 + $0xb8] sm:$0xff] }
 0x989   : > { %5491 = vmatprep.subr.mxu1 %v5410_v51  ;;  %v4300_v51 = vld [vmem:[%s7790_s10 + $0x38] sm:$0xff] }
 0x98a   : > { %5492 = vmatpush3.msra.mxu1 %v5394_v3  ;;  %v4315_v3 = vld [vmem:[%s7790_s10 + $0xb0] sm:$0xff] }
 0x98b   : > { %5493 = vmatprep.subr.mxu1 %v5409_v4  ;;  %v4299_v4 = vld [vmem:[%s7790_s10 + $0x30] sm:$0xff] }
 0x98c   : > { %5494 = vmatpush3.msra.mxu1 %v5393_v5  ;;  %v4314_v5 = vld [vmem:[%s7790_s10 + $0xa8] sm:$0xff] }
 0x98d   : > { %5495 = vmatprep.subr.mxu1 %v5408_v7  ;;  %v4298_v7 = vld [vmem:[%s7790_s10 + $0x28] sm:$0xff] }
 0x98e   : > { %5496 = vmatpush3.msra.mxu1 %v5392_v21  ;;  %v4313_v21 = vld [vmem:[%s7790_s10 + $0xa0] sm:$0xff] }
 0x98f   : > { %5497 = vmatprep.subr.mxu1 %v5407_v8  ;;  %v4297_v8 = vld [vmem:[%s7790_s10 + $0x20] sm:$0xff] }
 0x990   : > { %5498 = vmatpush3.msra.mxu1 %v5391_v9  ;;  %v4312_v9 = vld [vmem:[%s7790_s10 + $0x98] sm:$0xff] }
 0x991   : > { %5499 = vmatprep.subr.mxu1 %v5406_v10  ;;  %v4296_v10 = vld [vmem:[%s7790_s10 + $0x18] sm:$0xff] }
 0x992   : > { %5500 = vmatpush3.msra.mxu1 %v5390_v45  ;;  %v4311_v45 = vld [vmem:[%s7790_s10 + $0x90] sm:$0xff] }
 0x993   : > { %5501 = vmatprep.subr.mxu1 %v5405_v12  ;;  %v4295_v12 = vld [vmem:[%s7790_s10 + $0x10] sm:$0xff] }
 0x994   : > { %5502 = vmatpush3.msra.mxu1 %v5389_v13  ;;  %v4310_v13 = vld [vmem:[%s7790_s10 + $0x88] sm:$0xff] }
 0x995   : > { %5503 = vmatprep.subr.mxu1 %v5404_v15  ;;  %v4294_v15 = vld [vmem:[%s7790_s10 + $0x8] sm:$0xff] }
 0x996   : > { %5504 = vmatpush3.msra.mxu1 %v5388_v16  ;;  %v4309_v16 = vld [vmem:[%s7790_s10 + $0x80] sm:$0xff] }
 0x997   : > { %5505 = vmatprep.subr.mxu1 %v5403_v27  ;;  %v4293_v27 = vld [vmem:[%s7790_s10] sm:$0xff] }
 0x998   : > { %5506 = vmatpush3.msra.mxu1 %v5387_v6  ;;  %v5447_v6 = vld [vmem:[%s7790_s10 + $0x2f8] sm:$0xff] }
 0x999   : > { %5507 = vmatprep.subr.mxu1 %v5402_v56 }
 0x99a   : > { %5508 = vmatpush3.msra.mxu1 %v5386_v57 }
 0x99b   : > { %5509 = vmatprep.subr.mxu1 %v5401_v26  ;;  %v5431_v26 = vld [vmem:[%s7790_s10 + $0x278] sm:$0xff] }
 0x99c   : > { %5510 = vmatpush3.msra.mxu1 %v5385_v28  ;;  %v5446_v28 = vld [vmem:[%s7790_s10 + $0x2f0] sm:$0xff] }
 0x99d   : > { %5511 = vmatprep.subr.mxu1 %v5400_v1 }
 0x99e   : > { %5512 = vmatpush3.msra.mxu1 %v5384_v11  ;;  %v5430_v11 = vld [vmem:[%s7790_s10 + $0x270] sm:$0xff] }
 0x99f   : > { %5513 = vmatprep.subr.mxu1 %v5399_v58  ;;  %v5445_v58 = vld [vmem:[%s7790_s10 + $0x2e8] sm:$0xff] }
 0x9a0   : > { %5514 = vmatpush3.msra.mxu1 %v5383_v25 }
 0x9a1   : > { %5515 = vmatprep.subr.mxu1 %v5398_v61  ;;  %v5429_v61 = vld [vmem:[%s7790_s10 + $0x268] sm:$0xff] }
 0x9a2   : > { %5516 = vmatpush3.msra.mxu1 %v5382_v24  ;;  %v5444_v24 = vld [vmem:[%s7790_s10 + $0x2e0] sm:$0xff] }
 0x9a3   : > { %5517 = vmatprep.subr.mxu1 %v5397_v48  ;;  %v5412_v48 = vld [vmem:[%s7789_s9 + $0x2] sm:$0x1] }
 0x9a4   : > { %5518 = vmatpush3.msra.mxu1 %v5381_v62  ;;  %v5428_v62 = vld [vmem:[%s7790_s10 + $0x260] sm:$0xff] }
 0x9a5   : > { %5519 = vmatprep.subr.mxu1 %v5396_v52  ;;  %v5483_v52 = vld [vmem:[%s7790_s10 + $0x3f8] sm:$0xff] }
 0x9a6   : > { %5520 = vmatpush3.msra.mxu1 %v5380_v23  ;;  %v5443_v23 = vld [vmem:[%s7790_s10 + $0x2d8] sm:$0xff] }
 0xa43   : > { %v3987_v54 = vpop.f32.mrf.mxu0 }
 0xa44   : > { %v3992_v22 = vadd.f32 %v3987_v54, %v3776_v63  ;;  %v5442_v54 = vld [vmem:[%s7790_s10 + $0x2d0] sm:$0xff]  ;;  %v5467_v63 = vld [vmem:[%s7790_s10 + $0x378] sm:$0xff] }
 0xa45   : > { %v3989_v17 = vpop.f32.mrf.mxu0 }
 0xa46   : > { %v3993_v18 = vadd.f32 %v3989_v17, %v3778_v2  ;;  %v5426_v17 = vld [vmem:[%s7790_s10 + $0x250] sm:$0xff] }
 0xa47   : > { %v4201_v46 = vpop.f32.mrf.mxu1  ;;  %v5482_v2 = vld [vmem:[%s7790_s10 + $0x3f0] sm:$0xff] }
 0xa48   : > { %v4206_v29 = vadd.f32 %v4201_v46, %v3992_v22  ;;  %v5441_v22 = vld [vmem:[%s7790_s10 + $0x2c8] sm:$0xff]  ;;  %v5466_v46 = vld [vmem:[%s7790_s10 + $0x370] sm:$0xff] }
 0xa49   : > { %v4203_v19 = vpop.f32.mrf.mxu1 }
 0xa4a   : > { %v4207_v20 = vadd.f32 %v4203_v19, %v3993_v18  ;;  %v7379_v49 = vmax.f32 %v4206_v29, 0.0  ;;  %v5425_v18 = vld [vmem:[%s7790_s10 + $0x248] sm:$0xff]  ;;  %v5440_v19 = vld [vmem:[%s7790_s10 + $0x2c0] sm:$0xff] }
 0xa4b   : > { %v5481_v29 = vld [vmem:[%s7790_s10 + $0x3e8] sm:$0xff] }
 0xa4c   : > { %v7377_v30 = vmax.f32 %v4207_v20, 0.0  ;;  %v5465_v20 = vld [vmem:[%s7790_s10 + $0x368] sm:$0xff] }
 0xa4e   : > { %5373 = vmatprep.subr.msk.mxu0 %vm4215_vm4, %v7377_v30  ;;  %5413 = vmatprep.subr.msk.mxu1 %vm4215_vm4, %v7377_v30 }
 0xa4f   : > { %5374 = vmatpush1.msk.msra.mxu0 %vm4215_vm4, %v7379_v49 }
 0xa50   : > { %5375 = vmatmul.mubr.msk.f32.vlgmr.msra.gmra.mxu0 %vm4211_vm5, %v4210_v59  ;;  %5377 = vmatprep.subr.msk.mxu0 %vm4215_vm4, %v7377_v30  ;;  %v5439_v59 = vld [vmem:[%s7790_s10 + $0x2b8] sm:$0xff] }
 0xa51   : > { %5378 = vmatpush1.msk.msra.mxu0 %vm4215_vm4, %v7379_v49  ;;  %4394 = vmatprep.mubr.f32.mxu0 %v6049_v0 }
 0xa52   : > { %5524 = vmatprep.subr.mxu0 %v4324_v31  ;;  %v5464_v31 = vld [vmem:[%s7790_s10 + $0x360] sm:$0xff] }
 0xa54   : > { %5379 = vmatmul.mubr.msk.f32.vlgmr.msra.gmra.mxu0 %vm4211_vm5, %v5376_v33  ;;  %v5423_v33 = vld [vmem:[%s7790_s10 + $0x238] sm:$0xff] }
 0xa55   : > { %5525 = vmatpush3.msra.mxu0 %v4308_v55  ;;  %v5479_v55 = vld [vmem:[%s7790_s10 + $0x3d8] sm:$0xff] }
 0xa56   : > { %5526 = vmatprep.subr.mxu0 %v4323_v60  ;;  %v5438_v60 = vld [vmem:[%s7790_s10 + $0x2b0] sm:$0xff] }
 0xa57   : > { %5527 = vmatpush3.msra.mxu0 %v4307_v36  ;;  %v5463_v36 = vld [vmem:[%s7790_s10 + $0x358] sm:$0xff] }
 0xa58   : > { %5528 = vmatprep.subr.mxu0 %v4322_v14  ;;  %v5422_v14 = vld [vmem:[%s7790_s10 + $0x230] sm:$0xff] }
 0xa59   : > { %5529 = vmatpush3.msra.mxu0 %v4306_v37  ;;  %v5478_v37 = vld [vmem:[%s7790_s10 + $0x3d0] sm:$0xff] }
 0xa5a   : > { %5530 = vmatprep.subr.mxu0 %v4321_v32  ;;  %v5437_v32 = vld [vmem:[%s7790_s10 + $0x2a8] sm:$0xff] }
 0xa5b   : > { %5531 = vmatpush3.msra.mxu0 %v4305_v35  ;;  %v5462_v35 = vld [vmem:[%s7790_s10 + $0x350] sm:$0xff] }
 0xa5c   : > { %5532 = vmatprep.subr.mxu0 %v4320_v34  ;;  %v5421_v34 = vld [vmem:[%s7790_s10 + $0x228] sm:$0xff] }
 0xa5d   : > { %5533 = vmatpush3.msra.mxu0 %v4304_v38  ;;  %v5477_v38 = vld [vmem:[%s7790_s10 + $0x3c8] sm:$0xff] }
 0xa5e   : > { %5534 = vmatprep.subr.mxu0 %v4319_v39  ;;  %v5436_v39 = vld [vmem:[%s7790_s10 + $0x2a0] sm:$0xff] }
 0xa5f   : > { %5535 = vmatpush3.msra.mxu0 %v4303_v40  ;;  %v5461_v40 = vld [vmem:[%s7790_s10 + $0x348] sm:$0xff] }
 0xa60   : > { %5536 = vmatprep.subr.mxu0 %v4318_v41  ;;  %v5420_v41 = vld [vmem:[%s7790_s10 + $0x220] sm:$0xff] }
 0xa61   : > { %5537 = vmatpush3.msra.mxu0 %v4302_v42  ;;  %v5476_v42 = vld [vmem:[%s7790_s10 + $0x3c0] sm:$0xff] }
 0xa62   : > { %5538 = vmatprep.subr.mxu0 %v4317_v43  ;;  %v5460_v43 = vld [vmem:[%s7790_s10 + $0x340] sm:$0xff] }
 0xa63   : > { %5539 = vmatpush3.msra.mxu0 %v4301_v44  ;;  %v5475_v44 = vld [vmem:[%s7790_s10 + $0x3b8] sm:$0xff] }
 0xa64   : > { %5540 = vmatprep.subr.mxu0 %v4316_v50  ;;  %v5459_v50 = vld [vmem:[%s7790_s10 + $0x338] sm:$0xff] }
 0xa65   : > { %5541 = vmatpush3.msra.mxu0 %v4300_v51  ;;  %v5474_v51 = vld [vmem:[%s7790_s10 + $0x3b0] sm:$0xff] }
 0xa66   : > { %5542 = vmatprep.subr.mxu0 %v4315_v3  ;;  %v5458_v3 = vld [vmem:[%s7790_s10 + $0x330] sm:$0xff] }
 0xa67   : > { %5543 = vmatpush3.msra.mxu0 %v4299_v4  ;;  %v5435_v4 = vld [vmem:[%s7790_s10 + $0x298] sm:$0xff] }
 0xa68   : > { %5544 = vmatprep.subr.mxu0 %v4314_v5  ;;  %v5473_v5 = vld [vmem:[%s7790_s10 + $0x3a8] sm:$0xff] }
 0xa69   : > { %5545 = vmatpush3.msra.mxu0 %v4298_v7  ;;  %v5419_v7 = vld [vmem:[%s7790_s10 + $0x218] sm:$0xff] }
 0xa6a   : > { %5546 = vmatprep.subr.mxu0 %v4313_v21  ;;  %v5457_v21 = vld [vmem:[%s7790_s10 + $0x328] sm:$0xff] }
 0xa6b   : > { %5547 = vmatpush3.msra.mxu0 %v4297_v8  ;;  %v5434_v8 = vld [vmem:[%s7790_s10 + $0x290] sm:$0xff] }
 0xa6c   : > { %5548 = vmatprep.subr.mxu0 %v4312_v9  ;;  %v5472_v9 = vld [vmem:[%s7790_s10 + $0x3a0] sm:$0xff] }
 0xa6d   : > { %5549 = vmatpush3.msra.mxu0 %v4296_v10  ;;  %v5418_v10 = vld [vmem:[%s7790_s10 + $0x210] sm:$0xff] }
 0xa6e   : > { %5550 = vmatprep.subr.mxu0 %v4311_v45  ;;  %v5456_v45 = vld [vmem:[%s7790_s10 + $0x320] sm:$0xff] }
 0xa6f   : > { %5551 = vmatpush3.msra.mxu0 %v4295_v12  ;;  %v5433_v12 = vld [vmem:[%s7790_s10 + $0x288] sm:$0xff] }
 0xa70   : > { %5552 = vmatprep.subr.mxu0 %v4310_v13  ;;  %v5471_v13 = vld [vmem:[%s7790_s10 + $0x398] sm:$0xff] }
 0xa71   : > { %5553 = vmatpush3.msra.mxu0 %v4294_v15  ;;  %v5417_v15 = vld [vmem:[%s7790_s10 + $0x208] sm:$0xff] }
 0xa72   : > { %5554 = vmatprep.subr.mxu0 %v4309_v16  ;;  %v5455_v16 = vld [vmem:[%s7790_s10 + $0x318] sm:$0xff] }
 0xa73   : > { %5555 = vmatpush3.msra.mxu0 %v4293_v27  ;;  %v5432_v27 = vld [vmem:[%s7790_s10 + $0x280] sm:$0xff] }
 0xa74   : > { %5559 = vmatprep.subr.mxu0 %v5447_v6  ;;  %v5470_v6 = vld [vmem:[%s7790_s10 + $0x390] sm:$0xff] }
 0xb10   : > { %v4288_v56 = vpop.f32.mrf.mxu0 }
 0xb12   : > { %v4290_v57 = vpop.f32.mrf.mxu0 }
 0xb13   : > { %4568 = vmatprep.mubr.f32.mxu0 %v4290_v57  ;;  %v5454_v57 = vld [vmem:[%s7790_s10 + $0x310] sm:$0xff] }
 0xb14   : > { %v4396_v1 = vpop.f32.mrf.mxu0  ;;  %4569 = vmatmul.mubr.f32.vlgmr.msra.gmra.mxu0 %v4288_v56  ;;  %v5416_v56 = vld [vmem:[%s7790_s10 + $0x200] sm:$0xff] }
 0xb15   : > { %5560 = vmatpush3.msra.mxu0 %v5431_v26  ;;  %v5469_v26 = vld [vmem:[%s7790_s10 + $0x388] sm:$0xff] }
 0xb16   : > { %v4398_v25 = vpop.f32.mrf.mxu0  ;;  %5561 = vmatprep.subr.mxu0 %v5446_v28  ;;  %v5453_v28 = vld [vmem:[%s7790_s10 + $0x308] sm:$0xff] }
 0xb17   : > { %4498 = vmatprep.mubr.f32.mxu1 %v4398_v25  ;;  %5562 = vmatpush3.msra.mxu0 %v5430_v11  ;;  %v5452_v11 = vld [vmem:[%s7790_s10 + $0x300] sm:$0xff] }
 0xb18   : > { %4499 = vmatmul.mubr.f32.vlgmr.msra.gmra.mxu1 %v4396_v1  ;;  %5563 = vmatprep.subr.mxu0 %v5445_v58  ;;  %v5468_v1 = vld [vmem:[%s7790_s10 + $0x380] sm:$0xff] }
 0xb19   : > { %5414 = vmatpush1.msk.msra.mxu1 %vm4215_vm4, %v7379_v49  ;;  %4643 = vmatprep.mubr.f32.mxu1 %v6049_v0 }
 0xb1a   : > { %5449 = vmatprep.subr.msk.mxu1 %vm4215_vm4, %v7377_v30  ;;  %5564 = vmatpush3.msra.mxu0 %v5429_v61  ;;  %v5424_v30 = vld [vmem:[%s7790_s10 + $0x240] sm:$0xff] }
 0xb1b   : > { %5565 = vmatprep.subr.mxu0 %v5444_v24 }
 0xb1c   : > { %5415 = vmatmul.mubr.msk.f32.vlgmr.msra.gmra.mxu1 %vm4211_vm5, %v5412_v48  ;;  %5566 = vmatpush3.msra.mxu0 %v5428_v62  ;;  %v4942_v62 = vld [vmem:[%s7791_s11 + $0x38] sm:$0xff] }
 0xb1d   : > { %5450 = vmatpush1.msk.msra.mxu1 %vm4215_vm4, %v7379_v49  ;;  %4823 = vmatprep.mubr.f32.mxu1 %v6049_v0  ;;  %v5480_v49 = vld [vmem:[%s7790_s10 + $0x3e0] sm:$0xff] }
 0xb1e   : > { %5594 = vmatprep.subr.mxu1 %v5483_v52  ;;  %5567 = vmatprep.subr.mxu0 %v5443_v23 }
 0xb1f   : > { %5568 = vmatpush3.msra.mxu0 %v5427_v53  ;;  %v4941_v53 = vld [vmem:[%s7791_s11 + $0x30] sm:$0xff] }
 0xb20   : > { %5451 = vmatmul.mubr.msk.f32.vlgmr.msra.gmra.mxu1 %vm4211_vm5, %v5448_v47  ;;  %5569 = vmatprep.subr.mxu0 %v5442_v54  ;;  %v4940_v47 = vld [vmem:[%s7791_s11 + $0x28] sm:$0xff]  ;;  %v4939_v54 = vld [vmem:[%s7791_s11 + $0x20] sm:$0xff] }
 0xb21   : > { %5595 = vmatpush3.msra.mxu1 %v5467_v63  ;;  %5570 = vmatpush3.msra.mxu0 %v5426_v17  ;;  %v4938_v63 = vld [vmem:[%s7791_s11 + $0x18] sm:$0xff]  ;;  %v4937_v17 = vld [vmem:[%s7791_s11 + $0x10] sm:$0xff] }
 0xb22   : > { %5596 = vmatprep.subr.mxu1 %v5482_v2  ;;  %5571 = vmatprep.subr.mxu0 %v5441_v22  ;;  %v4936_v2 = vld [vmem:[%s7791_s11 + $0x8] sm:$0xff]  ;;  %v4935_v22 = vld [vmem:[%s7791_s11] sm:$0xff] }
 0xb23   : > { %5597 = vmatpush3.msra.mxu1 %v5466_v46  ;;  %5572 = vmatpush3.msra.mxu0 %v5425_v18 }
 0xb24   : > { %5598 = vmatprep.subr.mxu1 %v5481_v29  ;;  %5573 = vmatprep.subr.mxu0 %v5440_v19 }
 0xb25   : > { %5599 = vmatpush3.msra.mxu1 %v5465_v20  ;;  %5574 = vmatpush3.msra.mxu0 %v5424_v30 }
 0xb26   : > { %5600 = vmatprep.subr.mxu1 %v5480_v49  ;;  %5575 = vmatprep.subr.mxu0 %v5439_v59 }
 0xb27   : > { %5601 = vmatpush3.msra.mxu1 %v5464_v31  ;;  %5576 = vmatpush3.msra.mxu0 %v5423_v33 }
 0xb28   : > { %5602 = vmatprep.subr.mxu1 %v5479_v55  ;;  %5577 = vmatprep.subr.mxu0 %v5438_v60 }
 0xb29   : > { %5603 = vmatpush3.msra.mxu1 %v5463_v36  ;;  %5578 = vmatpush3.msra.mxu0 %v5422_v14 }
 0xb2a   : > { %5604 = vmatprep.subr.mxu1 %v5478_v37  ;;  %5579 = vmatprep.subr.mxu0 %v5437_v32 }
 0xb2b   : > { %5605 = vmatpush3.msra.mxu1 %v5462_v35  ;;  %5580 = vmatpush3.msra.mxu0 %v5421_v34 }
 0xb2c   : > { %5606 = vmatprep.subr.mxu1 %v5477_v38  ;;  %5581 = vmatprep.subr.mxu0 %v5436_v39 }
 0xb2d   : > { %5607 = vmatpush3.msra.mxu1 %v5461_v40  ;;  %5582 = vmatpush3.msra.mxu0 %v5420_v41 }
 0xb2e   : > { %5608 = vmatprep.subr.mxu1 %v5476_v42  ;;  %5583 = vmatprep.subr.mxu0 %v5435_v4 }
 0xb2f   : > { %5609 = vmatpush3.msra.mxu1 %v5460_v43  ;;  %5584 = vmatpush3.msra.mxu0 %v5419_v7 }
 0xb30   : > { %5610 = vmatprep.subr.mxu1 %v5475_v44  ;;  %5585 = vmatprep.subr.mxu0 %v5434_v8 }
 0xb31   : > { %5611 = vmatpush3.msra.mxu1 %v5459_v50  ;;  %5586 = vmatpush3.msra.mxu0 %v5418_v10 }
 0xb32   : > { %5612 = vmatprep.subr.mxu1 %v5474_v51  ;;  %5587 = vmatprep.subr.mxu0 %v5433_v12 }
 0xb33   : > { %5613 = vmatpush3.msra.mxu1 %v5458_v3  ;;  %5588 = vmatpush3.msra.mxu0 %v5417_v15 }
 0xb34   : > { %5614 = vmatprep.subr.mxu1 %v5473_v5  ;;  %5589 = vmatprep.subr.mxu0 %v5432_v27 }
 0xb35   : > { %5615 = vmatpush3.msra.mxu1 %v5457_v21  ;;  %5590 = vmatpush3.msra.mxu0 %v5416_v56 }
 0xb36   : > { %5616 = vmatprep.subr.mxu1 %v5472_v9  ;;  %5638 = vmatprep.subr.mxu0 %v6049_v0 }
 0xb37   : > { %5617 = vmatpush3.msra.mxu1 %v5456_v45 }
 0xb38   : > { %5618 = vmatprep.subr.mxu1 %v5471_v13 }
 0xb39   : > { %5619 = vmatpush3.msra.mxu1 %v5455_v16 }
 0xb3a   : > { %5620 = vmatprep.subr.mxu1 %v5470_v6 }
 0xb3b   : > { %5621 = vmatpush3.msra.mxu1 %v5454_v57 }
 0xb3c   : > { %5622 = vmatprep.subr.mxu1 %v5469_v26 }
 0xb3d   : > { %5623 = vmatpush3.msra.mxu1 %v5453_v28 }
 0xb3e   : > { %5624 = vmatprep.subr.mxu1 %v5468_v1 }
 0xb3f   : > { %5625 = vmatpush3.msra.mxu1 %v5452_v11 }
 0xbd4   : > { %v5556_v46 = vpop.f32.mrf.mxu0 }
 0xbd6   : > { %v5557_v18 = vpop.f32.mrf.mxu0 }
 0xbd7   : > { %v5558_v20 = vadd.f32 %v5557_v18, %v5556_v46 }
 0xbd8   : > { %v5521_v58 = vpop.f32.mrf.mxu1 }
 0xbda   : > { %v5522_v25 = vpop.f32.mrf.mxu1 }
 0xbdb   : > { %v5523_v61 = vadd.f32 %v5522_v25, %v5521_v58 }
 0xbdc   : > { %v4645_v24 = vpop.f32.mrf.mxu1 }
 0xbdd   : > { %v4571_v59 = vadd.f32 %v5558_v20, %v5523_v61 }
 0xbde   : > { %v4647_v48 = vpop.f32.mrf.mxu1 }
 0xbdf   : > { %4747 = vmatprep.mubr.f32.mxu0 %v4647_v48 }
 0xbe0   : > { %4748 = vmatmul.mubr.f32.vlgmr.msra.gmra.mxu0 %v4645_v24  ;;  %v4825_v52 = vpop.f32.mrf.mxu1 }
 0xbe1   : > { %5639 = vmatpush3.msra.mxu0 %v4942_v62  ;;  %5654 = vmatprep.mubr.msk.f32.mxu0 %vm6050_vm6, %v6049_v0 }
 0xbe2   : > { %v4827_v23 = vpop.f32.mrf.mxu1  ;;  %5640 = vmatprep.subr.mxu0 %v6049_v0 }
 0xbe3   : > { %4927 = vmatprep.mubr.f32.mxu1 %v4827_v23  ;;  %5641 = vmatpush3.msra.mxu0 %v4941_v53 }
 0xbe4   : > { %4928 = vmatmul.mubr.f32.vlgmr.msra.gmra.mxu1 %v4825_v52  ;;  %5642 = vmatprep.subr.mxu0 %v6049_v0 }
 0xbe5   : > { %5643 = vmatpush3.msra.mxu0 %v4940_v47 }
 0xbe6   : > { %5644 = vmatprep.subr.mxu0 %v6049_v0 }
 0xbe7   : > { %5645 = vmatpush3.msra.mxu0 %v4939_v54 }
 0xbe8   : > { %5646 = vmatprep.subr.mxu0 %v6049_v0 }
 0xbe9   : > { %5647 = vmatpush3.msra.mxu0 %v4938_v63 }
 0xbea   : > { %5648 = vmatprep.subr.mxu0 %v6049_v0 }
 0xbeb   : > { %5649 = vmatpush3.msra.mxu0 %v4937_v17 }
 0xbec   : > { %5650 = vmatprep.subr.mxu0 %v6049_v0 }
 0xbed   : > { %5651 = vmatpush3.msra.mxu0 %v4936_v2 }
 0xbee   : > { %5652 = vmatprep.subr.mxu0 %v6049_v0 }
 0xbef   : > { %5653 = vmatpush3.msra.mxu0 %v4935_v22 }
 0xca0   : > { %v5591_v29 = vpop.f32.mrf.mxu0 }
 0xca2   : > { %v5592_v19 = vpop.f32.mrf.mxu0 }
 0xca3   : > { %v5593_v30 = vadd.f32 %v5592_v19, %v5591_v29 }
 0xca4   : > { %v5626_v49 = vpop.f32.mrf.mxu1 }
 0xca5   : > { %v4753_v33 = vadd.f32 %v5593_v30, %v4571_v59 }
 0xca6   : > { %v5627_v31 = vpop.f32.mrf.mxu1 }
 0xca7   : > { %v5628_v55 = vadd.f32 %v5627_v31, %v5626_v49 }
 0xca9   : > { %v4933_v60 = vadd.f32 %v5628_v55, %v4753_v33 }
 0xcab   : > { %v4934_v36 = vmax.f32 %v4933_v60, 0.0 }
 0xcad   : > { %5655 = vmatmul.mubr.msk.f32.vlgmr.msra.gmra.mxu0 %vm538_vm0, %v4934_v36 }
 0xd6d   : > { %v5012_v0 = vpop.f32.mrf.mxu0 }
 0xd6e   : > { %5772 = vtanh.f32 %v5012_v0 }
 0xd6f   : > { %v5656_v14 = vpop.f32.mrf.mxu0 }
 0xd7b   : > { %v5773_v37 = vpop.eup %5772 }
 0xd7c   : > { %5018 = vst.msk [vmem:[%s517_s7] sm:$0x1] %vm5017_vm7, %v5773_v37 }
 0xd7d   : > { %5971 = shalt.err (!%p5968_p3)
}
 0xd7e   : > { %s5972_s28 = scalar_lea.hbm %s7743_s13, 16  ;;  %s5976_s15 = scalar_lea.hbm %s7792_s12, 32 }
 0xd7f   : > { %p5973_p6 = scmp.ne.s32.totalorder %s7743_s13, %s5972_s28  ;;  %p5977_p11 = scmp.lt.s32.totalorder %s7743_s13, %s7792_s12 }
 0xd80   : > { %p5978_p7 = scmp.lt.s32.totalorder %s5976_s15, %s5972_s28 }
 0xd81   : > { %p5974_p10 = pnand %p5973_p6, %p7829_p5 }
 0xd82   : > { %p5979_p0 = por %p5978_p7, %p5977_p11 }
 0xd83   : > { %p5975_p12 = pneg %p5974_p10 }
 0xd85   : > { %p5980_p2 = pnand %p5979_p0, %p5975_p12 }
 0xd87   : > { %5983 = shalt.err (!%p5980_p2)
}
 0xd88   : > { %5683 = dma.vmem_to_hbm [thread:$0]  (%p7829_p5), %s5033_s26, 16, %s7743_s13, %s5020_s1  }
 0xd89 PF: > { %s5044_s7 = sand.u32 1, %s6022_s21   ;;  %p7830_p8 = scmp.ne.s32.totalorder %s7817_s14, 0 }
 0xd8a   : > { %p7831_p9 = scmp.ge.s32.totalorder %s6034_s24, 2  ;;  %s5045_s8 = scalar_lea.sflag [#allocation4], %s5044_s7 }
 0xd8c   : > { %p5709_p4 = pnand %p7831_p9, %p7830_p8 }
 0xd8e   : > { %p5710_p13 = pneg %p5709_p4 }
 0xd90   : > { %6017 = dma.done.wait (%p5710_p13), %s5045_s8, 16  }
 0xd91   : > { %6019 = vsyncadd (%p5710_p13), %s5045_s8, 4294967280  ;;  %p28_p1 = scmp.ge.s32.totalorder %s6229_s16, 4   ;;  %s7832_s21 = smov %s6026_s22 }
 0xd92   : > { %s7833_s22 = smov %s6030_s23  ;;  %s7834_s23 = smov %s6240_s18 }
 0xd93   : > { %s7835_s24 = smov %s6229_s16  ;;  %30 = sbr.rel (!%p28_p1) target bundleno = 15 (0xf), region = 167 }
 0xd98   :  { %5049 = vsyncpa [#allocation3], 1 }
 0xd99   :  { %5051 = vsyncpa [#allocation3 + $0x1], 1 }
 0xd9a   :  { %5052 = vsyncpa [#allocation6], 1 }
 0xd9b   :  { %5053 = vsyncpa [#allocation9], 1 }
 0xd9c   :  { %5054 = vsyncpa [#allocation12], 1 }
 0xd9d   :  { %5055 = vsyncpa [#allocation4], 1 }
 0xd9e   :  { %5057 = vsyncpa [#allocation4 + $0x1], 1 }

</bundles_post_ra>
